<compile_context>
chip_gen: v5e
topology: v5e:2x2
jax: 0.10.0
libtpu: 0.0.40
codegen_flags: <defaults>
</compile_context>

<pallas_src>
import math

import jax
import jax.numpy as jnp
from jax import lax
from jax.experimental import pallas as pl
from jax.experimental.pallas import tpu as pltpu

# ----------------------------- model constants ------------------------------
EMBED_DIM = 128
DIM_1D = 52
HIDDEN = EMBED_DIM + DIM_1D        # 180 (= RetNet hidden_dim)
FFN = 360
LAYERS = 8
HEADS = 4
HEAD = HIDDEN // HEADS             # 45
ESM_DIM = 1280
EPS = 1e-5

# padded (lane-dense) sizes
HP = 256                           # padded hidden (180 -> 256)
HEADP = 64                         # padded per-head dim (45 -> 64)
HPH = HEADS * HEADP                # 256: concatenated padded head channels
FFNP = 384                         # padded FFN (360 -> 384)
VEC_W = FFNP                       # width of the packed per-layer vec tensor

# fixed RetNet decay gammas: 1 - exp(linspace(log(1/32), log(1/512), heads))
_GAMMAS = tuple(
    1.0 - math.exp(math.log(1.0 / 32.0)
                   + i * (math.log(1.0 / 512.0) - math.log(1.0 / 32.0))
                   / (HEADS - 1))
    for i in range(HEADS))
_LOG_GAMMAS = tuple(math.log(g) for g in _GAMMAS)


def _round_up(x, m):
    return ((x + m - 1) // m) * m


def _choose_tile(mp):
    # largest row tile (multiple of 8) that gives >= 2 grid steps if possible
    for t in (1024, 512, 256, 128, 64, 32, 16, 8):
        if mp % t == 0 and mp // t >= 2:
            return t
    return mp


def _choose_batch_tile(b, sp):
    # Fold batch elements into the matmul row dimension when S is small so the
    # MXU sees more than SP rows per matmul; if rows per step are already
    # large, keep batch un-folded so the "parallel" axis feeds megacore.
    if sp >= 128:
        return 1
    bt = 1
    for cand in range(1, b + 1):
        if b % cand == 0 and cand * sp <= 256:
            bt = cand
    return bt


# ----------------------------- Pallas kernels -------------------------------

def _esm_kernel(xe_ref, x1_ref, w_ref, vec_ref, o_ref):
    # Linear(1280->128) + ReLU + LayerNorm, fused with concat([esm, x_1d]) and
    # zero-pad to HP lanes.  vec rows: 0=bias, 1=ln_gamma, 2=ln_beta.
    vec = vec_ref[...]                                         # (8, 128) f32
    h = jnp.dot(xe_ref[...], w_ref[...],
                preferred_element_type=jnp.float32)            # bf16 x bf16 -> f32
    h = jnp.maximum(h + vec[0:1], 0.0)
    mu = jnp.mean(h, axis=-1, keepdims=True)
    d = h - mu
    var = jnp.mean(d * d, axis=-1, keepdims=True)
    o_ref[:, :EMBED_DIM] = d * lax.rsqrt(var + EPS) * vec[1:2] + vec[2:3]
    # x1_ref is already padded to 128 lanes (52 real + 76 zero) -> channels
    # [128:180) hold x_1d, [180:256) are zero.
    o_ref[:, EMBED_DIM:] = x1_ref[...]


def _retnet_kernel(x_ref, wqkv_ref, wg_ref, wo_ref, w1_ref, w2_ref,
                   vec_ref, o_ref, x_vmem):
    # One RetNet layer per grid step for a tile of Bt batch elements;
    # grid = (batch_tiles, layer).  Weight refs hold the full (LAYERS, ...)
    # stacks (constant index_map -> DMA'd once); the running activation is
    # carried in x_vmem across the layer axis.
    l = pl.program_id(1)
    bt, sp, _ = x_ref.shape
    r = bt * sp

    @pl.when(l == 0)
    def _():
        x_vmem[...] = x_ref[...].reshape(r, HP)

    x = x_vmem[...]                                            # (R, HP) f32
    vec = vec_ref[l]                                           # (8, VEC_W) f32

    cmask = (lax.broadcasted_iota(jnp.int32, (1, HP), 1) < HIDDEN
             ).astype(jnp.float32)

    def layer_norm(v, g, b):
        # statistics over the 180 true channels only; padded channels -> 0
        mu = jnp.sum(v * cmask, axis=-1, keepdims=True) * (1.0 / HIDDEN)
        d = (v - mu) * cmask
        var = jnp.sum(d * d, axis=-1, keepdims=True) * (1.0 / HIDDEN)
        return d * lax.rsqrt(var + EPS) * g + b

    # ---- MSR: LN1 -> fused QKV -> per-head retention + GroupNorm ----
    xn = layer_norm(x, vec[0:1, :HP], vec[1:2, :HP])
    xnb = xn.astype(jnp.bfloat16)

    qkv = jnp.dot(xnb, wqkv_ref[l],
                  preferred_element_type=jnp.float32)          # (R, 3*HPH)

    # block-diagonal causal mask over the bt folded batch elements (compares
    # only -- no vector integer division).
    ri = lax.broadcasted_iota(jnp.int32, (r, r), 0)
    ci = lax.broadcasted_iota(jnp.int32, (r, r), 1)
    same = ri < 0                                              # all-False
    for b in range(bt):
        lo, hi = b * sp, (b + 1) * sp
        same = same | ((ri >= lo) & (ri < hi) & (ci >= lo) & (ci < hi))
    causal = same & (ri >= ci)
    dist = jnp.where(causal, (ri - ci).astype(jnp.float32), 0.0)
    hmask = (lax.broadcasted_iota(jnp.int32, (1, HEADP), 1) < HEAD
             ).astype(jnp.float32)

    heads_out = []
    for h in range(HEADS):
        q = qkv[:, h * HEADP:(h + 1) * HEADP]
        k = qkv[:, HPH + h * HEADP:HPH + (h + 1) * HEADP]
        v = qkv[:, 2 * HPH + h * HEADP:2 * HPH + (h + 1) * HEADP]
        att = lax.dot_general(q, k, (((1,), (1,)), ((), ())),
                              preferred_element_type=jnp.float32)   # (R, R)
        # TODO(synk): for long S the decay could be a rank-1 row/col scaling of
        #             q/k (with block-relative normalization) instead of a
        #             full (R,R) exp; irrelevant at small R.
        decay = jnp.where(causal, jnp.exp(dist * _LOG_GAMMAS[h]), 0.0)
        ret = jnp.dot(att * decay, v,
                      preferred_element_type=jnp.float32)           # (R, HEADP)
        # GroupNorm group == head: stats over the 45 true channels
        mu = jnp.sum(ret * hmask, axis=-1, keepdims=True) * (1.0 / HEAD)
        d = (ret - mu) * hmask
        var = jnp.sum(d * d, axis=-1, keepdims=True) * (1.0 / HEAD)
        heads_out.append(d * lax.rsqrt(var + EPS))
    yn = jnp.concatenate(heads_out, axis=-1)                   # (R, HPH)
    yn = yn * vec[4:5, :HPH] + vec[5:6, :HPH]                  # GN affine

    # gated output projection: (swish(xn Wg) * GN(y)) Wo
    g = jnp.dot(xnb, wg_ref[l], preferred_element_type=jnp.float32)
    g = g * jax.nn.sigmoid(g)
    msr = jnp.dot((g * yn).astype(jnp.bfloat16), wo_ref[l],
                  preferred_element_type=jnp.float32)          # (R, HP)
    yres = msr + x                                             # Y = MSR(LN1(X)) + X

    # ---- FFN: LN2 -> GELU MLP -> residual ----
    yn2 = layer_norm(yres, vec[2:3, :HP], vec[3:4, :HP])
    h1 = jnp.dot(yn2.astype(jnp.bfloat16), w1_ref[l],
                 preferred_element_type=jnp.float32) + vec[7:8, :]
    # tanh-approx GELU (see TODO at top)
    h1 = 0.5 * h1 * (1.0 + jnp.tanh(0.7978845608028654
                                    * (h1 + 0.044715 * h1 * h1 * h1)))
    ffn = jnp.dot(h1.astype(jnp.bfloat16), w2_ref[l],
                  preferred_element_type=jnp.float32) + vec[6:7, :HP]
    x_new = ffn + yres                                         # X = FFN(LN2(Y)) + Y

    x_vmem[...] = x_new

    @pl.when(l == LAYERS - 1)
    def _():
        o_ref[...] = x_new.reshape(bt, sp, HP)


# ------------------------------ parameters ----------------------------------

def init_params(key):
    ks = jax.random.split(key, 2 + LAYERS * 9)
    it = iter(ks)

    def nk():
        return next(it)

    p = {
        "esm_w": jax.random.normal(nk(), (ESM_DIM, EMBED_DIM), jnp.float32)
                 * (1.0 / math.sqrt(ESM_DIM)),
        "esm_b": jax.random.normal(nk(), (1, EMBED_DIM), jnp.float32) * 0.01,
        "esm_ln_g": jnp.ones((1, EMBED_DIM), jnp.float32),
        "esm_ln_b": jnp.zeros((1, EMBED_DIM), jnp.float32),
    }
    layers = []
    for _ in range(LAYERS):
        layers.append({
            "wq": jax.random.normal(nk(), (HEADS, HIDDEN, HEAD), jnp.float32) / HIDDEN,
            "wk": jax.random.normal(nk(), (HEADS, HIDDEN, HEAD), jnp.float32) / HIDDEN,
            "wv": jax.random.normal(nk(), (HEADS, HIDDEN, HEAD), jnp.float32) / HIDDEN,
            "wg": jax.random.normal(nk(), (HIDDEN, HIDDEN), jnp.float32) / HIDDEN,
            "wo": jax.random.normal(nk(), (HIDDEN, HIDDEN), jnp.float32) / HIDDEN,
            "gn_w": jnp.ones((1, HIDDEN), jnp.float32),
            "gn_b": jnp.zeros((1, HIDDEN), jnp.float32),
            "ln1_g": jnp.ones((1, HIDDEN), jnp.float32),
            "ln1_b": jnp.zeros((1, HIDDEN), jnp.float32),
            "ln2_g": jnp.ones((1, HIDDEN), jnp.float32),
            "ln2_b": jnp.zeros((1, HIDDEN), jnp.float32),
            "ffn_w1": jax.random.normal(nk(), (HIDDEN, FFN), jnp.float32)
                      * (1.0 / math.sqrt(HIDDEN)),
            "ffn_b1": jax.random.normal(nk(), (1, FFN), jnp.float32) * 0.01,
            "ffn_w2": jax.random.normal(nk(), (FFN, HIDDEN), jnp.float32)
                      * (1.0 / math.sqrt(FFN)),
            "ffn_b2": jax.random.normal(nk(), (1, HIDDEN), jnp.float32) * 0.01,
        })
    p["layers"] = layers
    return p


def pack_params(p):
    """Pad / repack natural-shaped params into lane-dense kernel layouts."""
    f32, bf16 = jnp.float32, jnp.bfloat16

    esm_vec = jnp.zeros((8, EMBED_DIM), f32)
    esm_vec = esm_vec.at[0].set(p["esm_b"][0])
    esm_vec = esm_vec.at[1].set(p["esm_ln_g"][0])
    esm_vec = esm_vec.at[2].set(p["esm_ln_b"][0])

    def per_head_qkv(w):                       # (HEADS,HIDDEN,HEAD) -> (HP,HPH)
        out = jnp.zeros((HP, HPH), f32)
        for h in range(HEADS):
            out = out.at[:HIDDEN, h * HEADP:h * HEADP + HEAD].set(w[h])
        return out

    def head_cols(w):                          # (HIDDEN,HIDDEN) -> (HP,HPH)
        out = jnp.zeros((HP, HPH), f32)
        for h in range(HEADS):
            out = out.at[:HIDDEN, h * HEADP:h * HEADP + HEAD].set(
                w[:, h * HEAD:(h + 1) * HEAD])
        return out

    def head_rows(w):                          # (HIDDEN,HIDDEN) -> (HPH,HP)
        out = jnp.zeros((HPH, HP), f32)
        for h in range(HEADS):
            out = out.at[h * HEADP:h * HEADP + HEAD, :HIDDEN].set(
                w[h * HEAD:(h + 1) * HEAD, :])
        return out

    def head_vec(v):                           # (1,HIDDEN) -> (HPH,)
        out = jnp.zeros((HPH,), f32)
        for h in range(HEADS):
            out = out.at[h * HEADP:h * HEADP + HEAD].set(
                v[0, h * HEAD:(h + 1) * HEAD])
        return out

    wqkv_l, wg_l, wo_l, w1_l, w2_l, vec_l = [], [], [], [], [], []
    for lyr in p["layers"]:
        wqkv_l.append(jnp.concatenate(
            [per_head_qkv(lyr["wq"]), per_head_qkv(lyr["wk"]),
             per_head_qkv(lyr["wv"])], axis=1).astype(bf16))     # (HP, 3*HPH)
        wg_l.append(head_cols(lyr["wg"]).astype(bf16))            # (HP, HPH)
        wo_l.append(head_rows(lyr["wo"]).astype(bf16))            # (HPH, HP)
        w1_l.append(jnp.zeros((HP, FFNP), f32)
                    .at[:HIDDEN, :FFN].set(lyr["ffn_w1"]).astype(bf16))
        w2_l.append(jnp.zeros((FFNP, HP), f32)
                    .at[:FFN, :HIDDEN].set(lyr["ffn_w2"]).astype(bf16))

        vec = jnp.zeros((8, VEC_W), f32)
        vec = vec.at[0, :HIDDEN].set(lyr["ln1_g"][0])
        vec = vec.at[1, :HIDDEN].set(lyr["ln1_b"][0])
        vec = vec.at[2, :HIDDEN].set(lyr["ln2_g"][0])
        vec = vec.at[3, :HIDDEN].set(lyr["ln2_b"][0])
        vec = vec.at[4, :HPH].set(head_vec(lyr["gn_w"]))
        vec = vec.at[5, :HPH].set(head_vec(lyr["gn_b"]))
        vec = vec.at[6, :HIDDEN].set(lyr["ffn_b2"][0])
        vec = vec.at[7, :FFN].set(lyr["ffn_b1"][0])               # b1 folded in
        vec_l.append(vec)

    return {
        "esm_w": p["esm_w"].astype(bf16),
        "esm_vec": esm_vec,
        "wqkv": jnp.stack(wqkv_l),        # (L, HP, 3*HPH) bf16
        "wg": jnp.stack(wg_l),            # (L, HP, HPH)    bf16
        "wo": jnp.stack(wo_l),            # (L, HPH, HP)    bf16
        "w1": jnp.stack(w1_l),            # (L, HP, FFNP)   bf16
        "w2": jnp.stack(w2_l),            # (L, FFNP, HP)   bf16
        "vec": jnp.stack(vec_l),          # (L, 8, VEC_W)   f32
    }


# -------------------------------- forward -----------------------------------

def forward(packed, x_esm, x_1d):
    B, S, _ = x_esm.shape
    M = B * S
    MP = _round_up(M, 8)
    SP = _round_up(S, 8)
    TILE_M = _choose_tile(MP)
    BT = _choose_batch_tile(B, SP)

    # bf16 input for the 1280-wide ESM activations (halves their HBM traffic);
    # the 52-wide x_1d stays f32 since it is copied verbatim into the output.
    xe = jnp.pad(x_esm.reshape(M, ESM_DIM), ((0, MP - M), (0, 0))
                 ).astype(jnp.bfloat16)
    x1 = jnp.pad(x_1d.reshape(M, DIM_1D).astype(jnp.float32),
                 ((0, MP - M), (0, (HP - EMBED_DIM) - DIM_1D)))

    # --- ESM transform + concat + pad, tiled over rows ---
    e = pl.pallas_call(
        _esm_kernel,
        out_shape=jax.ShapeDtypeStruct((MP, HP), jnp.float32),
        grid=(MP // TILE_M,),
        in_specs=[
            pl.BlockSpec((TILE_M, ESM_DIM), lambda i: (i, 0)),
            pl.BlockSpec((TILE_M, HP - EMBED_DIM), lambda i: (i, 0)),
            pl.BlockSpec((ESM_DIM, EMBED_DIM), lambda i: (0, 0)),
            pl.BlockSpec((8, EMBED_DIM), lambda i: (0, 0)),
        ],
        out_specs=pl.BlockSpec((TILE_M, HP), lambda i: (i, 0)),
        compiler_params=pltpu.CompilerParams(
            dimension_semantics=("parallel",)),
    )(xe, x1, packed["esm_w"], packed["esm_vec"])

    x0 = e[:M].reshape(B, S, HP)
    if SP > S:
        x0 = jnp.pad(x0, ((0, 0), (0, SP - S), (0, 0)))

    # --- all 8 RetNet layers in one kernel: grid = (batch_tiles, layer).
    # Weight stacks use constant index_maps -> DMA'd to VMEM once (~8 MiB bf16
    # total, ~16 MiB with default double buffering), instead of re-streamed
    # per (batch, layer) step.
    out = pl.pallas_call(
        _retnet_kernel,
        out_shape=jax.ShapeDtypeStruct((B, SP, HP), jnp.float32),
        grid=(B // BT, LAYERS),
        in_specs=[
            pl.BlockSpec((BT, SP, HP), lambda b, l: (b, 0, 0)),
            pl.BlockSpec((LAYERS, HP, 3 * HPH), lambda b, l: (0, 0, 0)),
            pl.BlockSpec((LAYERS, HP, HPH), lambda b, l: (0, 0, 0)),
            pl.BlockSpec((LAYERS, HPH, HP), lambda b, l: (0, 0, 0)),
            pl.BlockSpec((LAYERS, HP, FFNP), lambda b, l: (0, 0, 0)),
            pl.BlockSpec((LAYERS, FFNP, HP), lambda b, l: (0, 0, 0)),
            pl.BlockSpec((LAYERS, 8, VEC_W), lambda b, l: (0, 0, 0)),
        ],
        out_specs=pl.BlockSpec((BT, SP, HP), lambda b, l: (b, 0, 0)),
        scratch_shapes=[pltpu.VMEM((BT * SP, HP), jnp.float32)],
        compiler_params=pltpu.CompilerParams(
            dimension_semantics=("parallel", "arbitrary"),
            # explicit limit: above v5e's 16 MiB / v7x's 32 MiB scoped
            # defaults, below v7x's 64 MiB physical VMEM.
            vmem_limit_bytes=40 * 1024 * 1024),
    )(x0, packed["wqkv"], packed["wg"], packed["wo"], packed["w1"],
      packed["w2"], packed["vec"])

    return out[:, :S, :HIDDEN]


# ---------------------------------- main -------------------------------------

if __name__ == "__main__":
    key = jax.random.PRNGKey(0)
    kp, k1, k2 = jax.random.split(key, 3)
    params = init_params(kp)
    packed = pack_params(params)

    B, S = 2, 8
    x_esm = jax.random.normal(k1, (B, S, ESM_DIM), dtype=jnp.float32)
    x_1d = jax.random.normal(k2, (B, S, DIM_1D), dtype=jnp.float32)

    out = jax.jit(forward)(packed, x_esm, x_1d)
    out = jax.block_until_ready(out)
    assert out.shape == (B, S, HIDDEN), out.shape
    assert bool(jnp.all(jnp.isfinite(out)))
    print("KERNEL_OK")
</pallas_src>

<mosaic_0001>
module attributes {stable_mosaic.version = 11 : i64} {
  func.func @_retnet_kernel(%arg0: i32, %arg1: i32, %arg2: memref<2x8x256xf32, #tpu.memory_space<vmem>>, %arg3: memref<8x256x768xbf16, #tpu.memory_space<vmem>>, %arg4: memref<8x256x256xbf16, #tpu.memory_space<vmem>>, %arg5: memref<8x256x256xbf16, #tpu.memory_space<vmem>>, %arg6: memref<8x256x384xbf16, #tpu.memory_space<vmem>>, %arg7: memref<8x384x256xbf16, #tpu.memory_space<vmem>>, %arg8: memref<8x8x384xf32, #tpu.memory_space<vmem>>, %arg9: memref<2x8x256xf32, #tpu.memory_space<vmem>>, %arg10: memref<16x256xf32, #tpu.memory_space<vmem>>) attributes {dimension_semantics = [#tpu.dimension_semantics<parallel>, #tpu.dimension_semantics<arbitrary>], iteration_bounds = array<i64: 1, 8>, scalar_prefetch = 0 : i64, scratch_operands = 1 : i64, tpu.core_type = #tpu.core_type<tc>, window_params = [{transform_indices = @transform_0, window_bounds = array<i64: 2, 8, 256>}, {pipeline_mode = #tpu.pipeline_mode<synchronous>, transform_indices = @transform_1, window_bounds = array<i64: 8, 256, 768>}, {pipeline_mode = #tpu.pipeline_mode<synchronous>, transform_indices = @transform_2, window_bounds = array<i64: 8, 256, 256>}, {pipeline_mode = #tpu.pipeline_mode<synchronous>, transform_indices = @transform_3, window_bounds = array<i64: 8, 256, 256>}, {pipeline_mode = #tpu.pipeline_mode<synchronous>, transform_indices = @transform_4, window_bounds = array<i64: 8, 256, 384>}, {pipeline_mode = #tpu.pipeline_mode<synchronous>, transform_indices = @transform_5, window_bounds = array<i64: 8, 384, 256>}, {pipeline_mode = #tpu.pipeline_mode<synchronous>, transform_indices = @transform_6, window_bounds = array<i64: 8, 8, 384>}, {transform_indices = @transform_7, window_bounds = array<i64: 2, 8, 256>}]} {
    %c0_i32 = arith.constant 0 : i32
    %0 = arith.cmpi eq, %arg1, %c0_i32 : i32
    %1 = arith.extui %0 : i1 to i32
    %c0_i32_0 = arith.constant 0 : i32
    %2 = arith.cmpi ne, %1, %c0_i32_0 : i32
    scf.if %2 {
      %c0_80 = arith.constant 0 : index
      %c0_81 = arith.constant 0 : index
      %c0_82 = arith.constant 0 : index
      %290 = vector.load %arg2[%c0_80, %c0_81, %c0_82] : memref<2x8x256xf32, #tpu.memory_space<vmem>>, vector<2x8x256xf32>
      %291 = vector.shape_cast %290 : vector<2x8x256xf32> to vector<16x256xf32>
      %c0_83 = arith.constant 0 : index
      %c0_84 = arith.constant 0 : index
      %292 = vector.load %arg10[%c0_83, %c0_84] : memref<16x256xf32, #tpu.memory_space<vmem>>, vector<16x256xf32>
      tpu.vector_store %arg10[%c0_83, %c0_84], %291 {strides = array<i32>} : memref<16x256xf32, #tpu.memory_space<vmem>>, vector<16x256xf32>,
    } else {
    }
    %c0 = arith.constant 0 : index
    %c0_1 = arith.constant 0 : index
    %3 = vector.load %arg10[%c0, %c0_1] : memref<16x256xf32, #tpu.memory_space<vmem>>, vector<16x256xf32>
    %4 = arith.index_cast %arg1 : i32 to index
    %c0_2 = arith.constant 0 : index
    %c0_3 = arith.constant 0 : index
    %5 = vector.load %arg8[%4, %c0_2, %c0_3] : memref<8x8x384xf32, #tpu.memory_space<vmem>>, vector<1x8x384xf32>
    %6 = vector.shape_cast %5 : vector<1x8x384xf32> to vector<8x384xf32>
    %7 = tpu.iota {dimensions = array<i32: 1>} : vector<1x256xi32>
    %c180_i32 = arith.constant 180 : i32
    %8 = vector.broadcast %c180_i32 : i32 to vector<1x256xi32>
    %9 = arith.cmpi slt, %7, %8 : vector<1x256xi32>
    %10 = arith.extui %9 : vector<1x256xi1> to vector<1x256xi32>
    %11 = arith.sitofp %10 : vector<1x256xi32> to vector<1x256xf32>
    %12 = vector.extract_strided_slice %6 {offsets = [0, 0], sizes = [1, 256], strides = [1, 1]} : vector<8x384xf32> to vector<1x256xf32>
    %13 = vector.extract_strided_slice %6 {offsets = [1, 0], sizes = [1, 256], strides = [1, 1]} : vector<8x384xf32> to vector<1x256xf32>
    %14 = vector.broadcast %11 : vector<1x256xf32> to vector<16x256xf32>
    %15 = arith.mulf %3, %14 : vector<16x256xf32>
    %cst = arith.constant dense<0.000000e+00> : vector<16xf32>
    %16 = vector.multi_reduction <add>, %15, %cst [1] : vector<16x256xf32> to vector<16xf32>
    %17 = vector.shape_cast %16 : vector<16xf32> to vector<16x1xf32>
    %cst_4 = arith.constant 0.00555555569 : f32
    %18 = vector.broadcast %cst_4 : f32 to vector<16x1xf32>
    %19 = arith.mulf %17, %18 : vector<16x1xf32>
    %20 = vector.broadcast %19 : vector<16x1xf32> to vector<16x256xf32>
    %21 = arith.subf %3, %20 : vector<16x256xf32>
    %22 = vector.broadcast %11 : vector<1x256xf32> to vector<16x256xf32>
    %23 = arith.mulf %21, %22 : vector<16x256xf32>
    %24 = arith.mulf %23, %23 : vector<16x256xf32>
    %cst_5 = arith.constant dense<0.000000e+00> : vector<16xf32>
    %25 = vector.multi_reduction <add>, %24, %cst_5 [1] : vector<16x256xf32> to vector<16xf32>
    %26 = vector.shape_cast %25 : vector<16xf32> to vector<16x1xf32>
    %cst_6 = arith.constant 0.00555555569 : f32
    %27 = vector.broadcast %cst_6 : f32 to vector<16x1xf32>
    %28 = arith.mulf %26, %27 : vector<16x1xf32>
    %cst_7 = arith.constant 9.99999974E-6 : f32
    %29 = vector.broadcast %cst_7 : f32 to vector<16x1xf32>
    %30 = arith.addf %28, %29 : vector<16x1xf32>
    %31 = math.rsqrt %30 : vector<16x1xf32>
    %32 = vector.broadcast %31 : vector<16x1xf32> to vector<16x256xf32>
    %33 = arith.mulf %23, %32 : vector<16x256xf32>
    %34 = vector.broadcast %12 : vector<1x256xf32> to vector<16x256xf32>
    %35 = arith.mulf %33, %34 : vector<16x256xf32>
    %36 = vector.broadcast %13 : vector<1x256xf32> to vector<16x256xf32>
    %37 = arith.addf %35, %36 : vector<16x256xf32>
    %38 = arith.truncf %37 : vector<16x256xf32> to vector<16x256xbf16>
    %39 = arith.index_cast %arg1 : i32 to index
    %c0_8 = arith.constant 0 : index
    %c0_9 = arith.constant 0 : index
    %40 = vector.load %arg3[%39, %c0_8, %c0_9] : memref<8x256x768xbf16, #tpu.memory_space<vmem>>, vector<1x256x768xbf16>
    %41 = vector.shape_cast %40 : vector<1x256x768xbf16> to vector<256x768xbf16>
    %cst_10 = arith.constant dense<0.000000e+00> : vector<16x768xf32>
    %42 = tpu.matmul %38, %41, %cst_10 {dimension_numbers = #tpu.dot_dimension_numbers<[1], [0], [0], [1], [0, 0, 1, 1], [], []>} : vector<16x256xbf16>, vector<256x768xbf16>, vector<16x768xf32> -> vector<16x768xf32>
    %43 = tpu.iota {dimensions = array<i32: 0>} : vector<16x16xi32>
    %44 = tpu.iota {dimensions = array<i32: 1>} : vector<16x16xi32>
    %c0_i32_11 = arith.constant 0 : i32
    %45 = vector.broadcast %c0_i32_11 : i32 to vector<16x16xi32>
    %46 = arith.cmpi slt, %43, %45 : vector<16x16xi32>
    %c0_i32_12 = arith.constant 0 : i32
    %47 = vector.broadcast %c0_i32_12 : i32 to vector<16x16xi32>
    %48 = arith.cmpi sge, %43, %47 : vector<16x16xi32>
    %c8_i32 = arith.constant 8 : i32
    %49 = vector.broadcast %c8_i32 : i32 to vector<16x16xi32>
    %50 = arith.cmpi slt, %43, %49 : vector<16x16xi32>
    %51 = arith.andi %48, %50 : vector<16x16xi1>
    %c0_i32_13 = arith.constant 0 : i32
    %52 = vector.broadcast %c0_i32_13 : i32 to vector<16x16xi32>
    %53 = arith.cmpi sge, %44, %52 : vector<16x16xi32>
    %54 = arith.andi %51, %53 : vector<16x16xi1>
    %c8_i32_14 = arith.constant 8 : i32
    %55 = vector.broadcast %c8_i32_14 : i32 to vector<16x16xi32>
    %56 = arith.cmpi slt, %44, %55 : vector<16x16xi32>
    %57 = arith.andi %54, %56 : vector<16x16xi1>
    %58 = arith.ori %46, %57 : vector<16x16xi1>
    %c8_i32_15 = arith.constant 8 : i32
    %59 = vector.broadcast %c8_i32_15 : i32 to vector<16x16xi32>
    %60 = arith.cmpi sge, %43, %59 : vector<16x16xi32>
    %c16_i32 = arith.constant 16 : i32
    %61 = vector.broadcast %c16_i32 : i32 to vector<16x16xi32>
    %62 = arith.cmpi slt, %43, %61 : vector<16x16xi32>
    %63 = arith.andi %60, %62 : vector<16x16xi1>
    %c8_i32_16 = arith.constant 8 : i32
    %64 = vector.broadcast %c8_i32_16 : i32 to vector<16x16xi32>
    %65 = arith.cmpi sge, %44, %64 : vector<16x16xi32>
    %66 = arith.andi %63, %65 : vector<16x16xi1>
    %c16_i32_17 = arith.constant 16 : i32
    %67 = vector.broadcast %c16_i32_17 : i32 to vector<16x16xi32>
    %68 = arith.cmpi slt, %44, %67 : vector<16x16xi32>
    %69 = arith.andi %66, %68 : vector<16x16xi1>
    %70 = arith.ori %58, %69 : vector<16x16xi1>
    %71 = arith.cmpi sge, %43, %44 : vector<16x16xi32>
    %72 = arith.andi %70, %71 : vector<16x16xi1>
    %73 = arith.subi %43, %44 : vector<16x16xi32>
    %74 = arith.sitofp %73 : vector<16x16xi32> to vector<16x16xf32>
    %cst_18 = arith.constant 0.000000e+00 : f32
    %75 = vector.broadcast %cst_18 : f32 to vector<16x16xf32>
    %76 = arith.select %72, %74, %75 : vector<16x16xi1>, vector<16x16xf32>
    %77 = tpu.iota {dimensions = array<i32: 1>} : vector<1x64xi32>
    %c45_i32 = arith.constant 45 : i32
    %78 = vector.broadcast %c45_i32 : i32 to vector<1x64xi32>
    %79 = arith.cmpi slt, %77, %78 : vector<1x64xi32>
    %80 = arith.extui %79 : vector<1x64xi1> to vector<1x64xi32>
    %81 = arith.sitofp %80 : vector<1x64xi32> to vector<1x64xf32>
    %82 = vector.extract_strided_slice %42 {offsets = [0, 0], sizes = [16, 64], strides = [1, 1]} : vector<16x768xf32> to vector<16x64xf32>
    %83 = vector.extract_strided_slice %42 {offsets = [0, 256], sizes = [16, 64], strides = [1, 1]} : vector<16x768xf32> to vector<16x64xf32>
    %84 = vector.extract_strided_slice %42 {offsets = [0, 512], sizes = [16, 64], strides = [1, 1]} : vector<16x768xf32> to vector<16x64xf32>
    %cst_19 = arith.constant dense<0.000000e+00> : vector<16x16xf32>
    %85 = tpu.matmul %82, %83, %cst_19 {dimension_numbers = #tpu.dot_dimension_numbers<[1], [1], [0], [0], [0, 0, 1, 0], [], []>} : vector<16x64xf32>, vector<16x64xf32>, vector<16x16xf32> -> vector<16x16xf32>
    %cst_20 = arith.constant -0.0317486972 : f32
    %86 = vector.broadcast %cst_20 : f32 to vector<16x16xf32>
    %87 = arith.mulf %76, %86 : vector<16x16xf32>
    %88 = math.exp %87 : vector<16x16xf32>
    %cst_21 = arith.constant 0.000000e+00 : f32
    %89 = vector.broadcast %cst_21 : f32 to vector<16x16xf32>
    %90 = arith.select %72, %88, %89 : vector<16x16xi1>, vector<16x16xf32>
    %91 = arith.mulf %85, %90 : vector<16x16xf32>
    %cst_22 = arith.constant dense<0.000000e+00> : vector<16x64xf32>
    %92 = tpu.matmul %91, %84, %cst_22 {dimension_numbers = #tpu.dot_dimension_numbers<[1], [0], [0], [1], [0, 0, 1, 1], [], []>} : vector<16x16xf32>, vector<16x64xf32>, vector<16x64xf32> -> vector<16x64xf32>
    %93 = vector.broadcast %81 : vector<1x64xf32> to vector<16x64xf32>
    %94 = arith.mulf %92, %93 : vector<16x64xf32>
    %cst_23 = arith.constant dense<0.000000e+00> : vector<16xf32>
    %95 = vector.multi_reduction <add>, %94, %cst_23 [1] : vector<16x64xf32> to vector<16xf32>
    %96 = vector.shape_cast %95 : vector<16xf32> to vector<16x1xf32>
    %cst_24 = arith.constant 0.0222222228 : f32
    %97 = vector.broadcast %cst_24 : f32 to vector<16x1xf32>
    %98 = arith.mulf %96, %97 : vector<16x1xf32>
    %99 = vector.broadcast %98 : vector<16x1xf32> to vector<16x64xf32>
    %100 = arith.subf %92, %99 : vector<16x64xf32>
    %101 = vector.broadcast %81 : vector<1x64xf32> to vector<16x64xf32>
    %102 = arith.mulf %100, %101 : vector<16x64xf32>
    %103 = arith.mulf %102, %102 : vector<16x64xf32>
    %cst_25 = arith.constant dense<0.000000e+00> : vector<16xf32>
    %104 = vector.multi_reduction <add>, %103, %cst_25 [1] : vector<16x64xf32> to vector<16xf32>
    %105 = vector.shape_cast %104 : vector<16xf32> to vector<16x1xf32>
    %cst_26 = arith.constant 0.0222222228 : f32
    %106 = vector.broadcast %cst_26 : f32 to vector<16x1xf32>
    %107 = arith.mulf %105, %106 : vector<16x1xf32>
    %cst_27 = arith.constant 9.99999974E-6 : f32
    %108 = vector.broadcast %cst_27 : f32 to vector<16x1xf32>
    %109 = arith.addf %107, %108 : vector<16x1xf32>
    %110 = math.rsqrt %109 : vector<16x1xf32>
    %111 = vector.broadcast %110 : vector<16x1xf32> to vector<16x64xf32>
    %112 = arith.mulf %102, %111 : vector<16x64xf32>
    %113 = vector.extract_strided_slice %42 {offsets = [0, 64], sizes = [16, 64], strides = [1, 1]} : vector<16x768xf32> to vector<16x64xf32>
    %114 = vector.extract_strided_slice %42 {offsets = [0, 320], sizes = [16, 64], strides = [1, 1]} : vector<16x768xf32> to vector<16x64xf32>
    %115 = vector.extract_strided_slice %42 {offsets = [0, 576], sizes = [16, 64], strides = [1, 1]} : vector<16x768xf32> to vector<16x64xf32>
    %cst_28 = arith.constant dense<0.000000e+00> : vector<16x16xf32>
    %116 = tpu.matmul %113, %114, %cst_28 {dimension_numbers = #tpu.dot_dimension_numbers<[1], [1], [0], [0], [0, 0, 1, 0], [], []>} : vector<16x64xf32>, vector<16x64xf32>, vector<16x16xf32> -> vector<16x16xf32>
    %cst_29 = arith.constant -0.0124791116 : f32
    %117 = vector.broadcast %cst_29 : f32 to vector<16x16xf32>
    %118 = arith.mulf %76, %117 : vector<16x16xf32>
    %119 = math.exp %118 : vector<16x16xf32>
    %cst_30 = arith.constant 0.000000e+00 : f32
    %120 = vector.broadcast %cst_30 : f32 to vector<16x16xf32>
    %121 = arith.select %72, %119, %120 : vector<16x16xi1>, vector<16x16xf32>
    %122 = arith.mulf %116, %121 : vector<16x16xf32>
    %cst_31 = arith.constant dense<0.000000e+00> : vector<16x64xf32>
    %123 = tpu.matmul %122, %115, %cst_31 {dimension_numbers = #tpu.dot_dimension_numbers<[1], [0], [0], [1], [0, 0, 1, 1], [], []>} : vector<16x16xf32>, vector<16x64xf32>, vector<16x64xf32> -> vector<16x64xf32>
    %124 = vector.broadcast %81 : vector<1x64xf32> to vector<16x64xf32>
    %125 = arith.mulf %123, %124 : vector<16x64xf32>
    %cst_32 = arith.constant dense<0.000000e+00> : vector<16xf32>
    %126 = vector.multi_reduction <add>, %125, %cst_32 [1] : vector<16x64xf32> to vector<16xf32>
    %127 = vector.shape_cast %126 : vector<16xf32> to vector<16x1xf32>
    %cst_33 = arith.constant 0.0222222228 : f32
    %128 = vector.broadcast %cst_33 : f32 to vector<16x1xf32>
    %129 = arith.mulf %127, %128 : vector<16x1xf32>
    %130 = vector.broadcast %129 : vector<16x1xf32> to vector<16x64xf32>
    %131 = arith.subf %123, %130 : vector<16x64xf32>
    %132 = vector.broadcast %81 : vector<1x64xf32> to vector<16x64xf32>
    %133 = arith.mulf %131, %132 : vector<16x64xf32>
    %134 = arith.mulf %133, %133 : vector<16x64xf32>
    %cst_34 = arith.constant dense<0.000000e+00> : vector<16xf32>
    %135 = vector.multi_reduction <add>, %134, %cst_34 [1] : vector<16x64xf32> to vector<16xf32>
    %136 = vector.shape_cast %135 : vector<16xf32> to vector<16x1xf32>
    %cst_35 = arith.constant 0.0222222228 : f32
    %137 = vector.broadcast %cst_35 : f32 to vector<16x1xf32>
    %138 = arith.mulf %136, %137 : vector<16x1xf32>
    %cst_36 = arith.constant 9.99999974E-6 : f32
    %139 = vector.broadcast %cst_36 : f32 to vector<16x1xf32>
    %140 = arith.addf %138, %139 : vector<16x1xf32>
    %141 = math.rsqrt %140 : vector<16x1xf32>
    %142 = vector.broadcast %141 : vector<16x1xf32> to vector<16x64xf32>
    %143 = arith.mulf %133, %142 : vector<16x64xf32>
    %144 = vector.extract_strided_slice %42 {offsets = [0, 128], sizes = [16, 64], strides = [1, 1]} : vector<16x768xf32> to vector<16x64xf32>
    %145 = vector.extract_strided_slice %42 {offsets = [0, 384], sizes = [16, 64], strides = [1, 1]} : vector<16x768xf32> to vector<16x64xf32>
    %146 = vector.extract_strided_slice %42 {offsets = [0, 640], sizes = [16, 64], strides = [1, 1]} : vector<16x768xf32> to vector<16x64xf32>
    %cst_37 = arith.constant dense<0.000000e+00> : vector<16x16xf32>
    %147 = tpu.matmul %144, %145, %cst_37 {dimension_numbers = #tpu.dot_dimension_numbers<[1], [1], [0], [0], [0, 0, 1, 0], [], []>} : vector<16x64xf32>, vector<16x64xf32>, vector<16x16xf32> -> vector<16x16xf32>
    %cst_38 = arith.constant -0.00493371719 : f32
    %148 = vector.broadcast %cst_38 : f32 to vector<16x16xf32>
    %149 = arith.mulf %76, %148 : vector<16x16xf32>
    %150 = math.exp %149 : vector<16x16xf32>
    %cst_39 = arith.constant 0.000000e+00 : f32
    %151 = vector.broadcast %cst_39 : f32 to vector<16x16xf32>
    %152 = arith.select %72, %150, %151 : vector<16x16xi1>, vector<16x16xf32>
    %153 = arith.mulf %147, %152 : vector<16x16xf32>
    %cst_40 = arith.constant dense<0.000000e+00> : vector<16x64xf32>
    %154 = tpu.matmul %153, %146, %cst_40 {dimension_numbers = #tpu.dot_dimension_numbers<[1], [0], [0], [1], [0, 0, 1, 1], [], []>} : vector<16x16xf32>, vector<16x64xf32>, vector<16x64xf32> -> vector<16x64xf32>
    %155 = vector.broadcast %81 : vector<1x64xf32> to vector<16x64xf32>
    %156 = arith.mulf %154, %155 : vector<16x64xf32>
    %cst_41 = arith.constant dense<0.000000e+00> : vector<16xf32>
    %157 = vector.multi_reduction <add>, %156, %cst_41 [1] : vector<16x64xf32> to vector<16xf32>
    %158 = vector.shape_cast %157 : vector<16xf32> to vector<16x1xf32>
    %cst_42 = arith.constant 0.0222222228 : f32
    %159 = vector.broadcast %cst_42 : f32 to vector<16x1xf32>
    %160 = arith.mulf %158, %159 : vector<16x1xf32>
    %161 = vector.broadcast %160 : vector<16x1xf32> to vector<16x64xf32>
    %162 = arith.subf %154, %161 : vector<16x64xf32>
    %163 = vector.broadcast %81 : vector<1x64xf32> to vector<16x64xf32>
    %164 = arith.mulf %162, %163 : vector<16x64xf32>
    %165 = arith.mulf %164, %164 : vector<16x64xf32>
    %cst_43 = arith.constant dense<0.000000e+00> : vector<16xf32>
    %166 = vector.multi_reduction <add>, %165, %cst_43 [1] : vector<16x64xf32> to vector<16xf32>
    %167 = vector.shape_cast %166 : vector<16xf32> to vector<16x1xf32>
    %cst_44 = arith.constant 0.0222222228 : f32
    %168 = vector.broadcast %cst_44 : f32 to vector<16x1xf32>
    %169 = arith.mulf %167, %168 : vector<16x1xf32>
    %cst_45 = arith.constant 9.99999974E-6 : f32
    %170 = vector.broadcast %cst_45 : f32 to vector<16x1xf32>
    %171 = arith.addf %169, %170 : vector<16x1xf32>
    %172 = math.rsqrt %171 : vector<16x1xf32>
    %173 = vector.broadcast %172 : vector<16x1xf32> to vector<16x64xf32>
    %174 = arith.mulf %164, %173 : vector<16x64xf32>
    %175 = vector.extract_strided_slice %42 {offsets = [0, 192], sizes = [16, 64], strides = [1, 1]} : vector<16x768xf32> to vector<16x64xf32>
    %176 = vector.extract_strided_slice %42 {offsets = [0, 448], sizes = [16, 64], strides = [1, 1]} : vector<16x768xf32> to vector<16x64xf32>
    %177 = vector.extract_strided_slice %42 {offsets = [0, 704], sizes = [16, 64], strides = [1, 1]} : vector<16x768xf32> to vector<16x64xf32>
    %cst_46 = arith.constant dense<0.000000e+00> : vector<16x16xf32>
    %178 = tpu.matmul %175, %176, %cst_46 {dimension_numbers = #tpu.dot_dimension_numbers<[1], [1], [0], [0], [0, 0, 1, 0], [], []>} : vector<16x64xf32>, vector<16x64xf32>, vector<16x16xf32> -> vector<16x16xf32>
    %cst_47 = arith.constant -0.00195503491 : f32
    %179 = vector.broadcast %cst_47 : f32 to vector<16x16xf32>
    %180 = arith.mulf %76, %179 : vector<16x16xf32>
    %181 = math.exp %180 : vector<16x16xf32>
    %cst_48 = arith.constant 0.000000e+00 : f32
    %182 = vector.broadcast %cst_48 : f32 to vector<16x16xf32>
    %183 = arith.select %72, %181, %182 : vector<16x16xi1>, vector<16x16xf32>
    %184 = arith.mulf %178, %183 : vector<16x16xf32>
    %cst_49 = arith.constant dense<0.000000e+00> : vector<16x64xf32>
    %185 = tpu.matmul %184, %177, %cst_49 {dimension_numbers = #tpu.dot_dimension_numbers<[1], [0], [0], [1], [0, 0, 1, 1], [], []>} : vector<16x16xf32>, vector<16x64xf32>, vector<16x64xf32> -> vector<16x64xf32>
    %186 = vector.broadcast %81 : vector<1x64xf32> to vector<16x64xf32>
    %187 = arith.mulf %185, %186 : vector<16x64xf32>
    %cst_50 = arith.constant dense<0.000000e+00> : vector<16xf32>
    %188 = vector.multi_reduction <add>, %187, %cst_50 [1] : vector<16x64xf32> to vector<16xf32>
    %189 = vector.shape_cast %188 : vector<16xf32> to vector<16x1xf32>
    %cst_51 = arith.constant 0.0222222228 : f32
    %190 = vector.broadcast %cst_51 : f32 to vector<16x1xf32>
    %191 = arith.mulf %189, %190 : vector<16x1xf32>
    %192 = vector.broadcast %191 : vector<16x1xf32> to vector<16x64xf32>
    %193 = arith.subf %185, %192 : vector<16x64xf32>
    %194 = vector.broadcast %81 : vector<1x64xf32> to vector<16x64xf32>
    %195 = arith.mulf %193, %194 : vector<16x64xf32>
    %196 = arith.mulf %195, %195 : vector<16x64xf32>
    %cst_52 = arith.constant dense<0.000000e+00> : vector<16xf32>
    %197 = vector.multi_reduction <add>, %196, %cst_52 [1] : vector<16x64xf32> to vector<16xf32>
    %198 = vector.shape_cast %197 : vector<16xf32> to vector<16x1xf32>
    %cst_53 = arith.constant 0.0222222228 : f32
    %199 = vector.broadcast %cst_53 : f32 to vector<16x1xf32>
    %200 = arith.mulf %198, %199 : vector<16x1xf32>
    %cst_54 = arith.constant 9.99999974E-6 : f32
    %201 = vector.broadcast %cst_54 : f32 to vector<16x1xf32>
    %202 = arith.addf %200, %201 : vector<16x1xf32>
    %203 = math.rsqrt %202 : vector<16x1xf32>
    %204 = vector.broadcast %203 : vector<16x1xf32> to vector<16x64xf32>
    %205 = arith.mulf %195, %204 : vector<16x64xf32>
    %206 = tpu.concatenate %112, %143, %174, %205 in 1 : vector<16x64xf32>, vector<16x64xf32>, vector<16x64xf32>, vector<16x64xf32> -> vector<16x256xf32>
    %207 = vector.extract_strided_slice %6 {offsets = [4, 0], sizes = [1, 256], strides = [1, 1]} : vector<8x384xf32> to vector<1x256xf32>
    %208 = vector.broadcast %207 : vector<1x256xf32> to vector<16x256xf32>
    %209 = arith.mulf %206, %208 : vector<16x256xf32>
    %210 = vector.extract_strided_slice %6 {offsets = [5, 0], sizes = [1, 256], strides = [1, 1]} : vector<8x384xf32> to vector<1x256xf32>
    %211 = vector.broadcast %210 : vector<1x256xf32> to vector<16x256xf32>
    %212 = arith.addf %209, %211 : vector<16x256xf32>
    %213 = arith.index_cast %arg1 : i32 to index
    %c0_55 = arith.constant 0 : index
    %c0_56 = arith.constant 0 : index
    %214 = vector.load %arg4[%213, %c0_55, %c0_56] : memref<8x256x256xbf16, #tpu.memory_space<vmem>>, vector<1x256x256xbf16>
    %215 = vector.shape_cast %214 : vector<1x256x256xbf16> to vector<256x256xbf16>
    %cst_57 = arith.constant dense<0.000000e+00> : vector<16x256xf32>
    %216 = tpu.matmul %38, %215, %cst_57 {dimension_numbers = #tpu.dot_dimension_numbers<[1], [0], [0], [1], [0, 0, 1, 1], [], []>} : vector<16x256xbf16>, vector<256x256xbf16>, vector<16x256xf32> -> vector<16x256xf32>
    %217 = arith.negf %216 : vector<16x256xf32>
    %218 = math.exp %217 : vector<16x256xf32>
    %cst_58 = arith.constant 1.000000e+00 : f32
    %219 = vector.broadcast %cst_58 : f32 to vector<16x256xf32>
    %220 = arith.addf %219, %218 : vector<16x256xf32>
    %221 = arith.divf %219, %220 : vector<16x256xf32>
    %222 = arith.mulf %216, %221 : vector<16x256xf32>
    %223 = arith.mulf %222, %212 : vector<16x256xf32>
    %224 = arith.truncf %223 : vector<16x256xf32> to vector<16x256xbf16>
    %225 = arith.index_cast %arg1 : i32 to index
    %c0_59 = arith.constant 0 : index
    %c0_60 = arith.constant 0 : index
    %226 = vector.load %arg5[%225, %c0_59, %c0_60] : memref<8x256x256xbf16, #tpu.memory_space<vmem>>, vector<1x256x256xbf16>
    %227 = vector.shape_cast %226 : vector<1x256x256xbf16> to vector<256x256xbf16>
    %cst_61 = arith.constant dense<0.000000e+00> : vector<16x256xf32>
    %228 = tpu.matmul %224, %227, %cst_61 {dimension_numbers = #tpu.dot_dimension_numbers<[1], [0], [0], [1], [0, 0, 1, 1], [], []>} : vector<16x256xbf16>, vector<256x256xbf16>, vector<16x256xf32> -> vector<16x256xf32>
    %229 = arith.addf %228, %3 : vector<16x256xf32>
    %230 = vector.extract_strided_slice %6 {offsets = [2, 0], sizes = [1, 256], strides = [1, 1]} : vector<8x384xf32> to vector<1x256xf32>
    %231 = vector.extract_strided_slice %6 {offsets = [3, 0], sizes = [1, 256], strides = [1, 1]} : vector<8x384xf32> to vector<1x256xf32>
    %232 = vector.broadcast %11 : vector<1x256xf32> to vector<16x256xf32>
    %233 = arith.mulf %229, %232 : vector<16x256xf32>
    %cst_62 = arith.constant dense<0.000000e+00> : vector<16xf32>
    %234 = vector.multi_reduction <add>, %233, %cst_62 [1] : vector<16x256xf32> to vector<16xf32>
    %235 = vector.shape_cast %234 : vector<16xf32> to vector<16x1xf32>
    %cst_63 = arith.constant 0.00555555569 : f32
    %236 = vector.broadcast %cst_63 : f32 to vector<16x1xf32>
    %237 = arith.mulf %235, %236 : vector<16x1xf32>
    %238 = vector.broadcast %237 : vector<16x1xf32> to vector<16x256xf32>
    %239 = arith.subf %229, %238 : vector<16x256xf32>
    %240 = vector.broadcast %11 : vector<1x256xf32> to vector<16x256xf32>
    %241 = arith.mulf %239, %240 : vector<16x256xf32>
    %242 = arith.mulf %241, %241 : vector<16x256xf32>
    %cst_64 = arith.constant dense<0.000000e+00> : vector<16xf32>
    %243 = vector.multi_reduction <add>, %242, %cst_64 [1] : vector<16x256xf32> to vector<16xf32>
    %244 = vector.shape_cast %243 : vector<16xf32> to vector<16x1xf32>
    %cst_65 = arith.constant 0.00555555569 : f32
    %245 = vector.broadcast %cst_65 : f32 to vector<16x1xf32>
    %246 = arith.mulf %244, %245 : vector<16x1xf32>
    %cst_66 = arith.constant 9.99999974E-6 : f32
    %247 = vector.broadcast %cst_66 : f32 to vector<16x1xf32>
    %248 = arith.addf %246, %247 : vector<16x1xf32>
    %249 = math.rsqrt %248 : vector<16x1xf32>
    %250 = vector.broadcast %249 : vector<16x1xf32> to vector<16x256xf32>
    %251 = arith.mulf %241, %250 : vector<16x256xf32>
    %252 = vector.broadcast %230 : vector<1x256xf32> to vector<16x256xf32>
    %253 = arith.mulf %251, %252 : vector<16x256xf32>
    %254 = vector.broadcast %231 : vector<1x256xf32> to vector<16x256xf32>
    %255 = arith.addf %253, %254 : vector<16x256xf32>
    %256 = arith.truncf %255 : vector<16x256xf32> to vector<16x256xbf16>
    %257 = arith.index_cast %arg1 : i32 to index
    %c0_67 = arith.constant 0 : index
    %c0_68 = arith.constant 0 : index
    %258 = vector.load %arg6[%257, %c0_67, %c0_68] : memref<8x256x384xbf16, #tpu.memory_space<vmem>>, vector<1x256x384xbf16>
    %259 = vector.shape_cast %258 : vector<1x256x384xbf16> to vector<256x384xbf16>
    %cst_69 = arith.constant dense<0.000000e+00> : vector<16x384xf32>
    %260 = tpu.matmul %256, %259, %cst_69 {dimension_numbers = #tpu.dot_dimension_numbers<[1], [0], [0], [1], [0, 0, 1, 1], [], []>} : vector<16x256xbf16>, vector<256x384xbf16>, vector<16x384xf32> -> vector<16x384xf32>
    %261 = vector.extract_strided_slice %6 {offsets = [7, 0], sizes = [1, 384], strides = [1, 1]} : vector<8x384xf32> to vector<1x384xf32>
    %262 = vector.broadcast %261 : vector<1x384xf32> to vector<16x384xf32>
    %263 = arith.addf %260, %262 : vector<16x384xf32>
    %cst_70 = arith.constant 5.000000e-01 : f32
    %264 = vector.broadcast %cst_70 : f32 to vector<16x384xf32>
    %265 = arith.mulf %264, %263 : vector<16x384xf32>
    %cst_71 = arith.constant 4.471500e-02 : f32
    %266 = vector.broadcast %cst_71 : f32 to vector<16x384xf32>
    %267 = arith.mulf %266, %263 : vector<16x384xf32>
    %268 = arith.mulf %267, %263 : vector<16x384xf32>
    %269 = arith.mulf %268, %263 : vector<16x384xf32>
    %270 = arith.addf %263, %269 : vector<16x384xf32>
    %cst_72 = arith.constant 0.797884583 : f32
    %271 = vector.broadcast %cst_72 : f32 to vector<16x384xf32>
    %272 = arith.mulf %271, %270 : vector<16x384xf32>
    %273 = math.tanh %272 : vector<16x384xf32>
    %cst_73 = arith.constant 1.000000e+00 : f32
    %274 = vector.broadcast %cst_73 : f32 to vector<16x384xf32>
    %275 = arith.addf %274, %273 : vector<16x384xf32>
    %276 = arith.mulf %265, %275 : vector<16x384xf32>
    %277 = arith.truncf %276 : vector<16x384xf32> to vector<16x384xbf16>
    %278 = arith.index_cast %arg1 : i32 to index
    %c0_74 = arith.constant 0 : index
    %c0_75 = arith.constant 0 : index
    %279 = vector.load %arg7[%278, %c0_74, %c0_75] : memref<8x384x256xbf16, #tpu.memory_space<vmem>>, vector<1x384x256xbf16>
    %280 = vector.shape_cast %279 : vector<1x384x256xbf16> to vector<384x256xbf16>
    %cst_76 = arith.constant dense<0.000000e+00> : vector<16x256xf32>
    %281 = tpu.matmul %277, %280, %cst_76 {dimension_numbers = #tpu.dot_dimension_numbers<[1], [0], [0], [1], [0, 0, 1, 1], [], []>} : vector<16x384xbf16>, vector<384x256xbf16>, vector<16x256xf32> -> vector<16x256xf32>
    %282 = vector.extract_strided_slice %6 {offsets = [6, 0], sizes = [1, 256], strides = [1, 1]} : vector<8x384xf32> to vector<1x256xf32>
    %283 = vector.broadcast %282 : vector<1x256xf32> to vector<16x256xf32>
    %284 = arith.addf %281, %283 : vector<16x256xf32>
    %285 = arith.addf %284, %229 : vector<16x256xf32>
    %c0_77 = arith.constant 0 : index
    %c0_78 = arith.constant 0 : index
    %286 = vector.load %arg10[%c0_77, %c0_78] : memref<16x256xf32, #tpu.memory_space<vmem>>, vector<16x256xf32>
    tpu.vector_store %arg10[%c0_77, %c0_78], %285 {strides = array<i32>} : memref<16x256xf32, #tpu.memory_space<vmem>>, vector<16x256xf32>,
    %c7_i32 = arith.constant 7 : i32
    %287 = arith.cmpi eq, %arg1, %c7_i32 : i32
    %288 = arith.extui %287 : i1 to i32
    %c0_i32_79 = arith.constant 0 : i32
    %289 = arith.cmpi ne, %288, %c0_i32_79 : i32
    scf.if %289 {
      %290 = vector.shape_cast %285 : vector<16x256xf32> to vector<2x8x256xf32>
      %c0_80 = arith.constant 0 : index
      %c0_81 = arith.constant 0 : index
      %c0_82 = arith.constant 0 : index
      %291 = vector.load %arg9[%c0_80, %c0_81, %c0_82] : memref<2x8x256xf32, #tpu.memory_space<vmem>>, vector<2x8x256xf32>
      tpu.vector_store %arg9[%c0_80, %c0_81, %c0_82], %290 {strides = array<i32>} : memref<2x8x256xf32, #tpu.memory_space<vmem>>, vector<2x8x256xf32>,
    } else {
    }
    return
  }
  func.func @transform_0(%arg0: i32, %arg1: i32) -> (i32, i32, i32) {
    %c0_i32 = arith.constant 0 : i32
    %c0_i32_0 = arith.constant 0 : i32
    %c0_i32_1 = arith.constant 0 : i32
    return %arg0, %c0_i32, %c0_i32_0 : i32, i32, i32
  }
  func.func @transform_1(%arg0: i32, %arg1: i32) -> (i32, i32, i32) {
    %c0_i32 = arith.constant 0 : i32
    %c0_i32_0 = arith.constant 0 : i32
    %c0_i32_1 = arith.constant 0 : i32
    %c0_i32_2 = arith.constant 0 : i32
    return %c0_i32, %c0_i32_0, %c0_i32_1 : i32, i32, i32
  }
  func.func @transform_2(%arg0: i32, %arg1: i32) -> (i32, i32, i32) {
    %c0_i32 = arith.constant 0 : i32
    %c0_i32_0 = arith.constant 0 : i32
    %c0_i32_1 = arith.constant 0 : i32
    %c0_i32_2 = arith.constant 0 : i32
    return %c0_i32, %c0_i32_0, %c0_i32_1 : i32, i32, i32
  }
  func.func @transform_3(%arg0: i32, %arg1: i32) -> (i32, i32, i32) {
    %c0_i32 = arith.constant 0 : i32
    %c0_i32_0 = arith.constant 0 : i32
    %c0_i32_1 = arith.constant 0 : i32
    %c0_i32_2 = arith.constant 0 : i32
    return %c0_i32, %c0_i32_0, %c0_i32_1 : i32, i32, i32
  }
  func.func @transform_4(%arg0: i32, %arg1: i32) -> (i32, i32, i32) {
    %c0_i32 = arith.constant 0 : i32
    %c0_i32_0 = arith.constant 0 : i32
    %c0_i32_1 = arith.constant 0 : i32
    %c0_i32_2 = arith.constant 0 : i32
    return %c0_i32, %c0_i32_0, %c0_i32_1 : i32, i32, i32
  }
  func.func @transform_5(%arg0: i32, %arg1: i32) -> (i32, i32, i32) {
    %c0_i32 = arith.constant 0 : i32
    %c0_i32_0 = arith.constant 0 : i32
    %c0_i32_1 = arith.constant 0 : i32
    %c0_i32_2 = arith.constant 0 : i32
    return %c0_i32, %c0_i32_0, %c0_i32_1 : i32, i32, i32
  }
  func.func @transform_6(%arg0: i32, %arg1: i32) -> (i32, i32, i32) {
    %c0_i32 = arith.constant 0 : i32
    %c0_i32_0 = arith.constant 0 : i32
    %c0_i32_1 = arith.constant 0 : i32
    %c0_i32_2 = arith.constant 0 : i32
    return %c0_i32, %c0_i32_0, %c0_i32_1 : i32, i32, i32
  }
  func.func @transform_7(%arg0: i32, %arg1: i32) -> (i32, i32, i32) {
    %c0_i32 = arith.constant 0 : i32
    %c0_i32_0 = arith.constant 0 : i32
    %c0_i32_1 = arith.constant 0 : i32
    return %arg0, %c0_i32, %c0_i32_0 : i32, i32, i32
  }
}

module attributes {stable_mosaic.version = 11 : i64} {
  func.func @_esm_kernel(%arg0: i32, %arg1: memref<8x1280xbf16, #tpu.memory_space<vmem>>, %arg2: memref<8x128xf32, #tpu.memory_space<vmem>>, %arg3: memref<1280x128xbf16, #tpu.memory_space<vmem>>, %arg4: memref<8x128xf32, #tpu.memory_space<vmem>>, %arg5: memref<8x256xf32, #tpu.memory_space<vmem>>) attributes {dimension_semantics = [#tpu.dimension_semantics<parallel>], iteration_bounds = array<i64: 2>, scalar_prefetch = 0 : i64, scratch_operands = 0 : i64, tpu.core_type = #tpu.core_type<tc>, window_params = [{transform_indices = @transform_0, window_bounds = array<i64: 8, 1280>}, {transform_indices = @transform_1, window_bounds = array<i64: 8, 128>}, {pipeline_mode = #tpu.pipeline_mode<synchronous>, transform_indices = @transform_2, window_bounds = array<i64: 1280, 128>}, {pipeline_mode = #tpu.pipeline_mode<synchronous>, transform_indices = @transform_3, window_bounds = array<i64: 8, 128>}, {transform_indices = @transform_4, window_bounds = array<i64: 8, 256>}]} {
    %c0 = arith.constant 0 : index
    %c0_0 = arith.constant 0 : index
    %0 = vector.load %arg4[%c0, %c0_0] : memref<8x128xf32, #tpu.memory_space<vmem>>, vector<8x128xf32>
    %c0_1 = arith.constant 0 : index
    %c0_2 = arith.constant 0 : index
    %1 = vector.load %arg1[%c0_1, %c0_2] : memref<8x1280xbf16, #tpu.memory_space<vmem>>, vector<8x1280xbf16>
    %c0_3 = arith.constant 0 : index
    %c0_4 = arith.constant 0 : index
    %2 = vector.load %arg3[%c0_3, %c0_4] : memref<1280x128xbf16, #tpu.memory_space<vmem>>, vector<1280x128xbf16>
    %cst = arith.constant dense<0.000000e+00> : vector<8x128xf32>
    %3 = tpu.matmul %1, %2, %cst {dimension_numbers = #tpu.dot_dimension_numbers<[1], [0], [0], [1], [0, 0, 1, 1], [], []>} : vector<8x1280xbf16>, vector<1280x128xbf16>, vector<8x128xf32> -> vector<8x128xf32>
    %4 = vector.extract_strided_slice %0 {offsets = [0, 0], sizes = [1, 128], strides = [1, 1]} : vector<8x128xf32> to vector<1x128xf32>
    %5 = vector.broadcast %4 : vector<1x128xf32> to vector<8x128xf32>
    %6 = arith.addf %3, %5 : vector<8x128xf32>
    %cst_5 = arith.constant 0.000000e+00 : f32
    %7 = vector.broadcast %cst_5 : f32 to vector<8x128xf32>
    %8 = arith.maximumf %6, %7 : vector<8x128xf32>
    %cst_6 = arith.constant dense<0.000000e+00> : vector<8xf32>
    %9 = vector.multi_reduction <add>, %8, %cst_6 [1] : vector<8x128xf32> to vector<8xf32>
    %10 = vector.shape_cast %9 : vector<8xf32> to vector<8x1xf32>
    %cst_7 = arith.constant 1.280000e+02 : f32
    %11 = vector.broadcast %cst_7 : f32 to vector<8x1xf32>
    %12 = arith.divf %10, %11 : vector<8x1xf32>
    %13 = vector.broadcast %12 : vector<8x1xf32> to vector<8x128xf32>
    %14 = arith.subf %8, %13 : vector<8x128xf32>
    %15 = arith.mulf %14, %14 : vector<8x128xf32>
    %cst_8 = arith.constant dense<0.000000e+00> : vector<8xf32>
    %16 = vector.multi_reduction <add>, %15, %cst_8 [1] : vector<8x128xf32> to vector<8xf32>
    %17 = vector.shape_cast %16 : vector<8xf32> to vector<8x1xf32>
    %cst_9 = arith.constant 1.280000e+02 : f32
    %18 = vector.broadcast %cst_9 : f32 to vector<8x1xf32>
    %19 = arith.divf %17, %18 : vector<8x1xf32>
    %cst_10 = arith.constant 9.99999974E-6 : f32
    %20 = vector.broadcast %cst_10 : f32 to vector<8x1xf32>
    %21 = arith.addf %19, %20 : vector<8x1xf32>
    %22 = math.rsqrt %21 : vector<8x1xf32>
    %23 = vector.broadcast %22 : vector<8x1xf32> to vector<8x128xf32>
    %24 = arith.mulf %14, %23 : vector<8x128xf32>
    %25 = vector.extract_strided_slice %0 {offsets = [1, 0], sizes = [1, 128], strides = [1, 1]} : vector<8x128xf32> to vector<1x128xf32>
    %26 = vector.broadcast %25 : vector<1x128xf32> to vector<8x128xf32>
    %27 = arith.mulf %24, %26 : vector<8x128xf32>
    %28 = vector.extract_strided_slice %0 {offsets = [2, 0], sizes = [1, 128], strides = [1, 1]} : vector<8x128xf32> to vector<1x128xf32>
    %29 = vector.broadcast %28 : vector<1x128xf32> to vector<8x128xf32>
    %30 = arith.addf %27, %29 : vector<8x128xf32>
    %c0_11 = arith.constant 0 : index
    %c0_12 = arith.constant 0 : index
    %31 = vector.load %arg5[%c0_11, %c0_12] : memref<8x256xf32, #tpu.memory_space<vmem>>, vector<8x128xf32>
    tpu.vector_store %arg5[%c0_11, %c0_12], %30 {strides = array<i32>} : memref<8x256xf32, #tpu.memory_space<vmem>>, vector<8x128xf32>,
    %c0_13 = arith.constant 0 : index
    %c0_14 = arith.constant 0 : index
    %32 = vector.load %arg2[%c0_13, %c0_14] : memref<8x128xf32, #tpu.memory_space<vmem>>, vector<8x128xf32>
    %c0_15 = arith.constant 0 : index
    %c128 = arith.constant 128 : index
    %33 = vector.load %arg5[%c0_15, %c128] : memref<8x256xf32, #tpu.memory_space<vmem>>, vector<8x128xf32>
    tpu.vector_store %arg5[%c0_15, %c128], %32 {strides = array<i32>} : memref<8x256xf32, #tpu.memory_space<vmem>>, vector<8x128xf32>,
    return
  }
  func.func @transform_0(%arg0: i32) -> (i32, i32) {
    %c0_i32 = arith.constant 0 : i32
    %c0_i32_0 = arith.constant 0 : i32
    return %arg0, %c0_i32 : i32, i32
  }
  func.func @transform_1(%arg0: i32) -> (i32, i32) {
    %c0_i32 = arith.constant 0 : i32
    %c0_i32_0 = arith.constant 0 : i32
    return %arg0, %c0_i32 : i32, i32
  }
  func.func @transform_2(%arg0: i32) -> (i32, i32) {
    %c0_i32 = arith.constant 0 : i32
    %c0_i32_0 = arith.constant 0 : i32
    %c0_i32_1 = arith.constant 0 : i32
    return %c0_i32, %c0_i32_0 : i32, i32
  }
  func.func @transform_3(%arg0: i32) -> (i32, i32) {
    %c0_i32 = arith.constant 0 : i32
    %c0_i32_0 = arith.constant 0 : i32
    %c0_i32_1 = arith.constant 0 : i32
    return %c0_i32, %c0_i32_0 : i32, i32
  }
  func.func @transform_4(%arg0: i32) -> (i32, i32) {
    %c0_i32 = arith.constant 0 : i32
    %c0_i32_0 = arith.constant 0 : i32
    return %arg0, %c0_i32 : i32, i32
  }
}

</mosaic_0001>

<bundles_post_ra>
// kernel: forward.2
= control target key start
LH: loop header
LB: loop body
LE: loop exit
PB: predicated region body
PF: predicated region fallthrough
CT: control target
= control target key end

     0   :  { %9 = vsyncpa [#allocation3], 0  ;;  %s1807_s0 = inlined_call_operand.vmem [shape: bf16[16,1280], index: 0, kind: input, shape index: {}]   ;;  %s1808_s1 = inlined_call_operand.vmem [shape: f32[16,128], index: 1, kind: input, shape index: {}]   ;;  %s1809_s2 = inlined_call_operand.hbm [shape: bf16[1280,128], index: 2, kind: input, shape index: {}]   ;;  %s1810_s3 = inlined_call_operand.hbm [shape: f32[8,128], index: 3, kind: input, shape index: {}]   ;;  %s1811_s4 = inlined_call_operand.vmem [shape: f32[16,256], index: 4, kind: output, shape index: {}]  }
   0x1   :  { %10 = vsyncpa [#allocation5], 0  ;;  %s1742_s15 = smov 0  }
   0x2 LB: > { %s152_s18 = sshll.u32 %s1809_s2, 4  ;;  %s1751_s19 = sadd.s32 4294967295, %s1710_s15   ;;  %s1710_s15 = sphi %s1742_s15, %s16_s15   ;;  %s153_s18 = int_to_ptr.hbm [resolvable:$true] %s152_s18 }
   0x3   : > { %p1185_p0 = scmp.ge.s32.totalorder %s1710_s15, 1  ;;  %p141_p1 = scmp.lt.s32.totalorder %s1710_s15, 3 }
   0x4   : > { %p1615_p2 = scmp.eq.s32.totalorder %s1751_s19, 0  ;;  %s1712_s21 = smov [#allocation2]  }
   0x5   : > { %p1756_p3 = pnand %p1185_p0, %p141_p1  ;;  %s154_s22 = sshll.u32 %s1712_s21, 4  ;;  %s155_s22 = int_to_ptr.vmem [resolvable:$true] %s154_s22 }
   0x6   : > { %s167_s25 = sshll.u32 %s1810_s3, 4  ;;  %s1713_s26 = smov [#allocation4]   ;;  %s168_s25 = int_to_ptr.hbm [resolvable:$true] %s167_s25 }
   0x7   : > { %p1608_p4 = pneg %p1756_p3  ;;  %s169_s27 = sshll.u32 %s1713_s26, 4  ;;  %s170_s27 = int_to_ptr.vmem [resolvable:$true] %s169_s27 }
   0x8   : > { %s1714_s28 = smov 64   ;;  %s1715_s29 = smov 4  }
   0x9   : > { %p1609_p5 = pnand %p1615_p2, %p1608_p4  ;;  %197 = sbr.rel (%p1756_p3) target bundleno = 512 (0x200), region = 36 }
   0xb   : > { %1611 = dma.hbm_to_vmem [thread:$0]  (!%p1609_p5), %s153_s18, 10240, %s155_s22, [#allocation3], %s1714_s28, %s1714_s28, %s1715_s29  }
   0xc   : > { %1614 = dma.hbm_to_vmem [thread:$0]  (!%p1609_p5), %s168_s25, 128, %s170_s27, [#allocation5]  }
   0xe   : > { %1701 = dma.done.wait (%p1615_p2), [#allocation3], 10240  }
   0xf   : > { %1703 = vsyncadd (%p1615_p2), [#allocation3], 4294957056 }
  0x10   : > { %1705 = dma.done.wait (%p1615_p2), [#allocation5], 128  }
  0x11   : > { %1707 = vsyncadd (%p1615_p2), [#allocation5], 4294967168  ;;  %v1526_v0 = vld [vmem:[#allocation2 + $0x38] sm:$0xff]  ;;  %v1525_v4 = vld [vmem:[#allocation2 + $0x30] sm:$0xff]  ;;  %p233_p6 = scmp.lt.s32.totalorder %s1751_s19, 1 }
  0x12   : > { %v1534_v1 = vld [vmem:[#allocation2 + $0x78] sm:$0xff]  ;;  %929 = vmatpush.bf16.msra.mxu0 %v1526_v0  ;;  %v1533_v5 = vld [vmem:[#allocation2 + $0x70] sm:$0xff]  ;;  %v1524_v8 = vld [vmem:[#allocation2 + $0x28] sm:$0xff] }
  0x13   : > { %v1542_v2 = vld [vmem:[#allocation2 + $0xb8] sm:$0xff]  ;;  %942 = vmatpush.bf16.msra.mxu1 %v1534_v1  ;;  %v1541_v6 = vld [vmem:[#allocation2 + $0xb0] sm:$0xff]  ;;  %v1532_v9 = vld [vmem:[#allocation2 + $0x68] sm:$0xff]  ;;  %s1814_s19 = smov (!%p233_p6, %s1751_s19), 1 }
  0x14   : > { %v1550_v3 = vld [vmem:[#allocation2 + $0xf8] sm:$0xff]  ;;  %955 = vmatpush.bf16.msra.mxu2 %v1542_v2  ;;  %v1549_v7 = vld [vmem:[#allocation2 + $0xf0] sm:$0xff]  ;;  %v1540_v10 = vld [vmem:[#allocation2 + $0xa8] sm:$0xff]  ;;  %s1193_s30 = sshll.u32 %s1814_s19, 3  ;;  %s1518_s5 = sshll.u32 %s1814_s19, 4 }
  0x15   : > { %968 = vmatpush.bf16.msra.mxu3 %v1550_v3  ;;  %v1548_v11 = vld [vmem:[#allocation2 + $0xe8] sm:$0xff]  ;;  %v1523_v12 = vld [vmem:[#allocation2 + $0x20] sm:$0xff]  ;;  %v1522_v16 = vld [vmem:[#allocation2 + $0x18] sm:$0xff]  ;;  %s241_s8 = scalar_lea.vmem %s1808_s1, %s1193_s30  ;;  %s1789_s11 = scalar_lea.vmem %s1811_s4, %s1518_s5 }
  0x16   : > { %930 = vmatpush.bf16.msra.mxu0 %v1525_v4  ;;  %v1531_v13 = vld [vmem:[#allocation2 + $0x60] sm:$0xff]  ;;  %v1530_v17 = vld [vmem:[#allocation2 + $0x58] sm:$0xff]  ;;  %v1521_v21 = vld [vmem:[#allocation2 + $0x10] sm:$0xff]  ;;  %s1599_s12 = smul.u32 40, %s1814_s19 }
  0x17   : > { %943 = vmatpush.bf16.msra.mxu1 %v1533_v5  ;;  %v1539_v14 = vld [vmem:[#allocation2 + $0xa0] sm:$0xff]  ;;  %v1538_v18 = vld [vmem:[#allocation2 + $0x98] sm:$0xff]  ;;  %v1529_v22 = vld [vmem:[#allocation2 + $0x50] sm:$0xff] }
  0x18   : > { %956 = vmatpush.bf16.msra.mxu2 %v1541_v6  ;;  %v1547_v15 = vld [vmem:[#allocation2 + $0xe0] sm:$0xff]  ;;  %v1546_v19 = vld [vmem:[#allocation2 + $0xd8] sm:$0xff]  ;;  %v1537_v23 = vld [vmem:[#allocation2 + $0x90] sm:$0xff]  ;;  %s1796_s16 = scalar_lea.vmem %s1807_s0, %s1599_s12 }
  0x19   : > { %969 = vmatpush.bf16.msra.mxu3 %v1549_v7  ;;  %v1092_v20 = vld [vmem:[%s241_s8] sm:$0xff]  ;;  %v1545_v24 = vld [vmem:[#allocation2 + $0xd0] sm:$0xff]  ;;  %v1520_v25 = vld [vmem:[#allocation2 + $0x8] sm:$0xff] }
  0x1a   : > { %931 = vmatpush.bf16.msra.mxu0 %v1524_v8  ;;  %1093 = vst [vmem:[%s1789_s11 + $0x8] sm:$0xff] %v1092_v20  ;;  %v1528_v26 = vld [vmem:[#allocation2 + $0x48] sm:$0xff]  ;;  %v248_v29 = vld [vmem:[%s1796_s16] sm:$0xff]  ;;  %v1558_v35 = vld [vmem:[#allocation2 + $0x138] sm:$0xff] }
  0x1b   : > { %944 = vmatpush.bf16.msra.mxu1 %v1532_v9  ;;  %v1536_v27 = vld [vmem:[#allocation2 + $0x88] sm:$0xff]  ;;  %v1519_v31 = vld [vmem:[#allocation2] sm:$0xff]  ;;  %v419_v33 = vunpack.c.l.b16 %v248_v29  ;;  %v420_v34 = vunpack.c.h.b16 %v248_v29  ;;  %v1566_v36 = vld [vmem:[#allocation2 + $0x178] sm:$0xff] }
  0x1c   : > { %957 = vmatpush.bf16.msra.mxu2 %v1540_v10  ;;  %v1544_v28 = vld [vmem:[#allocation2 + $0xc8] sm:$0xff]  ;;  %v1527_v32 = vld [vmem:[#allocation2 + $0x40] sm:$0xff]  ;;  %v1574_v41 = vld [vmem:[#allocation2 + $0x1b8] sm:$0xff] }
  0x1d   : > { %970 = vmatpush.bf16.msra.mxu3 %v1548_v11  ;;  %v249_v30 = vld [vmem:[%s1796_s16 + $0x8] sm:$0xff]  ;;  %v1535_v37 = vld [vmem:[#allocation2 + $0x80] sm:$0xff]  ;;  %v1582_v42 = vld [vmem:[#allocation2 + $0x1f8] sm:$0xff]  ;;  %v429_v43 = vpack.c.b16 %v419_v33, %v419_v33  ;;  %v430_v44 = vpack.c.b16 %v420_v34, %v420_v34 }
  0x1e   : > { %932 = vmatpush.bf16.msra.mxu0 %v1523_v12  ;;  %v1543_v38 = vld [vmem:[#allocation2 + $0xc0] sm:$0xff]  ;;  %v421_v39 = vunpack.c.l.b16 %v249_v30  ;;  %v422_v40 = vunpack.c.h.b16 %v249_v30  ;;  %v1557_v45 = vld [vmem:[#allocation2 + $0x130] sm:$0xff]  ;;  %v1556_v51 = vld [vmem:[#allocation2 + $0x128] sm:$0xff] }
  0x1f   : > { %945 = vmatpush.bf16.msra.mxu1 %v1531_v13  ;;  %v1565_v46 = vld [vmem:[#allocation2 + $0x170] sm:$0xff]  ;;  %v1564_v52 = vld [vmem:[#allocation2 + $0x168] sm:$0xff]  ;;  %v1555_v55 = vld [vmem:[#allocation2 + $0x120] sm:$0xff] }
  0x20   : > { %958 = vmatpush.bf16.msra.mxu2 %v1539_v14  ;;  %v431_v47 = vpack.c.b16 %v421_v39, %v421_v39  ;;  %v432_v48 = vpack.c.b16 %v422_v40, %v422_v40  ;;  %v1573_v49 = vld [vmem:[#allocation2 + $0x1b0] sm:$0xff]  ;;  %v1572_v53 = vld [vmem:[#allocation2 + $0x1a8] sm:$0xff]  ;;  %v1563_v56 = vld [vmem:[#allocation2 + $0x160] sm:$0xff] }
  0x21   : > { %971 = vmatpush.bf16.msra.mxu3 %v1547_v15  ;;  %v1581_v50 = vld [vmem:[#allocation2 + $0x1f0] sm:$0xff]  ;;  %v1580_v54 = vld [vmem:[#allocation2 + $0x1e8] sm:$0xff]  ;;  %v1571_v57 = vld [vmem:[#allocation2 + $0x1a0] sm:$0xff] }
  0x22   : > { %933 = vmatpush.bf16.msra.mxu0 %v1522_v16  ;;  %v1579_v58 = vld [vmem:[#allocation2 + $0x1e0] sm:$0xff]  ;;  %v1554_v59 = vld [vmem:[#allocation2 + $0x118] sm:$0xff]  ;;  %v1553_v63 = vld [vmem:[#allocation2 + $0x110] sm:$0xff] }
  0x23   : > { %946 = vmatpush.bf16.msra.mxu1 %v1530_v17  ;;  %v1562_v60 = vld [vmem:[#allocation2 + $0x158] sm:$0xff]  ;;  %v1561_v0 = vld [vmem:[#allocation2 + $0x150] sm:$0xff]  ;;  %v1552_v3 = vld [vmem:[#allocation2 + $0x108] sm:$0xff] }
  0x24   : > { %959 = vmatpush.bf16.msra.mxu2 %v1538_v18  ;;  %v1570_v61 = vld [vmem:[#allocation2 + $0x198] sm:$0xff]  ;;  %v1569_v1 = vld [vmem:[#allocation2 + $0x190] sm:$0xff]  ;;  %v1560_v4 = vld [vmem:[#allocation2 + $0x148] sm:$0xff] }
  0x25   : > { %972 = vmatpush.bf16.msra.mxu3 %v1546_v19  ;;  %v1578_v62 = vld [vmem:[#allocation2 + $0x1d8] sm:$0xff]  ;;  %v1577_v2 = vld [vmem:[#allocation2 + $0x1d0] sm:$0xff]  ;;  %v1568_v6 = vld [vmem:[#allocation2 + $0x188] sm:$0xff] }
  0x26   : > { %934 = vmatpush.bf16.msra.mxu0 %v1521_v21  ;;  %v250_v5 = vld [vmem:[%s1796_s16 + $0x10] sm:$0xff]  ;;  %v1576_v7 = vld [vmem:[#allocation2 + $0x1c8] sm:$0xff]  ;;  %v251_v8 = vld [vmem:[%s1796_s16 + $0x18] sm:$0xff] }
  0x27   : > { %947 = vmatpush.bf16.msra.mxu1 %v1529_v22  ;;  %v423_v9 = vunpack.c.l.b16 %v250_v5  ;;  %v424_v10 = vunpack.c.h.b16 %v250_v5  ;;  %v1551_v11 = vld [vmem:[#allocation2 + $0x100] sm:$0xff]  ;;  %v1590_v13 = vld [vmem:[#allocation2 + $0x238] sm:$0xff]  ;;  %v425_v17 = vunpack.c.l.b16 %v251_v8  ;;  %v426_v18 = vunpack.c.h.b16 %v251_v8  ;;  %v1589_v21 = vld [vmem:[#allocation2 + $0x230] sm:$0xff] }
  0x28   : > { %960 = vmatpush.bf16.msra.mxu2 %v1537_v23  ;;  %v1559_v12 = vld [vmem:[#allocation2 + $0x140] sm:$0xff]  ;;  %v1598_v14 = vld [vmem:[#allocation2 + $0x278] sm:$0xff]  ;;  %v1597_v22 = vld [vmem:[#allocation2 + $0x270] sm:$0xff] }
  0x29   : > { %973 = vmatpush.bf16.msra.mxu3 %v1545_v24  ;;  %v1567_v15 = vld [vmem:[#allocation2 + $0x180] sm:$0xff]  ;;  %v433_v19 = vpack.c.b16 %v423_v9, %v423_v9  ;;  %v434_v20 = vpack.c.b16 %v424_v10, %v424_v10  ;;  %v435_v23 = vpack.c.b16 %v425_v17, %v425_v17  ;;  %v436_v24 = vpack.c.b16 %v426_v18, %v426_v18  ;;  %v1586_v29 = vld [vmem:[#allocation2 + $0x218] sm:$0xff]  ;;  %v1584_v33 = vld [vmem:[#allocation2 + $0x208] sm:$0xff] }
  0x2a   : > { %935 = vmatpush.bf16.msra.mxu0 %v1520_v25  ;;  %v1575_v16 = vld [vmem:[#allocation2 + $0x1c0] sm:$0xff]  ;;  %v1588_v25 = vld [vmem:[#allocation2 + $0x228] sm:$0xff]  ;;  %v1594_v30 = vld [vmem:[#allocation2 + $0x258] sm:$0xff] }
  0x2b   : > { %948 = vmatpush.bf16.msra.mxu1 %v1528_v26  ;;  %v1596_v26 = vld [vmem:[#allocation2 + $0x268] sm:$0xff]  ;;  %v1591_v39 = vld [vmem:[#allocation2 + $0x240] sm:$0xff] }
  0x2c   : > { %961 = vmatpush.bf16.msra.mxu2 %v1536_v27  ;;  %v1587_v27 = vld [vmem:[#allocation2 + $0x220] sm:$0xff]  ;;  %v1592_v34 = vld [vmem:[#allocation2 + $0x248] sm:$0xff] }
  0x2d   : > { %974 = vmatpush.bf16.msra.mxu3 %v1544_v28  ;;  %v1595_v28 = vld [vmem:[#allocation2 + $0x260] sm:$0xff] }
  0x2e   : > { %936 = vmatpush.bf16.msra.mxu0 %v1519_v31  ;;  %v1585_v31 = vld [vmem:[#allocation2 + $0x210] sm:$0xff] }
  0x2f   : > { %949 = vmatpush.bf16.msra.mxu1 %v1527_v32  ;;  %v1593_v32 = vld [vmem:[#allocation2 + $0x250] sm:$0xff] }
  0x30   : > { %962 = vmatpush.bf16.msra.mxu2 %v1535_v37 }
  0x31   : > { %975 = vmatpush.bf16.msra.mxu3 %v1543_v38  ;;  %937 = vmatmul.bf16.vlgmr.msra.gmra.mxu0 %v429_v43  ;;  %v1583_v38 = vld [vmem:[#allocation2 + $0x200] sm:$0xff] }
  0x32   : > { %981 = vmatpush.bf16.msrb.mxu0 %v1558_v35  ;;  %950 = vmatmul.bf16.vlgmr.msra.gmra.mxu1 %v430_v44  ;;  %v252_v35 = vld [vmem:[%s1796_s16 + $0x20] sm:$0xff] }
  0x33   : > { %994 = vmatpush.bf16.msrb.mxu1 %v1566_v36  ;;  %963 = vmatmul.bf16.vlgmr.msra.gmra.mxu2 %v431_v47  ;;  %v427_v36 = vunpack.c.l.b16 %v252_v35  ;;  %v428_v37 = vunpack.c.h.b16 %v252_v35 }
  0x34   : > { %1007 = vmatpush.bf16.msrb.mxu2 %v1574_v41  ;;  %976 = vmatmul.bf16.vlgmr.msra.gmra.mxu3 %v432_v48 }
  0x35   : > { %1020 = vmatpush.bf16.msrb.mxu3 %v1582_v42  ;;  %v437_v40 = vpack.c.b16 %v427_v36, %v427_v36  ;;  %v438_v41 = vpack.c.b16 %v428_v37, %v428_v37 }
  0x36   : > { %982 = vmatpush.bf16.msrb.mxu0 %v1557_v45 }
  0x37   : > { %995 = vmatpush.bf16.msrb.mxu1 %v1565_v46 }
  0x38   : > { %1008 = vmatpush.bf16.msrb.mxu2 %v1573_v49 }
  0x39   : > { %1021 = vmatpush.bf16.msrb.mxu3 %v1581_v50  ;;  %v247_v50 = vld [vmem:[#allocation4] sm:$0xff] }
  0x3a   : > { %983 = vmatpush.bf16.msrb.mxu0 %v1556_v51  ;;  %v413_v51 = vperm.slane %v247_v50, 0 }
  0x3b   : > { %996 = vmatpush.bf16.msrb.mxu1 %v1564_v52 }
  0x3c   : > { %1009 = vmatpush.bf16.msrb.mxu2 %v1572_v53 }
  0x3d   : > { %1022 = vmatpush.bf16.msrb.mxu3 %v1580_v54 }
  0x3e   : > { %984 = vmatpush.bf16.msrb.mxu0 %v1555_v55 }
  0x3f   : > { %997 = vmatpush.bf16.msrb.mxu1 %v1563_v56 }
  0x40   : > { %1010 = vmatpush.bf16.msrb.mxu2 %v1571_v57 }
  0x41   : > { %1023 = vmatpush.bf16.msrb.mxu3 %v1579_v58 }
  0x42   : > { %985 = vmatpush.bf16.msrb.mxu0 %v1554_v59 }
  0x43   : > { %998 = vmatpush.bf16.msrb.mxu1 %v1562_v60 }
  0x44   : > { %1011 = vmatpush.bf16.msrb.mxu2 %v1570_v61 }
  0x45   : > { %1024 = vmatpush.bf16.msrb.mxu3 %v1578_v62 }
  0x46   : > { %986 = vmatpush.bf16.msrb.mxu0 %v1553_v63 }
  0x47   : > { %999 = vmatpush.bf16.msrb.mxu1 %v1561_v0 }
  0x48   : > { %1012 = vmatpush.bf16.msrb.mxu2 %v1569_v1 }
  0x49   : > { %1025 = vmatpush.bf16.msrb.mxu3 %v1577_v2 }
  0x4a   : > { %987 = vmatpush.bf16.msrb.mxu0 %v1552_v3 }
  0x4b   : > { %1000 = vmatpush.bf16.msrb.mxu1 %v1560_v4 }
  0x4c   : > { %1013 = vmatpush.bf16.msrb.mxu2 %v1568_v6 }
  0x4d   : > { %1026 = vmatpush.bf16.msrb.mxu3 %v1576_v7 }
  0x4e   : > { %988 = vmatpush.bf16.msrb.mxu0 %v1551_v11  ;;  %v1716_v11 = vmov 128.0  }
  0x4f   : > { %1001 = vmatpush.bf16.msrb.mxu1 %v1559_v12  ;;  %1632 = vrcp.f32 %v1716_v11 }
  0x50   : > { %1014 = vmatpush.bf16.msrb.mxu2 %v1567_v15 }
  0x51   : > { %1027 = vmatpush.bf16.msrb.mxu3 %v1575_v16  ;;  %989 = vmatmul.bf16.vlgmr.msrb.gmra.mxu0 %v433_v19 }
  0x52   : > { %1033 = vmatpush.bf16.msra.mxu0 %v1590_v13  ;;  %1002 = vmatmul.bf16.vlgmr.msrb.gmra.mxu1 %v434_v20 }
  0x53   : > { %1046 = vmatpush.bf16.msra.mxu1 %v1598_v14  ;;  %1015 = vmatmul.bf16.vlgmr.msrb.gmra.mxu2 %v435_v23 }
  0x54   : > { %1028 = vmatmul.bf16.vlgmr.msrb.gmra.mxu3 %v436_v24 }
  0x55   : > { %v1633_v12 = vpop.eup %1632 }
  0x56   : > { %1034 = vmatpush.bf16.msra.mxu0 %v1589_v21  ;;  %v1063_v13 = vmul.f32 128.0, %v1633_v12  ;;  %vm1067_vm0 = vweird.f32 %v1633_v12 }
  0x57   : > { %1047 = vmatpush.bf16.msra.mxu1 %v1597_v22 }
  0x58   : > { %v1064_v14 = vsub.f32 1.0, %v1063_v13 }
  0x5a   : > { %1035 = vmatpush.bf16.msra.mxu0 %v1588_v25  ;;  %v1065_v15 = vmul.f32 %v1633_v12, %v1064_v14 }
  0x5b   : > { %1048 = vmatpush.bf16.msra.mxu1 %v1596_v26 }
  0x5c   : > { %v1066_v16 = vadd.f32 %v1633_v12, %v1065_v15 }
  0x5e   : > { %1036 = vmatpush.bf16.msra.mxu0 %v1587_v27  ;;  %v1068_v17 = vsel %vm1067_vm0, %v1633_v12, %v1066_v16 }
  0x5f   : > { %1049 = vmatpush.bf16.msra.mxu1 %v1595_v28 }
  0x62   : > { %1037 = vmatpush.bf16.msra.mxu0 %v1586_v29 }
  0x63   : > { %1050 = vmatpush.bf16.msra.mxu1 %v1594_v30 }
  0x66   : > { %1038 = vmatpush.bf16.msra.mxu0 %v1585_v31  ;;  %v1087_v31 = vperm.slane %v247_v50, 1 }
  0x67   : > { %1051 = vmatpush.bf16.msra.mxu1 %v1593_v32 }
  0x6a   : > { %1039 = vmatpush.bf16.msra.mxu0 %v1584_v33  ;;  %v1089_v33 = vperm.slane %v247_v50, 2 }
  0x6b   : > { %1052 = vmatpush.bf16.msra.mxu1 %v1592_v34 }
  0x6e   : > { %1040 = vmatpush.bf16.msra.mxu0 %v1583_v38 }
  0x6f   : > { %1053 = vmatpush.bf16.msra.mxu1 %v1591_v39 }
  0x71   : > { %1041 = vmatmul.bf16.vlgmr.msra.gmra.mxu0 %v437_v40 }
  0x72   : > { %1054 = vmatmul.bf16.vlgmr.msra.gmra.mxu1 %v438_v41 }
  0xae   : > { %v938_v42 = vpop.f32.mrf.mxu0 }
  0xaf   : > { %v951_v43 = vpop.f32.mrf.mxu1  ;;  %v939_v52 = vadd.f32 %v938_v42, %v413_v51 }
  0xb1   : > { %v952_v55 = vadd.f32 %v951_v43, %v939_v52 }
  0xb6   : > { %v964_v44 = vpop.f32.mrf.mxu2  ;;  %v940_v46 = vpop.f32.mrf.mxu0 }
  0xb7   : > { %v977_v45 = vpop.f32.mrf.mxu3  ;;  %v953_v47 = vpop.f32.mrf.mxu1  ;;  %v965_v56 = vadd.f32 %v964_v44, %v952_v55 }
  0xb9   : > { %v978_v61 = vadd.f32 %v977_v45, %v965_v56 }
  0xbe   : > { %v966_v48 = vpop.f32.mrf.mxu2 }
  0xbf   : > { %v979_v49 = vpop.f32.mrf.mxu3 }
  0xce   : > { %v990_v53 = vpop.f32.mrf.mxu0 }
  0xcf   : > { %v1003_v54 = vpop.f32.mrf.mxu1  ;;  %v991_v62 = vadd.f32 %v990_v53, %v978_v61 }
  0xd1   : > { %v1004_v1 = vadd.f32 %v1003_v54, %v991_v62 }
  0xd6   : > { %v992_v57 = vpop.f32.mrf.mxu0  ;;  %v1016_v59 = vpop.f32.mrf.mxu2 }
  0xd7   : > { %v1005_v58 = vpop.f32.mrf.mxu1  ;;  %v1029_v60 = vpop.f32.mrf.mxu3  ;;  %v1017_v2 = vadd.f32 %v1016_v59, %v1004_v1 }
  0xd9   : > { %v1030_v3 = vadd.f32 %v1029_v60, %v1017_v2 }
  0xde   : > { %v1018_v63 = vpop.f32.mrf.mxu2 }
  0xdf   : > { %v1031_v0 = vpop.f32.mrf.mxu3 }
  0xee   : > { %v1042_v4 = vpop.f32.mrf.mxu0 }
  0xef   : > { %v1055_v5 = vpop.f32.mrf.mxu1  ;;  %v1043_v6 = vadd.f32 %v1042_v4, %v1030_v3 }
  0xf1   : > { %v1056_v7 = vadd.f32 %v1055_v5, %v1043_v6 }
  0xf3   : > { %v1059_v8 = vmax.f32 %v1056_v7, 0.0 }
  0xf5   : > { %1060 = vadd.xlane.f32.xlu0 %v1059_v8 }
  0xf6   : > { %v1044_v9 = vpop.f32.mrf.mxu0 }
  0xf7   : > { %v1057_v10 = vpop.f32.mrf.mxu1 }
 0x168   : > { %v1061_v18 = vpop.xlane.xlu0 %1060 }
 0x169   : > { %v1069_v19 = vmul.f32 %v1068_v17, %v1061_v18 }
 0x16b   : > { %v1070_v20 = vsub.f32 %v1059_v8, %v1069_v19 }
 0x16d   : > { %v1071_v21 = vmul.f32 %v1070_v20, %v1070_v20 }
 0x16f   : > { %1072 = vadd.xlane.f32.xlu0 %v1071_v21 }
 0x1e2   : > { %v1073_v22 = vpop.xlane.xlu0 %1072 }
 0x1e3   : > { %v1074_v23 = vmul.f32 %v1073_v22, %v1068_v17 }
 0x1e5   : > { %v1075_v24 = vadd.f32 1e-05, %v1074_v23 }
 0x1e7   : > { %1634 = vrsqrt.f32 %v1075_v24  ;;  %vm1082_vm2 = vweird.f32 %v1075_v24 }
 0x1ed   : > { %v1635_v25 = vpop.eup %1634 }
 0x1ee   : > { %v1077_v26 = vmul.f32 %v1635_v25, %v1075_v24  ;;  %vm1083_vm1 = vweird.f32 %v1635_v25 }
 0x1ef   : > { %vm1084_vm3 = vmor %vm1082_vm2, %vm1083_vm1 }
 0x1f0   : > { %v1078_v27 = vmul.f32 %v1635_v25, %v1077_v26 }
 0x1f2   : > { %v1079_v28 = vmul.f32 0.5, %v1078_v27 }
 0x1f4   : > { %v1080_v29 = vsub.f32 1.5, %v1079_v28 }
 0x1f6   : > { %v1081_v30 = vmul.f32 %v1635_v25, %v1080_v29 }
 0x1f8   : > { %v1085_v32 = vsel %vm1084_vm3, %v1635_v25, %v1081_v30 }
 0x1f9   : > { %v1086_v34 = vmul.f32 %v1085_v32, %v1070_v20 }
 0x1fb   : > { %v1088_v35 = vmul.f32 %v1087_v31, %v1086_v34 }
 0x1fd   : > { %v1090_v36 = vadd.f32 %v1089_v33, %v1088_v35 }
 0x1ff   : > { %1091 = vst [vmem:[%s1789_s11] sm:$0xff] %v1090_v36 }
 0x200 PF: > { %s16_s15 = sadd.s32 1, %s1710_s15  }
 0x201   : > { %p13_p7 = scmp.ge.s32.totalorder %s16_s15, 4  }
 0x203   :  { %15 = sbr.rel (!%p13_p7) target bundleno = 2 (0x2), region = 78 }
 0x208   :  { %1115 = vsyncpa [#allocation3], 1 }
 0x209   :  { %1117 = vsyncpa [#allocation3 + $0x1], 1 }
 0x20a   :  { %1118 = vsyncpa [#allocation5], 1 }

// kernel: forward.3
= control target key start
LH: loop header
LB: loop body
LE: loop exit
PB: predicated region body
PF: predicated region fallthrough
CT: control target
= control target key end

     0   :  { %12 = vsyncpa [#allocation4], 0  ;;  %s6492_s0 = inlined_call_operand.vmem [shape: f32[2,8,256], index: 0, kind: input, shape index: {}]   ;;  %s6493_s1 = inlined_call_operand.hbm [shape: bf16[8,256,768], index: 1, kind: input, shape index: {}]   ;;  %s6494_s2 = inlined_call_operand.hbm [shape: bf16[8,256,256], index: 2, kind: input, shape index: {}]   ;;  %s6495_s3 = inlined_call_operand.hbm [shape: bf16[8,256,256], index: 3, kind: input, shape index: {}]   ;;  %s6496_s4 = inlined_call_operand.hbm [shape: bf16[8,256,384], index: 4, kind: input, shape index: {}]   ;;  %s6497_s5 = inlined_call_operand.hbm [shape: bf16[8,384,256], index: 5, kind: input, shape index: {}]   ;;  %s6498_s6 = inlined_call_operand.hbm [shape: f32[8,8,384], index: 6, kind: input, shape index: {}]   ;;  %s6499_s7 = inlined_call_operand.hbm [shape: f32[2,8,256], index: 7, kind: output, shape index: {}]  }
   0x1   :  { %13 = vsyncpa [#allocation7], 0 }
   0x2   :  { %14 = vsyncpa [#allocation10], 0 }
   0x3   :  { %15 = vsyncpa [#allocation13], 0 }
   0x4   :  { %16 = vsyncpa [#allocation5], 0  ;;  %s5330_s24 = smov 0   ;;  %s5332_s25 = smov 0  }
   0x5   :  { %s5334_s26 = smov 0  }
   0x6 LB: > { %s252_s29 = sshll.u32 %s6494_s2, 4  ;;  %s3488_s30 = sadd.s32 4294967295, %s5271_s26   ;;  %s5271_s26 = sphi %s5334_s26, %s22_s26   ;;  %s5267_s25 = sphi %s5332_s25, %s6520_s25   ;;  %s5263_s24 = sphi %s5330_s24, %s6519_s24   ;;  %s253_s29 = int_to_ptr.hbm [resolvable:$true] %s252_s29 }
   0x7   : > { %p3489_p0 = scmp.ge.s32.totalorder %s5271_s26, 1  ;;  %p217_p1 = scmp.lt.s32.totalorder %s5271_s26, 9 }
   0x8   : > { %p5353_p2 = scmp.eq.s32.totalorder %s3488_s30, 0  ;;  %s5273_s10 = smov [#allocation6]  }
   0x9   : > { %p5357_p3 = pnand %p3489_p0, %p217_p1  ;;  %s254_s11 = sshll.u32 %s5273_s10, 4  ;;  %s255_s11 = int_to_ptr.vmem [resolvable:$true] %s254_s11 }
   0xa   : > { %s280_s14 = sshll.u32 %s6496_s4, 4  ;;  %s5274_s16 = smov [#allocation9]   ;;  %s281_s14 = int_to_ptr.hbm [resolvable:$true] %s280_s14 }
   0xb   : > { %p4861_p4 = pneg %p5357_p3  ;;  %s282_s17 = sshll.u32 %s5274_s16, 4  ;;  %s283_s17 = int_to_ptr.vmem [resolvable:$true] %s282_s17 }
   0xc   : > { %s5275_s18 = smov 128   ;;  %s5276_s19 = smov 8  }
   0xd   : > { %p5368_p5 = pnand %p5353_p2, %p4861_p4  ;;  %s5277_s20 = smov 192  }
   0xe   : > { %s5278_s21 = smov 12   ;;  %s238_s27 = sshll.u32 %s6493_s1, 4  ;;  %s239_s27 = int_to_ptr.hbm [resolvable:$true] %s238_s27 }
   0xf   : > { %4867 = dma.hbm_to_vmem [thread:$0]  (!%p5368_p5), %s253_s29, 32768, %s255_s11, [#allocation7], %s5275_s18, %s5275_s18, %s5276_s19  }
  0x10   : > { %4873 = dma.hbm_to_vmem [thread:$0]  (!%p5368_p5), %s281_s14, 49152, %s283_s17, [#allocation10], %s5277_s20, %s5277_s20, %s5278_s21  }
  0x11   : > { %s31_s28 = sadd.s32 1, %s5267_s25  ;;  %s5279_s10 = smov [#allocation3]  }
  0x12   : > { %p32_p6 = scmp.ge.s32.totalorder %s31_s28, 8  ;;  %s240_s12 = sshll.u32 %s5279_s10, 4  ;;  %s241_s12 = int_to_ptr.vmem [resolvable:$true] %s240_s12 }
  0x13   : > { %s5280_s13 = smov 384   ;;  %s5281_s29 = smov 24  }
  0x14   : > { %s6522_s28 = smov (%p32_p6, %s31_s28), 0  ;;  %s266_s16 = sshll.u32 %s6495_s3, 4  ;;  %s267_s16 = int_to_ptr.hbm [resolvable:$true] %s266_s16 }
  0x15   : > { %4864 = dma.hbm_to_vmem [thread:$0]  (!%p5368_p5), %s239_s27, 98304, %s241_s12, [#allocation4], %s5280_s13, %s5280_s13, %s5281_s29  }
  0x16   : > { %s5282_s17 = smov [#allocation8]   ;;  %s294_s23 = sshll.u32 %s6497_s5, 4  ;;  %s295_s23 = int_to_ptr.hbm [resolvable:$true] %s294_s23 }
  0x17   : > { %s268_s20 = sshll.u32 %s5282_s17, 4  ;;  %s5283_s27 = smov [#allocation11]   ;;  %s269_s20 = int_to_ptr.vmem [resolvable:$true] %s268_s20 }
  0x18   : > { %4870 = dma.hbm_to_vmem [thread:$0]  (!%p5368_p5), %s267_s16, 32768, %s269_s20, [#allocation7], %s5275_s18, %s5275_s18, %s5276_s19  }
  0x19   : > { %s296_s10 = sshll.u32 %s5283_s27, 4  ;;  %s308_s14 = sshll.u32 %s6498_s6, 4  ;;  %s297_s10 = int_to_ptr.vmem [resolvable:$true] %s296_s10  ;;  %s309_s14 = int_to_ptr.hbm [resolvable:$true] %s308_s14 }
  0x1a   : > { %4876 = dma.hbm_to_vmem [thread:$0]  (!%p5368_p5), %s295_s23, 49152, %s297_s10, [#allocation10], %s5275_s18, %s5275_s18, %s5276_s19  }
  0x1b   : > { %s5284_s17 = smov [#allocation12]   ;;  %326 = sbr.rel (%p5357_p3) target bundleno = 2026 (0x7ea), region = 48 }
  0x1c   : > { %s310_s21 = sshll.u32 %s5284_s17, 4  ;;  %s311_s21 = int_to_ptr.vmem [resolvable:$true] %s310_s21 }
  0x1d   : > { %4879 = dma.hbm_to_vmem [thread:$0]  (!%p5368_p5), %s309_s14, 3072, %s311_s21, [#allocation13], %s5280_s13, %s5280_s13, %s5281_s29  }
  0x20   : > { %5242 = dma.done.wait (%p5353_p2), [#allocation4], 98304  }
  0x21   : > { %5244 = vsyncadd (%p5353_p2), [#allocation4], 4294868992 }
  0x22   : > { %5246 = dma.done.wait (%p5353_p2), [#allocation7], 65536  }
  0x23   : > { %5248 = vsyncadd (%p5353_p2), [#allocation7], 4294901760 }
  0x24   : > { %5250 = dma.done.wait (%p5353_p2), [#allocation10], 98304  }
  0x25   : > { %5252 = vsyncadd (%p5353_p2), [#allocation10], 4294868992 }
  0x26   : > { %5254 = dma.done.wait (%p5353_p2), [#allocation13], 3072  }
  0x27   : > { %5256 = vsyncadd (%p5353_p2), [#allocation13], 4294964224  ;;  %p3504_p7 = scmp.ne.s32.totalorder %s5263_s24, 0 }
  0x29   : > { %391 = sbr.rel (%p3504_p7) target bundleno = 51 (0x33), region = 76 }
  0x2e   : > { %v392_v0 = vld [vmem:[%s6492_s0] sm:$0xff]  ;;  %v393_v1 = vld [vmem:[%s6492_s0 + $0x8] sm:$0xff]  ;;  %v394_v2 = vld [vmem:[%s6492_s0 + $0x10] sm:$0xff] }
  0x2f   : > { %396 = vst [vmem:[#allocation2 + $0x10] sm:$0xff] %v392_v0  ;;  %v395_v3 = vld [vmem:[%s6492_s0 + $0x18] sm:$0xff] }
  0x30   : > { %397 = vst [vmem:[#allocation2] sm:$0xff] %v393_v1 }
  0x31   : > { %398 = vst [vmem:[#allocation2 + $0x18] sm:$0xff] %v394_v2 }
  0x32   : > { %399 = vst [vmem:[#allocation2 + $0x8] sm:$0xff] %v395_v3 }
  0x33 PF: > { %v410_v4 = vlaneseq  ;;  %v5285_v9 = vmov 0.0   ;;  %s4572_s8 = smul.u32 768, %s5263_s24  ;;  %s5286_s10 = smov 64   ;;  %vm1284_vm7 = vcmask 523264  }
  0x34   : > { %s4571_s23 = smul.u32 24, %s5263_s24  ;;  %s4669_s12 = sshll.u32 %s5263_s24, 8 }
  0x35   : > { %v5440_v5 = vand.u32 127, %v410_v4  ;;  %s5461_s22 = scalar_lea.vmem [#allocation3], %s4572_s8  ;;  %s5715_s11 = scalar_lea.vmem [#allocation6], %s4669_s12 }
  0x36   : > { %v5445_v8 = vld [vmem:[#allocation2 + $0x10] sm:$0xff]  ;;  %v4618_v18 = vld [vmem:[%s5461_s22 + $0x164] sm:$0xf0]  ;;  %v3680_v23 = vld [vmem:[%s5461_s22 + $0x168] sm:$0xf0]  ;;  %s5614_s27 = scalar_lea.vmem [#allocation12], %s4571_s23 }
  0x37   : > { %v412_v6 = vadd.s32 128, %v5440_v5  ;;  %v5443_v7 = vld [vmem:[#allocation2] sm:$0xff]  ;;  %v3678_v17 = vld [vmem:[%s5461_s22 + $0x150] sm:$0xf]  ;;  %v4666_v21 = vld [vmem:[%s5461_s22 + $0x2e4] sm:$0xf0] }
  0x38   : > { %v5457_v15 = vld [vmem:[#allocation2 + $0x18] sm:$0xff]  ;;  %v3870_v19 = vld [vmem:[%s5461_s22 + $0x2d0] sm:$0xf]  ;;  %v3679_v20 = vor.u32 %v4618_v18, %v3678_v17  ;;  %v4615_v22 = vld [vmem:[%s5461_s22 + $0x154] sm:$0xf]  ;;  %vm1252_vm8 = vcmp.lt.s32.totalorder %v5440_v5, 8 }
  0x39   : > { %vm414_vm0 = vcmp.lt.s32.totalorder %v412_v6, 180  ;;  %v5452_v12 = vld [vmem:[#allocation2 + $0x8] sm:$0xff]  ;;  %v3871_v24 = vor.u32 %v4666_v21, %v3870_v19  ;;  %v3683_v25 = vor.u32 %v4615_v22, %v3680_v23  ;;  %v4663_v26 = vld [vmem:[%s5461_s22 + $0x2d4] sm:$0xf]  ;;  %v3654_v28 = vld [vmem:[%s5461_s22 + $0x120] sm:$0xf] }
  0x3a   : > { %v5448_v10 = vsel %vm414_vm0, 1.0, %v5285_v9  ;;  %v3872_v27 = vld [vmem:[%s5461_s22 + $0x2e8] sm:$0xf0]  ;;  %1070 = vmatpush.bf16.msra.mxu0 %v3679_v20  ;;  %v4612_v30 = vld [vmem:[%s5461_s22 + $0x134] sm:$0xf0]  ;;  %vm1263_vm11 = vcmp.ge.s32.totalorder %v5440_v5, 8 }
  0x3b   : > { %v420_v11 = vmul.f32 %v5448_v10, %v5443_v7  ;;  %v422_v14 = vmul.f32 %v5448_v10, %v5452_v12  ;;  %v3875_v29 = vor.u32 %v4663_v26, %v3872_v27  ;;  %v3846_v31 = vld [vmem:[%s5461_s22 + $0x2a0] sm:$0xf]  ;;  %v4660_v32 = vld [vmem:[%s5461_s22 + $0x2b4] sm:$0xf0]  ;;  %1084 = vmatpush.bf16.msra.mxu1 %v3871_v24  ;;  %1098 = vmatpush.bf16.msra.mxu2 %v3683_v25  ;;  %v4609_v35 = vld [vmem:[%s5461_s22 + $0x124] sm:$0xf] }
  0x3c   : > { %v3655_v33 = vor.u32 %v4612_v30, %v3654_v28  ;;  %v3847_v34 = vor.u32 %v4660_v32, %v3846_v31  ;;  %v3656_v36 = vld [vmem:[%s5461_s22 + $0x138] sm:$0xf0]  ;;  %v4657_v37 = vld [vmem:[%s5461_s22 + $0x2a4] sm:$0xf]  ;;  %v3630_v40 = vld [vmem:[%s5461_s22 + $0xf0] sm:$0xf] }
  0x3d   : > { %v423_v13 = vadd.f32 %v420_v11, %v5445_v8  ;;  %v426_v16 = vadd.f32 %v422_v14, %v5457_v15  ;;  %1112 = vmatpush.bf16.msra.mxu3 %v3875_v29  ;;  %v3659_v38 = vor.u32 %v4609_v35, %v3656_v36  ;;  %v3848_v39 = vld [vmem:[%s5461_s22 + $0x2b8] sm:$0xf0]  ;;  %v4606_v41 = vld [vmem:[%s5461_s22 + $0x104] sm:$0xf0]  ;;  %v3822_v43 = vld [vmem:[%s5461_s22 + $0x270] sm:$0xf] }
  0x3e   : > { %v3851_v42 = vor.u32 %v4657_v37, %v3848_v39  ;;  %v4654_v44 = vld [vmem:[%s5461_s22 + $0x284] sm:$0xf0]  ;;  %v4603_v45 = vld [vmem:[%s5461_s22 + $0xf4] sm:$0xf]  ;;  %1071 = vmatpush.bf16.msra.mxu0 %v3655_v33  ;;  %v3631_v46 = vor.u32 %v4606_v41, %v3630_v40  ;;  %v3632_v47 = vld [vmem:[%s5461_s22 + $0x108] sm:$0xf0] }
  0x3f   : > { %424 = vadd.xlane.f32.xlu0 %v423_v13  ;;  %v4651_v48 = vld [vmem:[%s5461_s22 + $0x274] sm:$0xf]  ;;  %v3824_v49 = vld [vmem:[%s5461_s22 + $0x288] sm:$0xf0]  ;;  %1085 = vmatpush.bf16.msra.mxu1 %v3847_v34  ;;  %v3823_v50 = vor.u32 %v4654_v44, %v3822_v43  ;;  %v3635_v51 = vor.u32 %v4603_v45, %v3632_v47  ;;  %v3606_v52 = vld [vmem:[%s5461_s22 + $0xc0] sm:$0xf] }
  0x40   : > { %1099 = vmatpush.bf16.msra.mxu2 %v3659_v38  ;;  %v4600_v53 = vld [vmem:[%s5461_s22 + $0xd4] sm:$0xf0]  ;;  %v3798_v54 = vld [vmem:[%s5461_s22 + $0x240] sm:$0xf]  ;;  %v3827_v55 = vor.u32 %v4651_v48, %v3824_v49  ;;  %v4597_v57 = vld [vmem:[%s5461_s22 + $0xc4] sm:$0xf] }
  0x41   : > { %1113 = vmatpush.bf16.msra.mxu3 %v3851_v42  ;;  %v4648_v56 = vld [vmem:[%s5461_s22 + $0x254] sm:$0xf0]  ;;  %v3608_v58 = vld [vmem:[%s5461_s22 + $0xd8] sm:$0xf0]  ;;  %v4645_v59 = vld [vmem:[%s5461_s22 + $0x244] sm:$0xf]  ;;  %v3607_v61 = vor.u32 %v4600_v53, %v3606_v52 }
  0x42   : > { %v3800_v60 = vld [vmem:[%s5461_s22 + $0x258] sm:$0xf0]  ;;  %1072 = vmatpush.bf16.msra.mxu0 %v3631_v46  ;;  %v3582_v62 = vld [vmem:[%s5461_s22 + $0x90] sm:$0xf]  ;;  %v3799_v63 = vor.u32 %v4648_v56, %v3798_v54  ;;  %v3611_v0 = vor.u32 %v4597_v57, %v3608_v58  ;;  %v4594_v1 = vld [vmem:[%s5461_s22 + $0xa4] sm:$0xf0] }
  0x43   : > { %1086 = vmatpush.bf16.msra.mxu1 %v3823_v50  ;;  %v3774_v2 = vld [vmem:[%s5461_s22 + $0x210] sm:$0xf]  ;;  %v4642_v3 = vld [vmem:[%s5461_s22 + $0x224] sm:$0xf0]  ;;  %v3803_v11 = vor.u32 %v4645_v59, %v3800_v60  ;;  %v4591_v13 = vld [vmem:[%s5461_s22 + $0x94] sm:$0xf]  ;;  %v3583_v19 = vor.u32 %v4594_v1, %v3582_v62 }
  0x44   : > { %1100 = vmatpush.bf16.msra.mxu2 %v3635_v51  ;;  %v3584_v14 = vld [vmem:[%s5461_s22 + $0xa8] sm:$0xf0]  ;;  %v4639_v17 = vld [vmem:[%s5461_s22 + $0x214] sm:$0xf]  ;;  %v3775_v20 = vor.u32 %v4642_v3, %v3774_v2  ;;  %v3558_v35 = vld [vmem:[%s5461_s22 + $0x60] sm:$0xf] }
  0x45   : > { %1114 = vmatpush.bf16.msra.mxu3 %v3827_v55  ;;  %v3776_v18 = vld [vmem:[%s5461_s22 + $0x228] sm:$0xf0]  ;;  %v3587_v23 = vor.u32 %v4591_v13, %v3584_v14  ;;  %v4636_v37 = vld [vmem:[%s5461_s22 + $0x1f4] sm:$0xf0]  ;;  %v4585_v38 = vld [vmem:[%s5461_s22 + $0x64] sm:$0xf] }
  0x46   : > { %1073 = vmatpush.bf16.msra.mxu0 %v3607_v61  ;;  %v3779_v24 = vor.u32 %v4639_v17, %v3776_v18  ;;  %v3560_v39 = vld [vmem:[%s5461_s22 + $0x78] sm:$0xf0]  ;;  %v4633_v42 = vld [vmem:[%s5461_s22 + $0x1e4] sm:$0xf]  ;;  %v3534_v45 = vld [vmem:[%s5461_s22 + $0x30] sm:$0xf] }
  0x47   : > { %427 = vadd.xlane.f32.xlu0 %v426_v16  ;;  %1087 = vmatpush.bf16.msra.mxu1 %v3799_v63  ;;  %v3563_v41 = vor.u32 %v4585_v38, %v3560_v39  ;;  %v3752_v43 = vld [vmem:[%s5461_s22 + $0x1f8] sm:$0xf0]  ;;  %v4582_v46 = vld [vmem:[%s5461_s22 + $0x44] sm:$0xf0]  ;;  %v3726_v47 = vld [vmem:[%s5461_s22 + $0x1b0] sm:$0xf] }
  0x48   : > { %1101 = vmatpush.bf16.msra.mxu2 %v3611_v0  ;;  %v3755_v44 = vor.u32 %v4633_v42, %v3752_v43  ;;  %v3535_v48 = vor.u32 %v4582_v46, %v3534_v45  ;;  %v4630_v49 = vld [vmem:[%s5461_s22 + $0x1c4] sm:$0xf0]  ;;  %v4579_v50 = vld [vmem:[%s5461_s22 + $0x34] sm:$0xf]  ;;  %v3536_v51 = vld [vmem:[%s5461_s22 + $0x48] sm:$0xf0] }
  0x49   : > { %1115 = vmatpush.bf16.msra.mxu3 %v3803_v11  ;;  %v3727_v52 = vor.u32 %v4630_v49, %v3726_v47  ;;  %v3539_v53 = vor.u32 %v4579_v50, %v3536_v51  ;;  %v4627_v54 = vld [vmem:[%s5461_s22 + $0x1b4] sm:$0xf]  ;;  %v3728_v55 = vld [vmem:[%s5461_s22 + $0x1c8] sm:$0xf0]  ;;  %v3510_v57 = vld [vmem:[%s5461_s22] sm:$0xf] }
  0x4a   : > { %1074 = vmatpush.bf16.msra.mxu0 %v3583_v19  ;;  %v3731_v56 = vor.u32 %v4627_v54, %v3728_v55  ;;  %v4576_v58 = vld [vmem:[%s5461_s22 + $0x14] sm:$0xf0]  ;;  %v3702_v59 = vld [vmem:[%s5461_s22 + $0x180] sm:$0xf]  ;;  %v4573_v62 = vld [vmem:[%s5461_s22 + $0x4] sm:$0xf] }
  0x4b   : > { %1088 = vmatpush.bf16.msra.mxu1 %v3775_v20  ;;  %v3511_v60 = vor.u32 %v4576_v58, %v3510_v57  ;;  %v4624_v61 = vld [vmem:[%s5461_s22 + $0x194] sm:$0xf0]  ;;  %v3512_v63 = vld [vmem:[%s5461_s22 + $0x18] sm:$0xf0]  ;;  %v4621_v2 = vld [vmem:[%s5461_s22 + $0x184] sm:$0xf] }
  0x4c   : > { %1102 = vmatpush.bf16.msra.mxu2 %v3587_v23  ;;  %v3703_v0 = vor.u32 %v4624_v61, %v3702_v59  ;;  %v3515_v1 = vor.u32 %v4573_v62, %v3512_v63  ;;  %v3704_v3 = vld [vmem:[%s5461_s22 + $0x198] sm:$0xf0]  ;;  %v4619_v13 = vld [vmem:[%s5461_s22 + $0x16c] sm:$0xf0]  ;;  %v3878_v14 = vld [vmem:[%s5461_s22 + $0x2d8] sm:$0xf] }
  0x4d   : > { %1116 = vmatpush.bf16.msra.mxu3 %v3779_v24  ;;  %v3707_v11 = vor.u32 %v4621_v2, %v3704_v3  ;;  %v4616_v19 = vld [vmem:[%s5461_s22 + $0x15c] sm:$0xf]  ;;  %v3688_v20 = vld [vmem:[%s5461_s22 + $0x170] sm:$0xf0]  ;;  %v4607_v38 = vld [vmem:[%s5461_s22 + $0x10c] sm:$0xf0] }
  0x4e   : > { %v3691_v23 = vor.u32 %v4616_v19, %v3688_v20  ;;  %v3880_v24 = vld [vmem:[%s5461_s22 + $0x2f0] sm:$0xf0]  ;;  %v3830_v39 = vld [vmem:[%s5461_s22 + $0x278] sm:$0xf]  ;;  %v4604_v42 = vld [vmem:[%s5461_s22 + $0xfc] sm:$0xf] }
  0x4f   : > { %v3640_v43 = vld [vmem:[%s5461_s22 + $0x110] sm:$0xf0]  ;;  %v4652_v46 = vld [vmem:[%s5461_s22 + $0x27c] sm:$0xf]  ;;  %v3614_v49 = vld [vmem:[%s5461_s22 + $0xc8] sm:$0xf] }
  0x50   : > { %1103 = vmatpush.bf16.msra.mxu2 %v3563_v41  ;;  %v4655_v41 = vld [vmem:[%s5461_s22 + $0x28c] sm:$0xf0]  ;;  %v3643_v45 = vor.u32 %v4604_v42, %v3640_v43  ;;  %v3832_v47 = vld [vmem:[%s5461_s22 + $0x290] sm:$0xf0]  ;;  %v4601_v50 = vld [vmem:[%s5461_s22 + $0xdc] sm:$0xf0] }
  0x51   : > { %1117 = vmatpush.bf16.msra.mxu3 %v3755_v44  ;;  %v3831_v44 = vor.u32 %v4655_v41, %v3830_v39  ;;  %v3806_v51 = vld [vmem:[%s5461_s22 + $0x248] sm:$0xf]  ;;  %v4598_v54 = vld [vmem:[%s5461_s22 + $0xcc] sm:$0xf]  ;;  %v3616_v55 = vld [vmem:[%s5461_s22 + $0xe0] sm:$0xf0] }
  0x52   : > { %v3619_v57 = vor.u32 %v4598_v54, %v3616_v55  ;;  %v4646_v58 = vld [vmem:[%s5461_s22 + $0x24c] sm:$0xf]  ;;  %v3808_v59 = vld [vmem:[%s5461_s22 + $0x260] sm:$0xf0]  ;;  %v3590_v61 = vld [vmem:[%s5461_s22 + $0x98] sm:$0xf] }
  0x53   : > { %v4595_v62 = vld [vmem:[%s5461_s22 + $0xac] sm:$0xf0]  ;;  %v3782_v63 = vld [vmem:[%s5461_s22 + $0x218] sm:$0xf]  ;;  %v4592_v2 = vld [vmem:[%s5461_s22 + $0x9c] sm:$0xf] }
  0x54   : > { %1104 = vmatpush.bf16.msra.mxu2 %v3539_v53  ;;  %v4649_v53 = vld [vmem:[%s5461_s22 + $0x25c] sm:$0xf0]  ;;  %v3592_v3 = vld [vmem:[%s5461_s22 + $0xb0] sm:$0xf0]  ;;  %v3758_v19 = vld [vmem:[%s5461_s22 + $0x1e8] sm:$0xf] }
  0x55   : > { %1118 = vmatpush.bf16.msra.mxu3 %v3731_v56  ;;  %v3807_v56 = vor.u32 %v4649_v53, %v3806_v51  ;;  %v4628_v39 = vld [vmem:[%s5461_s22 + $0x1bc] sm:$0xf]  ;;  %v4622_v53 = vld [vmem:[%s5461_s22 + $0x18c] sm:$0xf]  ;;  %v3712_v54 = vld [vmem:[%s5461_s22 + $0x1a0] sm:$0xf0] }
  0x56   : > { %vm1266_vm12 = vcmp.lt.s32.totalorder %v5440_v5, 16  ;;  %vm1330_vm0 = vcmask 130048   ;;  %s5951_s14 = scalar_lea.vmem [#allocation8], %s4669_s12  ;;  %s4735_s17 = smul.u32 384, %s5263_s24 }
  0x57   : > { %vm1268_vm13 = vmand %vm1263_vm11, %vm1266_vm12  ;;  %p4566_p8 = scmp.ne.s32.totalorder %s5263_s24, 7 }
  0x58   : > { %1105 = vmatpush.bf16.msra.mxu2 %v3515_v1  ;;  %v4643_v1 = vld [vmem:[%s5461_s22 + $0x22c] sm:$0xf0]  ;;  %s6216_s21 = scalar_lea.vmem [#allocation9], %s4735_s17  ;;  %s6338_s9 = scalar_lea.vmem [#allocation11], %s4735_s17 }
  0x59   : > { %1119 = vmatpush.bf16.msra.mxu3 %v3707_v11  ;;  %v3595_v11 = vor.u32 %v4592_v2, %v3592_v3 }
  0x5c   : > { %1154 = vmatpush.bf16.msrb.mxu2 %v3691_v23  ;;  %v4586_v23 = vld [vmem:[%s5461_s22 + $0x6c] sm:$0xf] }
  0xb2   : > { %v425_v6 = vpop.xlane.xlu0 %424 }
  0xb3   : > { %v429_v16 = vmul.f32 0.0055555557, %v425_v6  ;;  %v3686_v6 = vld [vmem:[%s5461_s22 + $0x158] sm:$0xf] }
  0xb4   : > { %v3687_v17 = vor.u32 %v4619_v13, %v3686_v6  ;;  %v3783_v6 = vor.u32 %v4643_v1, %v3782_v63  ;;  %v4640_v13 = vld [vmem:[%s5461_s22 + $0x21c] sm:$0xf] }
  0xb5   : > { %v5504_v21 = vsub.f32 %v5445_v8, %v429_v16  ;;  %v432_v22 = vsub.f32 %v5443_v7, %v429_v16  ;;  %v4667_v16 = vld [vmem:[%s5461_s22 + $0x2ec] sm:$0xf0] }
  0xb6   : > { %v3879_v18 = vor.u32 %v4667_v16, %v3878_v14  ;;  %v3784_v14 = vld [vmem:[%s5461_s22 + $0x230] sm:$0xf0] }
  0xb7   : > { %v5508_v25 = vmul.f32 %v5448_v10, %v432_v22  ;;  %v439_v26 = vmul.f32 %v5504_v21, %v5504_v21  ;;  %v4664_v22 = vld [vmem:[%s5461_s22 + $0x2dc] sm:$0xf]  ;;  %v3787_v16 = vor.u32 %v4640_v13, %v3784_v14 }
  0xb9   : > { %v440_v27 = vmul.f32 %v5508_v25, %v5508_v25 }
  0xba   : > { %v428_v7 = vpop.xlane.xlu0 %427 }
  0xbb   : > { %v430_v8 = vmul.f32 0.0055555557, %v428_v7  ;;  %v443_v28 = vadd.f32 %v440_v27, %v439_v26  ;;  %v3662_v26 = vld [vmem:[%s5461_s22 + $0x128] sm:$0xf]  ;;  %v4613_v27 = vld [vmem:[%s5461_s22 + $0x13c] sm:$0xf0]  ;;  %v3883_v7 = vor.u32 %v4664_v22, %v3880_v24 }
  0xbc   : > { %v4637_v22 = vld [vmem:[%s5461_s22 + $0x1fc] sm:$0xf0]  ;;  %v3568_v24 = vld [vmem:[%s5461_s22 + $0x80] sm:$0xf0] }
  0xbd   : > { %v5515_v29 = vsub.f32 %v5457_v15, %v430_v8  ;;  %v434_v30 = vsub.f32 %v5452_v12, %v430_v8  ;;  %444 = vadd.xlane.f32.xlu1 %v443_v28  ;;  %v4588_v15 = vld [vmem:[%s5461_s22 + $0x74] sm:$0xf0]  ;;  %v3750_v12 = vld [vmem:[%s5461_s22 + $0x1e0] sm:$0xf]  ;;  %v3663_v8 = vor.u32 %v4613_v27, %v3662_v26  ;;  %v3854_v28 = vld [vmem:[%s5461_s22 + $0x2a8] sm:$0xf]  ;;  %1168 = vmatpush.bf16.msrb.mxu3 %v3883_v7 }
  0xbe   : > { %v3559_v36 = vor.u32 %v4588_v15, %v3558_v35  ;;  %v3751_v40 = vor.u32 %v4636_v37, %v3750_v12  ;;  %v4658_v35 = vld [vmem:[%s5461_s22 + $0x2ac] sm:$0xf]  ;;  %v3856_v15 = vld [vmem:[%s5461_s22 + $0x2c0] sm:$0xf0]  ;;  %v3638_v37 = vld [vmem:[%s5461_s22 + $0xf8] sm:$0xf]  ;;  %v3759_v26 = vor.u32 %v4637_v22, %v3758_v19  ;;  %v3571_v27 = vor.u32 %v4586_v23, %v3568_v24 }
  0xbf   : > { %v5519_v31 = vmul.f32 %v5448_v10, %v434_v30  ;;  %v441_v32 = vmul.f32 %v5515_v29, %v5515_v29  ;;  %v4661_v30 = vld [vmem:[%s5461_s22 + $0x2bc] sm:$0xf0]  ;;  %v4634_v7 = vld [vmem:[%s5461_s22 + $0x1ec] sm:$0xf] }
  0xc0   : > { %1075 = vmatpush.bf16.msra.mxu0 %v3559_v36  ;;  %1089 = vmatpush.bf16.msra.mxu1 %v3751_v40  ;;  %v3859_v36 = vor.u32 %v4658_v35, %v3856_v15  ;;  %v3639_v40 = vor.u32 %v4607_v38, %v3638_v37  ;;  %v3544_v38 = vld [vmem:[%s5461_s22 + $0x50] sm:$0xf0] }
  0xc1   : > { %v442_v33 = vmul.f32 %v5519_v31, %v5519_v31 }
  0xc2   : > { %1169 = vmatpush.bf16.msrb.mxu3 %v3859_v36  ;;  %v4580_v36 = vld [vmem:[%s5461_s22 + $0x3c] sm:$0xf] }
  0xc3   : > { %v446_v34 = vadd.f32 %v442_v33, %v441_v32  ;;  %v4610_v32 = vld [vmem:[%s5461_s22 + $0x12c] sm:$0xf]  ;;  %v3855_v33 = vor.u32 %v4661_v30, %v3854_v28  ;;  %v3547_v42 = vor.u32 %v4580_v36, %v3544_v38  ;;  %v3696_v38 = vld [vmem:[%s5461_s22 + $0x178] sm:$0xf0] }
  0xc4   : > { %1076 = vmatpush.bf16.msra.mxu0 %v3535_v48  ;;  %1090 = vmatpush.bf16.msra.mxu1 %v3727_v52  ;;  %v3835_v48 = vor.u32 %v4652_v46, %v3832_v47  ;;  %v3615_v52 = vor.u32 %v4601_v50, %v3614_v49  ;;  %v3710_v46 = vld [vmem:[%s5461_s22 + $0x188] sm:$0xf]  ;;  %v4574_v49 = vld [vmem:[%s5461_s22 + $0xc] sm:$0xf]  ;;  %v3520_v50 = vld [vmem:[%s5461_s22 + $0x20] sm:$0xf0] }
  0xc5   : > { %447 = vadd.xlane.f32.xlu1 %v446_v34  ;;  %v3664_v34 = vld [vmem:[%s5461_s22 + $0x140] sm:$0xf0] }
  0xc6   : > { %v3667_v12 = vor.u32 %v4610_v32, %v3664_v34  ;;  %1170 = vmatpush.bf16.msrb.mxu3 %v3835_v48  ;;  %v3542_v32 = vld [vmem:[%s5461_s22 + $0x38] sm:$0xf]  ;;  %v4625_v48 = vld [vmem:[%s5461_s22 + $0x19c] sm:$0xf0] }
  0xc7   : > { %v3734_v34 = vld [vmem:[%s5461_s22 + $0x1b8] sm:$0xf]  ;;  %v3711_v51 = vor.u32 %v4625_v48, %v3710_v46  ;;  %v4662_v48 = vld [vmem:[%s5461_s22 + $0x2c4] sm:$0xf0] }
  0xc8   : > { %1077 = vmatpush.bf16.msra.mxu0 %v3511_v60  ;;  %1091 = vmatpush.bf16.msra.mxu1 %v3703_v0  ;;  %v3811_v60 = vor.u32 %v4646_v58, %v3808_v59  ;;  %v3591_v0 = vor.u32 %v4595_v62, %v3590_v61 }
  0xc9   : > { %1155 = vmatpush.bf16.msrb.mxu2 %v3667_v12  ;;  %v4631_v12 = vld [vmem:[%s5461_s22 + $0x1cc] sm:$0xf0] }
  0xca   : > { %1171 = vmatpush.bf16.msrb.mxu3 %v3811_v60  ;;  %v3735_v37 = vor.u32 %v4631_v12, %v3734_v34  ;;  %v4668_v34 = vld [vmem:[%s5461_s22 + $0x2f4] sm:$0xf0] }
  0xcc   : > { %1126 = vmatpush.bf16.msrb.mxu0 %v3687_v17  ;;  %1140 = vmatpush.bf16.msrb.mxu1 %v3879_v18  ;;  %v3566_v17 = vld [vmem:[%s5461_s22 + $0x68] sm:$0xf]  ;;  %v4589_v18 = vld [vmem:[%s5461_s22 + $0x7c] sm:$0xf0] }
  0xcd   : > { %1156 = vmatpush.bf16.msrb.mxu2 %v3643_v45  ;;  %v3567_v20 = vor.u32 %v4589_v18, %v3566_v17  ;;  %v4577_v45 = vld [vmem:[%s5461_s22 + $0x1c] sm:$0xf0] }
  0xce   : > { %1172 = vmatpush.bf16.msrb.mxu3 %v3787_v16 }
  0xd0   : > { %1127 = vmatpush.bf16.msrb.mxu0 %v3663_v8  ;;  %1141 = vmatpush.bf16.msrb.mxu1 %v3855_v33  ;;  %v3760_v8 = vld [vmem:[%s5461_s22 + $0x200] sm:$0xf0]  ;;  %v4583_v33 = vld [vmem:[%s5461_s22 + $0x4c] sm:$0xf0] }
  0xd1   : > { %1157 = vmatpush.bf16.msrb.mxu2 %v3619_v57  ;;  %v3763_v28 = vor.u32 %v4634_v7, %v3760_v8  ;;  %v3543_v15 = vor.u32 %v4583_v33, %v3542_v32  ;;  %v4620_v32 = vld [vmem:[%s5461_s22 + $0x174] sm:$0xf0]  ;;  %v3886_v33 = vld [vmem:[%s5461_s22 + $0x2e0] sm:$0xf] }
  0xd3   : > { %1173 = vmatpush.bf16.msrb.mxu3 %v3763_v28 }
  0xd4   : > { %1128 = vmatpush.bf16.msrb.mxu0 %v3639_v40  ;;  %1142 = vmatpush.bf16.msrb.mxu1 %v3831_v44  ;;  %v3736_v40 = vld [vmem:[%s5461_s22 + $0x1d0] sm:$0xf0]  ;;  %v3518_v44 = vld [vmem:[%s5461_s22 + $0x8] sm:$0xf] }
  0xd5   : > { %1158 = vmatpush.bf16.msrb.mxu2 %v3595_v11  ;;  %v3739_v43 = vor.u32 %v4628_v39, %v3736_v40  ;;  %v3519_v47 = vor.u32 %v4577_v45, %v3518_v44  ;;  %v408_v11 = vld [vmem:[%s5614_s27 + $0x8] sm:$0xff] }
  0xd6   : > { %v478_v18 = vperm.slane %v408_v11, 0  ;;  %v484_v24 = vperm.slane %v408_v11, 1  ;;  %v4614_v44 = vld [vmem:[%s5461_s22 + $0x144] sm:$0xf0] }
  0xd7   : > { %1174 = vmatpush.bf16.msrb.mxu3 %v3739_v43  ;;  %v3670_v43 = vld [vmem:[%s5461_s22 + $0x130] sm:$0xf] }
  0xd8   : > { %1129 = vmatpush.bf16.msrb.mxu0 %v3615_v52  ;;  %1143 = vmatpush.bf16.msrb.mxu1 %v3807_v56  ;;  %v3523_v52 = vor.u32 %v4574_v49, %v3520_v50  ;;  %v3715_v56 = vor.u32 %v4622_v53, %v3712_v54  ;;  %v4611_v49 = vld [vmem:[%s5461_s22 + $0x134] sm:$0xf]  ;;  %v3672_v50 = vld [vmem:[%s5461_s22 + $0x148] sm:$0xf0]  ;;  %v3671_v53 = vor.u32 %v4614_v44, %v3670_v43 }
  0xd9   : > { %1159 = vmatpush.bf16.msrb.mxu2 %v3571_v27 }
  0xdb   : > { %1175 = vmatpush.bf16.msrb.mxu3 %v3715_v56  ;;  %v4608_v56 = vld [vmem:[%s5461_s22 + $0x114] sm:$0xf0] }
  0xdc   : > { %1130 = vmatpush.bf16.msrb.mxu0 %v3591_v0  ;;  %1144 = vmatpush.bf16.msrb.mxu1 %v3783_v6  ;;  %v407_v6 = vld [vmem:[%s5614_s27] sm:$0xff] }
  0xdd   : > { %1160 = vmatpush.bf16.msrb.mxu2 %v3547_v42  ;;  %v477_v17 = vperm.slane %v407_v6, 0  ;;  %v483_v23 = vperm.slane %v407_v6, 1  ;;  %v3887_v42 = vor.u32 %v4668_v34, %v3886_v33  ;;  %v4602_v6 = vld [vmem:[%s5461_s22 + $0xe4] sm:$0xf0] }
  0xe0   : > { %1131 = vmatpush.bf16.msrb.mxu0 %v3567_v20  ;;  %1145 = vmatpush.bf16.msrb.mxu1 %v3759_v26 }
  0xe1   : > { %1161 = vmatpush.bf16.msrb.mxu2 %v3523_v52  ;;  %v3864_v52 = vld [vmem:[%s5461_s22 + $0x2c8] sm:$0xf0] }
  0xe4   : > { %1132 = vmatpush.bf16.msrb.mxu0 %v3543_v15  ;;  %1146 = vmatpush.bf16.msrb.mxu1 %v3735_v37 }
  0xe8   : > { %1133 = vmatpush.bf16.msrb.mxu0 %v3519_v47  ;;  %1147 = vmatpush.bf16.msrb.mxu1 %v3711_v51  ;;  %v3862_v47 = vld [vmem:[%s5461_s22 + $0x2b0] sm:$0xf]  ;;  %v4659_v51 = vld [vmem:[%s5461_s22 + $0x2b4] sm:$0xf] }
  0xe9   : > { %v3863_v54 = vor.u32 %v4662_v48, %v3862_v47 }
 0x130   : > { %v445_v30 = vpop.xlane.xlu1 %444 }
 0x131   : > { %v449_v35 = vmul.f32 0.0055555557, %v445_v30 }
 0x133   : > { %v451_v41 = vadd.f32 1e-05, %v449_v35  ;;  %v4617_v35 = vld [vmem:[%s5461_s22 + $0x164] sm:$0xf] }
 0x134   : > { %v3699_v45 = vor.u32 %v4617_v35, %v3696_v38  ;;  %v3574_v35 = vld [vmem:[%s5461_s22 + $0x70] sm:$0xf]  ;;  %v4638_v38 = vld [vmem:[%s5461_s22 + $0x204] sm:$0xf0] }
 0x135   : > { %4945 = vrsqrt.f32 %v451_v41  ;;  %vm459_vm2 = vweird.f32 %v451_v41 }
 0x138   : > { %v448_v55 = vpop.xlane.xlu1 %447 }
 0x139   : > { %v450_v57 = vmul.f32 0.0055555557, %v448_v55  ;;  %v3646_v55 = vld [vmem:[%s5461_s22 + $0x100] sm:$0xf] }
 0x13b   : > { %v4946_v58 = vpop.eup %4945  ;;  %v452_v59 = vadd.f32 1e-05, %v450_v57  ;;  %v3675_v57 = vor.u32 %v4611_v49, %v3672_v50  ;;  %v3742_v49 = vld [vmem:[%s5461_s22 + $0x1c0] sm:$0xf]  ;;  %v4632_v50 = vld [vmem:[%s5461_s22 + $0x1d4] sm:$0xf0] }
 0x13c   : > { %v454_v60 = vmul.f32 %v4946_v58, %v451_v41  ;;  %vm460_vm1 = vweird.f32 %v4946_v58 }
 0x13d   : > { %4947 = vrsqrt.f32 %v452_v59  ;;  %vm461_vm3 = vmor %vm459_vm2, %vm460_vm1  ;;  %vm469_vm5 = vweird.f32 %v452_v59  ;;  %vm1281_vm1 = vcmp.lt.s32.totalorder %v5440_v5, 45 }
 0x13e   : > { %v455_v61 = vmul.f32 %v4946_v58, %v454_v60  ;;  %v4656_v60 = vld [vmem:[%s5461_s22 + $0x294] sm:$0xf0] }
 0x140   : > { %v456_v62 = vmul.f32 0.5, %v455_v61  ;;  %v4605_v61 = vld [vmem:[%s5461_s22 + $0x104] sm:$0xf] }
 0x142   : > { %v457_v63 = vsub.f32 1.5, %v456_v62  ;;  %v3648_v62 = vld [vmem:[%s5461_s22 + $0x118] sm:$0xf0] }
 0x143   : > { %v4948_v0 = vpop.eup %4947  ;;  %v3651_v11 = vor.u32 %v4605_v61, %v3648_v62  ;;  %v3718_v61 = vld [vmem:[%s5461_s22 + $0x190] sm:$0xf]  ;;  %v4626_v62 = vld [vmem:[%s5461_s22 + $0x1a4] sm:$0xf0] }
 0x144   : > { %v458_v1 = vmul.f32 %v4946_v58, %v457_v63  ;;  %v464_v2 = vmul.f32 %v4948_v0, %v452_v59  ;;  %vm470_vm4 = vweird.f32 %v4948_v0  ;;  %v3838_v59 = vld [vmem:[%s5461_s22 + $0x280] sm:$0xf]  ;;  %v4653_v63 = vld [vmem:[%s5461_s22 + $0x284] sm:$0xf] }
 0x145   : > { %vm471_vm6 = vmor %vm469_vm5, %vm470_vm4 }
 0x146   : > { %v465_v3 = vmul.f32 %v4948_v0, %v464_v2  ;;  %v462_v13 = vsel %vm461_vm3, %v4946_v58, %v458_v1  ;;  %v3867_v58 = vor.u32 %v4659_v51, %v3864_v52  ;;  %v3647_v1 = vor.u32 %v4608_v56, %v3646_v55  ;;  %v4581_v51 = vld [vmem:[%s5461_s22 + $0x44] sm:$0xf]  ;;  %v3552_v52 = vld [vmem:[%s5461_s22 + $0x58] sm:$0xf0] }
 0x147   : > { %v473_v19 = vmul.f32 %v462_v13, %v5504_v21  ;;  %v474_v20 = vmul.f32 %v462_v13, %v5508_v25  ;;  %v3694_v25 = vld [vmem:[%s5461_s22 + $0x160] sm:$0xf]  ;;  %v3839_v2 = vor.u32 %v4656_v60, %v3838_v59  ;;  %v3743_v56 = vor.u32 %v4632_v50, %v3742_v49  ;;  %v4681_v49 = vld [vmem:[%s5715_s11 + $0x54] sm:$0xf0] }
 0x148   : > { %v466_v14 = vmul.f32 0.5, %v465_v3  ;;  %v3695_v41 = vor.u32 %v4620_v32, %v3694_v25  ;;  %v3622_v3 = vld [vmem:[%s5461_s22 + $0xd0] sm:$0xf]  ;;  %v4641_v25 = vld [vmem:[%s5461_s22 + $0x224] sm:$0xf]  ;;  %v3555_v59 = vor.u32 %v4581_v51, %v3552_v52 }
 0x149   : > { %v479_v27 = vmul.f32 %v477_v17, %v473_v19  ;;  %v480_v7 = vmul.f32 %v478_v18, %v474_v20  ;;  %v4647_v19 = vld [vmem:[%s5461_s22 + $0x254] sm:$0xf]  ;;  %v3816_v20 = vld [vmem:[%s5461_s22 + $0x268] sm:$0xf0]  ;;  %v3792_v32 = vld [vmem:[%s5461_s22 + $0x238] sm:$0xf0] }
 0x14a   : > { %v467_v16 = vsub.f32 1.5, %v466_v14  ;;  %v3814_v14 = vld [vmem:[%s5461_s22 + $0x250] sm:$0xf] }
 0x14b   : > { %v485_v15 = vadd.f32 %v483_v23, %v479_v27  ;;  %v486_v12 = vadd.f32 %v484_v24, %v480_v7  ;;  %v3819_v7 = vor.u32 %v4647_v19, %v3816_v20 }
 0x14c   : > { %v468_v22 = vmul.f32 %v4948_v0, %v467_v16  ;;  %v4650_v16 = vld [vmem:[%s5461_s22 + $0x264] sm:$0xf0] }
 0x14e   : > { %v472_v26 = vsel %vm471_vm6, %v4948_v0, %v468_v22  ;;  %v3840_v0 = vld [vmem:[%s5461_s22 + $0x298] sm:$0xf0]  ;;  %v3623_v22 = vor.u32 %v4602_v6, %v3622_v3  ;;  %v3719_v6 = vor.u32 %v4626_v62, %v3718_v61  ;;  %v3945_v61 = vld [vmem:[%s5715_s11 + $0x30] sm:$0xf]  ;;  %v4677_v62 = vld [vmem:[%s5715_s11 + $0x34] sm:$0xf0] }
 0x14f   : > { %v475_v8 = vmul.f32 %v472_v26, %v5515_v29  ;;  %v476_v21 = vmul.f32 %v472_v26, %v5519_v31  ;;  %v4665_v29 = vld [vmem:[%s5461_s22 + $0x2e4] sm:$0xf]  ;;  %v3888_v31 = vld [vmem:[%s5461_s22 + $0x2f8] sm:$0xf0]  ;;  %v3843_v13 = vor.u32 %v4653_v63, %v3840_v0  ;;  %v4596_v26 = vld [vmem:[%s5461_s22 + $0xb4] sm:$0xf0] }
 0x150   : > { %v3891_v46 = vor.u32 %v4665_v29, %v3888_v31  ;;  %v4587_v29 = vld [vmem:[%s5461_s22 + $0x74] sm:$0xf]  ;;  %v3576_v31 = vld [vmem:[%s5461_s22 + $0x88] sm:$0xf0] }
 0x151   : > { %v481_v28 = vmul.f32 %v477_v17, %v475_v8  ;;  %v482_v30 = vmul.f32 %v478_v18, %v476_v21  ;;  %v4599_v17 = vld [vmem:[%s5461_s22 + $0xd4] sm:$0xf]  ;;  %v3624_v18 = vld [vmem:[%s5461_s22 + $0xe8] sm:$0xf0]  ;;  %v3790_v8 = vld [vmem:[%s5461_s22 + $0x220] sm:$0xf]  ;;  %v3579_v47 = vor.u32 %v4587_v29, %v3576_v31 }
 0x152   : > { %v3627_v27 = vor.u32 %v4599_v17, %v3624_v18  ;;  %v4644_v21 = vld [vmem:[%s5461_s22 + $0x234] sm:$0xf0]  ;;  %v4575_v63 = vld [vmem:[%s5461_s22 + $0x14] sm:$0xf]  ;;  %v3528_v0 = vld [vmem:[%s5461_s22 + $0x28] sm:$0xf0] }
 0x153   : > { %v487_v36 = vadd.f32 %v483_v23, %v481_v28  ;;  %v488_v37 = vadd.f32 %v484_v24, %v482_v30  ;;  %v3815_v23 = vor.u32 %v4650_v16, %v3814_v14  ;;  %v3598_v24 = vld [vmem:[%s5461_s22 + $0xa0] sm:$0xf]  ;;  %v4593_v28 = vld [vmem:[%s5461_s22 + $0xa4] sm:$0xf]  ;;  %v3600_v30 = vld [vmem:[%s5461_s22 + $0xb8] sm:$0xf0]  ;;  %v3791_v34 = vor.u32 %v4644_v21, %v3790_v8 }
 0x154   : > { %v3599_v33 = vor.u32 %v4596_v26, %v3598_v24 }
 0x155   : > { %v5630_v39 = vpack.c.bf16 %v487_v36, %v485_v15  ;;  %v5632_v40 = vpack.c.bf16 %v488_v37, %v486_v12  ;;  %v4590_v15 = vld [vmem:[%s5461_s22 + $0x84] sm:$0xf0]  ;;  %v3603_v12 = vor.u32 %v4593_v28, %v3600_v30  ;;  %v3795_v36 = vor.u32 %v4641_v25, %v3792_v32  ;;  %v3766_v37 = vld [vmem:[%s5461_s22 + $0x1f0] sm:$0xf] }
 0x156   : > { %v3575_v43 = vor.u32 %v4590_v15, %v3574_v35  ;;  %v3767_v44 = vor.u32 %v4638_v38, %v3766_v37 }
 0x157   : > { %1078 = vmatmul.bf16.vlgmr.msra.gmra.mxu0 %v5630_v39  ;;  %1092 = vmatmul.bf16.vlgmr.msra.gmra.mxu1 %v5632_v40 }
 0x158   : > { %1106 = vmatmul.bf16.vlgmr.msra.gmra.mxu2 %v5630_v39  ;;  %1120 = vmatmul.bf16.vlgmr.msra.gmra.mxu3 %v5632_v40 }
 0x159   : > { %1182 = vmatpush.bf16.msra.mxu0 %v3695_v41  ;;  %1196 = vmatpush.bf16.msra.mxu1 %v3887_v42  ;;  %v4635_v41 = vld [vmem:[%s5461_s22 + $0x1f4] sm:$0xf]  ;;  %v3768_v42 = vld [vmem:[%s5461_s22 + $0x208] sm:$0xf0] }
 0x15a   : > { %1210 = vmatpush.bf16.msra.mxu2 %v3699_v45  ;;  %1224 = vmatpush.bf16.msra.mxu3 %v3891_v46  ;;  %v3550_v45 = vld [vmem:[%s5461_s22 + $0x40] sm:$0xf]  ;;  %v4584_v46 = vld [vmem:[%s5461_s22 + $0x54] sm:$0xf0]  ;;  %v3771_v48 = vor.u32 %v4635_v41, %v3768_v42  ;;  %v4683_v42 = vld [vmem:[%s5715_s11 + $0x64] sm:$0xf0] }
 0x15b   : > { %v3551_v55 = vor.u32 %v4584_v46, %v3550_v45  ;;  %v3969_v41 = vld [vmem:[%s5715_s11 + $0x60] sm:$0xf] }
 0x15c   : > { %v3970_v45 = vor.u32 %v4683_v42, %v3969_v41  ;;  %v4678_v42 = vld [vmem:[%s5715_s11 + $0x44] sm:$0xf] }
 0x15d   : > { %1183 = vmatpush.bf16.msra.mxu0 %v3671_v53  ;;  %1197 = vmatpush.bf16.msra.mxu1 %v3863_v54  ;;  %v4629_v53 = vld [vmem:[%s5461_s22 + $0x1c4] sm:$0xf]  ;;  %v3744_v54 = vld [vmem:[%s5461_s22 + $0x1d8] sm:$0xf0] }
 0x15e   : > { %1211 = vmatpush.bf16.msra.mxu2 %v3675_v57  ;;  %1225 = vmatpush.bf16.msra.mxu3 %v3867_v58  ;;  %v3526_v57 = vld [vmem:[%s5461_s22 + $0x10] sm:$0xf]  ;;  %v4578_v58 = vld [vmem:[%s5461_s22 + $0x24] sm:$0xf0]  ;;  %v3747_v60 = vor.u32 %v4629_v53, %v3744_v54  ;;  %v3953_v53 = vld [vmem:[%s5715_s11 + $0x40] sm:$0xf] }
 0x15f   : > { %v3527_v3 = vor.u32 %v4578_v58, %v3526_v57  ;;  %v4679_v54 = vld [vmem:[%s5715_s11 + $0x44] sm:$0xf0] }
 0x160   : > { %v3954_v57 = vor.u32 %v4679_v54, %v3953_v53 }
 0x161   : > { %1184 = vmatpush.bf16.msra.mxu0 %v3647_v1  ;;  %1198 = vmatpush.bf16.msra.mxu1 %v3839_v2  ;;  %v4623_v1 = vld [vmem:[%s5461_s22 + $0x194] sm:$0xf]  ;;  %v3720_v2 = vld [vmem:[%s5461_s22 + $0x1a8] sm:$0xf0] }
 0x162   : > { %1212 = vmatpush.bf16.msra.mxu2 %v3651_v11  ;;  %1226 = vmatpush.bf16.msra.mxu3 %v3843_v13  ;;  %v3531_v11 = vor.u32 %v4575_v63, %v3528_v0  ;;  %v3723_v13 = vor.u32 %v4623_v1, %v3720_v2  ;;  %v3946_v0 = vor.u32 %v4677_v62, %v3945_v61  ;;  %v3937_v1 = vld [vmem:[%s5715_s11 + $0x20] sm:$0xf]  ;;  %v4675_v2 = vld [vmem:[%s5715_s11 + $0x24] sm:$0xf0]  ;;  %v4701_v61 = vld [vmem:[%s5715_s11 + $0xf4] sm:$0xf0] }
 0x163   : > { %v4672_v62 = vld [vmem:[%s5715_s11 + $0x14] sm:$0xf] }
 0x165   : > { %1185 = vmatpush.bf16.msra.mxu0 %v3623_v22  ;;  %1199 = vmatpush.bf16.msra.mxu1 %v3815_v23 }
 0x166   : > { %1213 = vmatpush.bf16.msra.mxu2 %v3627_v27  ;;  %1227 = vmatpush.bf16.msra.mxu3 %v3819_v7 }
 0x167   : > { %1134 = vmatmul.bf16.vlgmr.msrb.gmra.mxu0 %v5630_v39  ;;  %1148 = vmatmul.bf16.vlgmr.msrb.gmra.mxu1 %v5632_v40 }
 0x168   : > { %1162 = vmatmul.bf16.vlgmr.msrb.gmra.mxu2 %v5630_v39  ;;  %1176 = vmatmul.bf16.vlgmr.msrb.gmra.mxu3 %v5632_v40 }
 0x169   : > { %1186 = vmatpush.bf16.msra.mxu0 %v3599_v33  ;;  %1200 = vmatpush.bf16.msra.mxu1 %v3791_v34 }
 0x16a   : > { %1214 = vmatpush.bf16.msra.mxu2 %v3603_v12  ;;  %1228 = vmatpush.bf16.msra.mxu3 %v3795_v36  ;;  %v3977_v12 = vld [vmem:[%s5715_s11 + $0x70] sm:$0xf]  ;;  %v4685_v36 = vld [vmem:[%s5715_s11 + $0x74] sm:$0xf0] }
 0x16b   : > { %v3978_v31 = vor.u32 %v4685_v36, %v3977_v12  ;;  %v4680_v12 = vld [vmem:[%s5715_s11 + $0x54] sm:$0xf]  ;;  %v3963_v36 = vld [vmem:[%s5715_s11 + $0x58] sm:$0xf0] }
 0x16c   : > { %v3966_v41 = vor.u32 %v4680_v12, %v3963_v36  ;;  %v4009_v36 = vld [vmem:[%s5715_s11 + $0xb0] sm:$0xf] }
 0x16d   : > { %1187 = vmatpush.bf16.msra.mxu0 %v3575_v43  ;;  %1201 = vmatpush.bf16.msra.mxu1 %v3767_v44 }
 0x16e   : > { %1215 = vmatpush.bf16.msra.mxu2 %v3579_v47  ;;  %1229 = vmatpush.bf16.msra.mxu3 %v3771_v48  ;;  %v3961_v48 = vld [vmem:[%s5715_s11 + $0x50] sm:$0xf] }
 0x16f   : > { %v3962_v52 = vor.u32 %v4681_v49, %v3961_v48  ;;  %v3947_v48 = vld [vmem:[%s5715_s11 + $0x38] sm:$0xf0] }
 0x171   : > { %1188 = vmatpush.bf16.msra.mxu0 %v3551_v55  ;;  %1202 = vmatpush.bf16.msra.mxu1 %v3743_v56 }
 0x172   : > { %1216 = vmatpush.bf16.msra.mxu2 %v3555_v59  ;;  %1230 = vmatpush.bf16.msra.mxu3 %v3747_v60 }
 0x175   : > { %1189 = vmatpush.bf16.msra.mxu0 %v3527_v3  ;;  %1203 = vmatpush.bf16.msra.mxu1 %v3719_v6  ;;  %v3938_v3 = vor.u32 %v4675_v2, %v3937_v1  ;;  %v3929_v6 = vld [vmem:[%s5715_s11 + $0x10] sm:$0xf] }
 0x176   : > { %1217 = vmatpush.bf16.msra.mxu2 %v3531_v11  ;;  %1231 = vmatpush.bf16.msra.mxu3 %v3723_v13  ;;  %v4673_v11 = vld [vmem:[%s5715_s11 + $0x14] sm:$0xf0] }
 0x178   : > { %1190 = vmatmul.bf16.vlgmr.msra.gmra.mxu0 %v5630_v39  ;;  %1204 = vmatmul.bf16.vlgmr.msra.gmra.mxu1 %v5632_v40 }
 0x179   : > { %1218 = vmatmul.bf16.vlgmr.msra.gmra.mxu2 %v5630_v39  ;;  %1232 = vmatmul.bf16.vlgmr.msra.gmra.mxu3 %v5632_v40 }
 0x1d4   : > { %v1079_v14 = vpop.f32.mrf.mxu0  ;;  %v1093_v16 = vpop.f32.mrf.mxu1 }
 0x1d5   : > { %v1094_v17 = vadd.f32 %v1093_v16, %v1079_v14  ;;  %v3930_v14 = vor.u32 %v4673_v11, %v3929_v6  ;;  %v3921_v16 = vld [vmem:[%s5715_s11] sm:$0xf] }
 0x1d6   : > { %v4033_v11 = vld [vmem:[%s5715_s11 + $0xe0] sm:$0xf] }
 0x1d7   : > { %1408 = vrot.lane.b32.xlu0 %v1094_v17, %s5286_s10 }
 0x1db   : > { %v1107_v18 = vpop.f32.mrf.mxu2  ;;  %v1121_v19 = vpop.f32.mrf.mxu3 }
 0x1dc   : > { %v1081_v20 = vpop.f32.mrf.mxu0  ;;  %v1095_v22 = vpop.f32.mrf.mxu1  ;;  %v1122_v58 = vadd.f32 %v1121_v19, %v1107_v18 }
 0x1dd   : > { %v1096_v23 = vadd.f32 %v1095_v22, %v1081_v20 }
 0x1df   : > { %1410 = vrot.lane.b32.xlu1 %v1096_v23, %s5286_s10 }
 0x1e3   : > { %v1109_v24 = vpop.f32.mrf.mxu2  ;;  %v1123_v26 = vpop.f32.mrf.mxu3 }
 0x1e4   : > { %v5704_v27 = vadd.f32 %v1123_v26, %v1109_v24  ;;  %v1135_v7 = vpop.f32.mrf.mxu0  ;;  %v1149_v8 = vpop.f32.mrf.mxu1  ;;  %v1239_v24 = vshrl.u32 %v410_v4, 7 }
 0x1e5   : > { %v1150_v21 = vadd.f32 %v1149_v8, %v1135_v7  ;;  %v4684_v7 = vld [vmem:[%s5715_s11 + $0x74] sm:$0xf]  ;;  %v3979_v8 = vld [vmem:[%s5715_s11 + $0x78] sm:$0xf0] }
 0x1e6   : > { %1666 = vrot.lane.b32.xlu0 %v5704_v27, %s5286_s10  ;;  %v1275_v26 = vsub.s32 %v1239_v24, %v5440_v5  ;;  %vm1271_vm9 = vcmp.ge.s32.totalorder %v1239_v24, %v5440_v5 }
 0x1e7   : > { %1412 = vrot.lane.b32.xlu2 %v1150_v21, %s5286_s10  ;;  %vm5757_vm10 = vmand %vm1252_vm8, %vm1271_vm9 }
 0x1eb   : > { %v1163_v28 = vpop.f32.mrf.mxu2  ;;  %v1177_v30 = vpop.f32.mrf.mxu3 }
 0x1ec   : > { %v1137_v25 = vpop.f32.mrf.mxu0  ;;  %v1151_v32 = vpop.f32.mrf.mxu1  ;;  %v1178_v37 = vadd.f32 %v1177_v30, %v1163_v28  ;;  %v1277_v28 = vcvt.s32.f32 %v1275_v26  ;;  %v1240_v30 = vadd.s32 8, %v1239_v24  ;;  %v4697_v24 = vld [vmem:[%s5715_s11 + $0xd4] sm:$0xf0] }
 0x1ed   : > { %v1152_v33 = vadd.f32 %v1151_v32, %v1137_v25  ;;  %v3982_v25 = vor.u32 %v4684_v7, %v3979_v8  ;;  %v4682_v32 = vld [vmem:[%s5715_s11 + $0x64] sm:$0xf] }
 0x1ee   : > { %vm1272_vm14 = vcmp.ge.s32.totalorder %v1240_v30, %v5440_v5 }
 0x1ef   : > { %1414 = vrot.lane.b32.xlu2 %v1152_v33, %s5286_s10  ;;  %3893 = vmatpush.xpose.msk.msrb.mxu0 %vm1284_vm7, %v1152_v33  ;;  %v3971_v33 = vld [vmem:[%s5715_s11 + $0x68] sm:$0xf0]  ;;  %vm5776_vm15 = vmand %vm1268_vm13, %vm1272_vm14 }
 0x1f3   : > { %v1165_v34 = vpop.f32.mrf.mxu2  ;;  %v1179_v35 = vpop.f32.mrf.mxu3  ;;  %3894 = vmatpush.xpose.msk.msrb.mxu0 %vm1284_vm7, %v1150_v21 }
 0x1f4   : > { %v1180_v15 = vadd.f32 %v1179_v35, %v1165_v34  ;;  %v5768_v34 = vsel %vm5757_vm10, %v1277_v28, 0.0  ;;  %v1276_v35 = vsub.s32 %v1240_v30, %v5440_v5 }
 0x1f5   : > { %v1191_v38 = vpop.f32.mrf.mxu0  ;;  %v1205_v29 = vpop.f32.mrf.mxu1 }
 0x1f6   : > { %3895 = vmatmul.msk.f32.vlgmr.msrb.gmra.mxu0 %vm1284_vm7, %v1094_v17  ;;  %v1206_v51 = vadd.f32 %v1205_v29, %v1191_v38  ;;  %v4671_v17 = vld [vmem:[%s5715_s11 + $0x4] sm:$0xf0]  ;;  %v1278_v29 = vcvt.s32.f32 %v1276_v35 }
 0x1f7   : > { %3905 = vmatpush.xpose.msk.msra.mxu0 %vm1284_vm7, %v1180_v15  ;;  %1668 = vrot.lane.b32.xlu2 %v1178_v37, %s5286_s10  ;;  %v3922_v18 = vor.u32 %v4671_v17, %v3921_v16  ;;  %v4670_v16 = vld [vmem:[%s5715_s11 + $0x4] sm:$0xf]  ;;  %v3923_v17 = vld [vmem:[%s5715_s11 + $0x8] sm:$0xf0] }
 0x1fb   : > { %3906 = vmatpush.xpose.msk.msra.mxu0 %vm1284_vm7, %v1178_v37  ;;  %v1320_v37 = vmul.f32 -0.031748697, %v5768_v34 }
 0x1fc   : > { %v1219_v43 = vpop.f32.mrf.mxu2  ;;  %v1233_v44 = vpop.f32.mrf.mxu3 }
 0x1fd   : > { %v1193_v46 = vpop.f32.mrf.mxu0  ;;  %v1207_v47 = vpop.f32.mrf.mxu1  ;;  %v1234_v59 = vadd.f32 %v1233_v44, %v1219_v43  ;;  %v3955_v43 = vld [vmem:[%s5715_s11 + $0x48] sm:$0xf0]  ;;  %v1322_v44 = vmul.f32 1.442695, %v1320_v37  ;;  %v4693_v37 = vld [vmem:[%s5715_s11 + $0xb4] sm:$0xf0] }
 0x1fe   : > { %v1208_v50 = vadd.f32 %v1207_v47, %v1193_v46  ;;  %3896 = vmatmul.msk.f32.gmra.mxu0 %vm1284_vm7, %v1096_v23  ;;  %v3958_v46 = vor.u32 %v4678_v42, %v3955_v43  ;;  %v4676_v47 = vld [vmem:[%s5715_s11 + $0x34] sm:$0xf]  ;;  %v4001_v43 = vld [vmem:[%s5715_s11 + $0xa0] sm:$0xf] }
 0x1ff   : > { %2025 = vmatpush.bf16.msrb.mxu0 %v3978_v31  ;;  %1670 = vrot.lane.b32.xlu2 %v1180_v15, %s5286_s10  ;;  %v3974_v15 = vor.u32 %v4682_v32, %v3971_v33  ;;  %4949 = vpow2.f32 %v1322_v44  ;;  %v3950_v53 = vor.u32 %v4676_v47, %v3947_v48  ;;  %v4695_v32 = vld [vmem:[%s5715_s11 + $0xc4] sm:$0xf0]  ;;  %v3993_v47 = vld [vmem:[%s5715_s11 + $0x90] sm:$0xf]  ;;  %v4689_v48 = vld [vmem:[%s5715_s11 + $0x94] sm:$0xf0] }
 0x200   : > { %1351 = vmatpush.msrb.mxu1 %v1208_v50  ;;  %v4935_v13 = vpack.i.bf16 %v1206_v51, %v1208_v50  ;;  %v4691_v44 = vld [vmem:[%s5715_s11 + $0xa4] sm:$0xf0] }
 0x202   : > { %1352 = vmatpush.msrb.mxu1 %v1206_v51 }
 0x203   : > { %2026 = vmatpush.bf16.msrb.mxu0 %v3970_v45  ;;  %v5784_v45 = vsel %vm5776_vm15, %v1278_v29, 0.0 }
 0x204   : > { %v1221_v55 = vpop.f32.mrf.mxu2  ;;  %v1235_v56 = vpop.f32.mrf.mxu3  ;;  %v1321_v49 = vmul.f32 -0.031748697, %v5784_v45  ;;  %v1578_v26 = vmul.f32 -0.004933717, %v5784_v45 }
 0x205   : > { %v1236_v60 = vadd.f32 %v1235_v56, %v1221_v55  ;;  %v4674_v55 = vld [vmem:[%s5715_s11 + $0x24] sm:$0xf]  ;;  %v3939_v56 = vld [vmem:[%s5715_s11 + $0x28] sm:$0xf0] }
 0x206   : > { %3907 = vmatmul.msk.f32.vlgmr.msra.gmra.mxu0 %vm1284_vm7, %v1122_v58  ;;  %v1581_v33 = vmul.f32 1.442695, %v1578_v26  ;;  %v4019_v26 = vld [vmem:[%s5715_s11 + $0xc8] sm:$0xf0] }
 0x207   : > { %2027 = vmatpush.bf16.msrb.mxu0 %v3962_v52  ;;  %v4940_v63 = vpack.i.bf16 %v1234_v59, %v1236_v60  ;;  %1607 = vmatpush.msra.mxu1 %v1236_v60  ;;  %v4041_v60 = vld [vmem:[%s5715_s11 + $0xf0] sm:$0xf] }
 0x208   : > { %1664 = vrot.lane.b32.xlu2 %v1122_v58, %s5286_s10  ;;  %v4950_v58 = vpop.eup %4949 }
 0x209   : > { %1608 = vmatpush.msra.mxu1 %v1234_v59  ;;  %4941 = vrot.lane.b32.xlu1 %v4940_v63, %s5286_s10  ;;  %v3942_v59 = vor.u32 %v4674_v55, %v3939_v56  ;;  %v3931_v63 = vld [vmem:[%s5715_s11 + $0x18] sm:$0xf0]  ;;  %v1326_v1 = vsel %vm5757_vm10, %v4950_v58, 0.0  ;;  %v1447_v56 = vmul.f32 -0.012479112, %v5768_v34 }
 0x20a   : > { %v3934_v6 = vor.u32 %v4672_v62, %v3931_v63  ;;  %v1448_v58 = vmul.f32 -0.012479112, %v5784_v45  ;;  %v4043_v62 = vld [vmem:[%s5715_s11 + $0xf8] sm:$0xf0] }
 0x20b   : > { %2028 = vmatpush.bf16.msrb.mxu0 %v3954_v57  ;;  %v1324_v57 = vmul.f32 1.442695, %v1321_v49 }
 0x20d   : > { %4951 = vpow2.f32 %v1324_v57  ;;  %v1449_v57 = vmul.f32 1.442695, %v1447_v56 }
 0x20e   : > { %3908 = vmatmul.msk.f32.gmra.mxu0 %vm1284_vm7, %v5704_v27 }
 0x20f   : > { %2029 = vmatpush.bf16.msrb.mxu0 %v3946_v0  ;;  %v1577_v0 = vmul.f32 -0.004933717, %v5768_v34 }
 0x210   : > { %4936 = vrot.lane.b32.xlu2 %v4935_v13, %s5286_s10  ;;  %v4699_v13 = vld [vmem:[%s5715_s11 + $0xe4] sm:$0xf0] }
 0x213   : > { %2030 = vmatpush.bf16.msrb.mxu0 %v3938_v3  ;;  %v4042_v3 = vor.u32 %v4701_v61, %v4041_v60  ;;  %v4700_v61 = vld [vmem:[%s5715_s11 + $0xf4] sm:$0xf] }
 0x217   : > { %2031 = vmatpush.bf16.msrb.mxu0 %v3930_v14 }
 0x21b   : > { %2032 = vmatpush.bf16.msrb.mxu0 %v3922_v18  ;;  %v1579_v18 = vmul.f32 1.442695, %v1577_v0  ;;  %v1703_v0 = vmul.f32 -0.001955035, %v5768_v34 }
 0x21d   : > { %4953 = vpow2.f32 %v1579_v18  ;;  %v4027_v18 = vld [vmem:[%s5715_s11 + $0xd8] sm:$0xf0] }
 0x21e   : > { %2033 = vmatmul.bf16.vlgmr.msrb.gmra.mxu0 %v5630_v39  ;;  %4955 = vpow2.f32 %v1581_v33 }
 0x21f   : > { %4957 = vpow2.f32 %v1449_v57 }
 0x241   : > { %v1413_v19 = vpop.permute.xlu2 %1412 }
 0x249   : > { %v1415_v20 = vpop.permute.xlu2 %1414  ;;  %v1409_v22 = vpop.permute.xlu0 %1408 }
 0x24a   : > { %3899 = vmatpush.xpose.msk.msrb.mxu2 %vm1284_vm7, %v1415_v20  ;;  %v4034_v20 = vor.u32 %v4699_v13, %v4033_v11  ;;  %v4035_v11 = vld [vmem:[%s5715_s11 + $0xe8] sm:$0xf0] }
 0x24e   : > { %3900 = vmatpush.xpose.msk.msrb.mxu2 %vm1284_vm7, %v1413_v19  ;;  %v4952_v19 = vpop.eup %4951 }
 0x251   : > { %3901 = vmatmul.msk.f32.vlgmr.msrb.gmra.mxu2 %vm1284_vm7, %v1409_v22  ;;  %v1669_v23 = vpop.permute.xlu2 %1668  ;;  %v1411_v27 = vpop.permute.xlu1 %1410  ;;  %v3926_v22 = vor.u32 %v4670_v16, %v3923_v17  ;;  %v4696_v17 = vld [vmem:[%s5715_s11 + $0xd4] sm:$0xf] }
 0x258   : > { %v1667_v50 = vpop.permute.xlu0 %1666 }
 0x259   : > { %v1671_v21 = vpop.permute.xlu2 %1670  ;;  %3902 = vmatmul.msk.f32.gmra.mxu2 %vm1284_vm7, %v1411_v27  ;;  %v1327_v27 = vsel %vm5776_vm15, %v4952_v19, 0.0  ;;  %v1704_v19 = vmul.f32 -0.001955035, %v5784_v45 }
 0x25a   : > { %3911 = vmatpush.xpose.msk.msra.mxu2 %vm1284_vm7, %v1671_v21 }
 0x25e   : > { %3912 = vmatpush.xpose.msk.msra.mxu2 %vm1284_vm7, %v1669_v23  ;;  %v4025_v23 = vld [vmem:[%s5715_s11 + $0xd0] sm:$0xf] }
 0x25f   : > { %v4026_v28 = vor.u32 %v4697_v24, %v4025_v23  ;;  %v4694_v24 = vld [vmem:[%s5715_s11 + $0xc4] sm:$0xf] }
 0x262   : > { %2053 = vmatpush.bf16.msrb.mxu2 %v3982_v25  ;;  %v1665_v38 = vpop.permute.xlu2 %1664  ;;  %v4017_v25 = vld [vmem:[%s5715_s11 + $0xc0] sm:$0xf] }
 0x263   : > { %3913 = vmatmul.msk.f32.vlgmr.msra.gmra.mxu2 %vm1284_vm7, %v1665_v38  ;;  %v4018_v12 = vor.u32 %v4695_v32, %v4017_v25  ;;  %v4690_v25 = vld [vmem:[%s5715_s11 + $0xa4] sm:$0xf]  ;;  %v4003_v32 = vld [vmem:[%s5715_s11 + $0xa8] sm:$0xf0] }
 0x266   : > { %2054 = vmatpush.bf16.msrb.mxu2 %v3974_v15  ;;  %v4954_v15 = vpop.eup %4953 }
 0x267   : > { %v1583_v38 = vsel %vm5757_vm10, %v4954_v15, 0.0  ;;  %v4006_v15 = vor.u32 %v4690_v25, %v4003_v32 }
 0x26a   : > { %2055 = vmatpush.bf16.msrb.mxu2 %v3966_v41  ;;  %v4937_v51 = vpop.permute.xlu2 %4936  ;;  %v4010_v41 = vor.u32 %v4693_v37, %v4009_v36  ;;  %v4688_v36 = vld [vmem:[%s5715_s11 + $0x94] sm:$0xf]  ;;  %v3995_v37 = vld [vmem:[%s5715_s11 + $0x98] sm:$0xf0] }
 0x26b   : > { %v4938_v52 = vunpack.i.l.bf16 %v4937_v51  ;;  %3914 = vmatmul.msk.f32.gmra.mxu2 %vm1284_vm7, %v1667_v50  ;;  %v4939_v54 = vunpack.i.h.bf16 %v4937_v51  ;;  %v3994_v51 = vor.u32 %v4689_v48, %v3993_v47  ;;  %v3998_v4 = vor.u32 %v4688_v36, %v3995_v37 }
 0x26d   : > { %1485 = vmatpush.msrb.mxu3 %v4938_v52 }
 0x26e   : > { %2056 = vmatpush.bf16.msrb.mxu2 %v3958_v46  ;;  %v4002_v46 = vor.u32 %v4691_v44, %v4001_v43 }
 0x26f   : > { %1486 = vmatpush.msrb.mxu3 %v4939_v54  ;;  %v4687_v54 = vld [vmem:[%s5715_s11 + $0x84] sm:$0xf0] }
 0x272   : > { %2057 = vmatpush.bf16.msrb.mxu2 %v3950_v53  ;;  %v3985_v53 = vld [vmem:[%s5715_s11 + $0x80] sm:$0xf] }
 0x273   : > { %v1314_v2 = vpop.f32.mrf.mxu0  ;;  %v3986_v55 = vor.u32 %v4687_v54, %v3985_v53 }
 0x274   : > { %v1328_v14 = vmul.f32 %v1326_v1, %v1314_v2  ;;  %v4046_v2 = vor.u32 %v4700_v61, %v4043_v62 }
 0x276   : > { %2058 = vmatpush.bf16.msrb.mxu2 %v3942_v59  ;;  %3897 = vmatmul.msk.f32.vlgmr.msrb.gmra.mxu1 %vm1330_vm0, %v1328_v14  ;;  %v1451_v59 = vmul.f32 1.442695, %v1448_v58  ;;  %v1705_v14 = vmul.f32 1.442695, %v1703_v0 }
 0x277   : > { %2039 = vmatpush.bf16.msrb.mxu1 %v4042_v3 }
 0x278   : > { %4959 = vpow2.f32 %v1451_v59 }
 0x279   : > { %4961 = vpow2.f32 %v1705_v14 }
 0x27a   : > { %2059 = vmatpush.bf16.msrb.mxu2 %v3934_v6  ;;  %v4698_v6 = vld [vmem:[%s5715_s11 + $0xe4] sm:$0xf] }
 0x27b   : > { %v4942_v7 = vpop.permute.xlu1 %4941  ;;  %v1317_v21 = vpop.f32.mrf.mxu0  ;;  %2040 = vmatpush.bf16.msrb.mxu1 %v4034_v20  ;;  %v4038_v16 = vor.u32 %v4698_v6, %v4035_v11 }
 0x27c   : > { %v4943_v8 = vunpack.i.l.bf16 %v4942_v7  ;;  %v1329_v30 = vmul.f32 %v1327_v27, %v1317_v21  ;;  %v4944_v35 = vunpack.i.h.bf16 %v4942_v7  ;;  %v1707_v27 = vmul.f32 1.442695, %v1704_v19  ;;  %v4692_v21 = vld [vmem:[%s5715_s11 + $0xb4] sm:$0xf] }
 0x27d   : > { %v4022_v7 = vor.u32 %v4694_v24, %v4019_v26 }
 0x27e   : > { %2060 = vmatpush.bf16.msrb.mxu2 %v3926_v22  ;;  %1741 = vmatpush.msra.mxu3 %v4943_v8  ;;  %v4030_v22 = vor.u32 %v4696_v17, %v4027_v18  ;;  %4963 = vpow2.f32 %v1707_v27 }
 0x27f   : > { %3898 = vmatmul.msk.f32.gmra.mxu1 %vm1330_vm0, %v1329_v30 }
 0x280   : > { %1742 = vmatpush.msra.mxu3 %v4944_v35  ;;  %2041 = vmatpush.bf16.msrb.mxu1 %v4026_v28  ;;  %v4011_v28 = vld [vmem:[%s5715_s11 + $0xb8] sm:$0xf0] }
 0x281   : > { %2061 = vmatmul.bf16.vlgmr.msrb.gmra.mxu2 %v5630_v39  ;;  %v4956_v39 = vpop.eup %4955  ;;  %v4014_v30 = vor.u32 %v4692_v21, %v4011_v28 }
 0x282   : > { %v1584_v49 = vsel %vm5776_vm15, %v4956_v39, 0.0  ;;  %v4958_v60 = vpop.eup %4957 }
 0x283   : > { %v1571_v29 = vpop.f32.mrf.mxu0  ;;  %v1453_v63 = vsel %vm5757_vm10, %v4958_v60, 0.0  ;;  %v4960_v13 = vpop.eup %4959 }
 0x284   : > { %2042 = vmatpush.bf16.msrb.mxu1 %v4018_v12  ;;  %v1585_v42 = vmul.f32 %v1583_v38, %v1571_v29  ;;  %v1454_v34 = vsel %vm5776_vm15, %v4960_v13, 0.0  ;;  %v4962_v8 = vpop.eup %4961  ;;  %v4686_v29 = vld [vmem:[%s5715_s11 + $0x84] sm:$0xf] }
 0x285   : > { %v1709_v45 = vsel %vm5757_vm10, %v4962_v8, 0.0  ;;  %v4964_v12 = vpop.eup %4963 }
 0x286   : > { %v1710_v38 = vsel %vm5776_vm15, %v4964_v12, 0.0 }
 0x287   : > { %3909 = vmatmul.msk.f32.vlgmr.msra.gmra.mxu1 %vm1330_vm0, %v1585_v42 }
 0x288   : > { %2043 = vmatpush.bf16.msrb.mxu1 %v4010_v41  ;;  %v3987_v41 = vld [vmem:[%s5715_s11 + $0x88] sm:$0xf0] }
 0x289   : > { %v3990_v44 = vor.u32 %v4686_v29, %v3987_v41 }
 0x28b   : > { %v1574_v50 = vpop.f32.mrf.mxu0 }
 0x28c   : > { %2044 = vmatpush.bf16.msrb.mxu1 %v4002_v46  ;;  %v1586_v52 = vmul.f32 %v1584_v49, %v1574_v50  ;;  %v5863_v46 = vsel %vm1281_vm1, 1.0, %v5285_v9 }
 0x28f   : > { %3910 = vmatmul.msk.f32.gmra.mxu1 %vm1330_vm0, %v1586_v52 }
 0x290   : > { %2045 = vmatpush.bf16.msrb.mxu1 %v3994_v51 }
 0x294   : > { %2046 = vmatpush.bf16.msrb.mxu1 %v3986_v55 }
 0x297   : > { %2047 = vmatmul.bf16.vlgmr.msrb.gmra.mxu1 %v5632_v40 }
 0x2d4   : > { %v1441_v1 = vpop.f32.mrf.mxu2 }
 0x2d5   : > { %v1455_v3 = vmul.f32 %v1453_v63, %v1441_v1 }
 0x2d7   : > { %3903 = vmatmul.msk.f32.vlgmr.msrb.gmra.mxu3 %vm1330_vm0, %v1455_v3 }
 0x2d8   : > { %2067 = vmatpush.bf16.msrb.mxu3 %v4046_v2 }
 0x2dc   : > { %v1444_v20 = vpop.f32.mrf.mxu2  ;;  %2068 = vmatpush.bf16.msrb.mxu3 %v4038_v16 }
 0x2dd   : > { %v1456_v23 = vmul.f32 %v1454_v34, %v1444_v20 }
 0x2df   : > { %3904 = vmatmul.msk.f32.gmra.mxu3 %vm1330_vm0, %v1456_v23 }
 0x2e0   : > { %2069 = vmatpush.bf16.msrb.mxu3 %v4030_v22 }
 0x2e4   : > { %2070 = vmatpush.bf16.msrb.mxu3 %v4022_v7 }
 0x2e6   : > { %v1697_v33 = vpop.f32.mrf.mxu2 }
 0x2e7   : > { %v1711_v35 = vmul.f32 %v1709_v45, %v1697_v33 }
 0x2e8   : > { %2071 = vmatpush.bf16.msrb.mxu3 %v4014_v30 }
 0x2e9   : > { %3915 = vmatmul.msk.f32.vlgmr.msra.gmra.mxu3 %vm1330_vm0, %v1711_v35 }
 0x2ec   : > { %2072 = vmatpush.bf16.msrb.mxu3 %v4006_v15 }
 0x2ee   : > { %v1700_v42 = vpop.f32.mrf.mxu2 }
 0x2ef   : > { %v1712_v43 = vmul.f32 %v1710_v38, %v1700_v42 }
 0x2f0   : > { %2073 = vmatpush.bf16.msrb.mxu3 %v3998_v4 }
 0x2f1   : > { %3916 = vmatmul.msk.f32.gmra.mxu3 %vm1330_vm0, %v1712_v43 }
 0x2f3   : > { %v1354_v39 = vpop.f32.mrf.mxu1 }
 0x2f4   : > { %2074 = vmatpush.bf16.msrb.mxu3 %v3990_v44  ;;  %v1360_v5 = vmul.f32 %v5863_v46, %v1354_v39 }
 0x2f6   : > { %v1362_v54 = vsel %vm1284_vm7, %v1360_v5, 0.0 }
 0x2f9   : > { %2075 = vmatmul.bf16.vlgmr.msrb.gmra.mxu3 %v5632_v40 }
 0x2fc   : > { %v5865_v31 = vpop.f32.mrf.mxu1 }
 0x2fd   : > { %v1361_v58 = vmul.f32 %v5863_v46, %v5865_v31 }
 0x2ff   : > { %v1365_v63 = vsel %vm1284_vm7, %v1361_v58, 0.0 }
 0x304   : > { %v5870_v52 = vpop.f32.mrf.mxu1 }
 0x305   : > { %v1616_v0 = vmul.f32 %v5863_v46, %v5870_v52 }
 0x307   : > { %v1618_v1 = vsel %vm1284_vm7, %v1616_v0, 0.0 }
 0x30c   : > { %v1613_v55 = vpop.f32.mrf.mxu1 }
 0x30d   : > { %v1617_v57 = vmul.f32 %v5863_v46, %v1613_v55 }
 0x30f   : > { %v1621_v61 = vsel %vm1284_vm7, %v1617_v57, 0.0 }
 0x35a   : > { %v1488_v47 = vpop.f32.mrf.mxu3 }
 0x35b   : > { %v1494_v48 = vmul.f32 %v5863_v46, %v1488_v47 }
 0x35d   : > { %v1496_v49 = vsel %vm1284_vm7, %v1494_v48, 0.0 }
 0x35e   : > { %1497 = vadd.xlane.f32.xlu0 %v1496_v49 }
 0x362   : > { %v1491_v50 = vpop.f32.mrf.mxu3 }
 0x363   : > { %v1495_v51 = vmul.f32 %v5863_v46, %v1491_v50 }
 0x365   : > { %v1499_v40 = vsel %vm1284_vm7, %v1495_v51, 0.0 }
 0x366   : > { %1500 = vadd.xlane.f32.xlu2 %v1499_v40 }
 0x36c   : > { %v1744_v9 = vpop.f32.mrf.mxu3 }
 0x36d   : > { %v1750_v53 = vmul.f32 %v5863_v46, %v1744_v9 }
 0x36e   : > { %1363 = vadd.xlane.f32.xlu2 %v1362_v54 }
 0x36f   : > { %v1752_v56 = vsel %vm1284_vm7, %v1750_v53, 0.0 }
 0x370   : > { %1753 = vadd.xlane.f32.xlu1 %v1752_v56 }
 0x374   : > { %v1747_v59 = vpop.f32.mrf.mxu3 }
 0x375   : > { %v1751_v60 = vmul.f32 %v5863_v46, %v1747_v59 }
 0x376   : > { %1622 = vadd.xlane.f32.xlu2 %v1621_v61 }
 0x377   : > { %v1755_v62 = vsel %vm1284_vm7, %v1751_v60, 0.0 }
 0x378   : > { %1756 = vadd.xlane.f32.xlu0 %v1755_v62  ;;  %1366 = vadd.xlane.f32.xlu1 %v1365_v63 }
 0x380   : > { %1619 = vadd.xlane.f32.xlu0 %v1618_v1 }
 0x3d1   : > { %v1498_v2 = vpop.xlane.xlu0 %1497 }
 0x3d2   : > { %v1502_v3 = vmul.f32 0.022222223, %v1498_v2 }
 0x3d4   : > { %v1504_v6 = vsub.f32 %v1488_v47, %v1502_v3 }
 0x3d6   : > { %v5888_v11 = vmul.f32 %v5863_v46, %v1504_v6 }
 0x3d8   : > { %v1508_v13 = vmul.f32 %v5888_v11, %v5888_v11 }
 0x3d9   : > { %v1501_v14 = vpop.xlane.xlu2 %1500 }
 0x3da   : > { %v1503_v16 = vmul.f32 0.022222223, %v1501_v14  ;;  %v1510_v17 = vsel %vm1284_vm7, %v1508_v13, 0.0 }
 0x3db   : > { %1511 = vadd.xlane.f32.xlu1 %v1510_v17 }
 0x3dc   : > { %v1505_v18 = vsub.f32 %v1491_v50, %v1503_v16 }
 0x3de   : > { %v5894_v34 = vmul.f32 %v5863_v46, %v1505_v18 }
 0x3e0   : > { %v1509_v19 = vmul.f32 %v5894_v34, %v5894_v34 }
 0x3e1   : > { %v1364_v20 = vpop.xlane.xlu2 %1363 }
 0x3e2   : > { %v1368_v22 = vmul.f32 0.022222223, %v1364_v20  ;;  %v1513_v23 = vsel %vm1284_vm7, %v1509_v19, 0.0 }
 0x3e3   : > { %v1754_v24 = vpop.xlane.xlu1 %1753  ;;  %1514 = vadd.xlane.f32.xlu0 %v1513_v23 }
 0x3e4   : > { %v1370_v26 = vsub.f32 %v1354_v39, %v1368_v22  ;;  %v1758_v27 = vmul.f32 0.022222223, %v1754_v24 }
 0x3e6   : > { %v1760_v7 = vsub.f32 %v1744_v9, %v1758_v27  ;;  %v5900_v8 = vmul.f32 %v5863_v46, %v1370_v26 }
 0x3e8   : > { %v1374_v21 = vmul.f32 %v5900_v8, %v5900_v8  ;;  %v5905_v28 = vmul.f32 %v5863_v46, %v1760_v7 }
 0x3e9   : > { %v1623_v45 = vpop.xlane.xlu2 %1622 }
 0x3ea   : > { %v1625_v30 = vmul.f32 0.022222223, %v1623_v45  ;;  %v1376_v25 = vsel %vm1284_vm7, %v1374_v21, 0.0  ;;  %v1764_v32 = vmul.f32 %v5905_v28, %v5905_v28 }
 0x3eb   : > { %v1757_v33 = vpop.xlane.xlu0 %1756  ;;  %v1367_v35 = vpop.xlane.xlu1 %1366  ;;  %1377 = vadd.xlane.f32.xlu0 %v1376_v25 }
 0x3ec   : > { %v1627_v15 = vsub.f32 %v1613_v55, %v1625_v30  ;;  %v1759_v12 = vmul.f32 0.022222223, %v1757_v33  ;;  %v1369_v36 = vmul.f32 0.022222223, %v1367_v35  ;;  %v1766_v37 = vsel %vm1284_vm7, %v1764_v32, 0.0 }
 0x3ed   : > { %1767 = vadd.xlane.f32.xlu2 %v1766_v37 }
 0x3ee   : > { %v1761_v38 = vsub.f32 %v1747_v59, %v1759_v12  ;;  %v1371_v4 = vsub.f32 %v5865_v31, %v1369_v36  ;;  %v5913_v29 = vmul.f32 %v5863_v46, %v1627_v15 }
 0x3f0   : > { %v1631_v41 = vmul.f32 %v5913_v29, %v5913_v29  ;;  %v5918_v42 = vmul.f32 %v5863_v46, %v1761_v38  ;;  %v5921_v43 = vmul.f32 %v5863_v46, %v1371_v4  ;;  %v2048_v38 = vpop.f32.mrf.mxu1  ;;  %v2034_v4 = vpop.f32.mrf.mxu0 }
 0x3f2   : > { %v1635_v44 = vsel %vm1284_vm7, %v1631_v41, 0.0  ;;  %v1765_v39 = vmul.f32 %v5918_v42, %v5918_v42  ;;  %v1375_v31 = vmul.f32 %v5921_v43, %v5921_v43 }
 0x3f3   : > { %v1620_v47 = vpop.xlane.xlu0 %1619  ;;  %1636 = vadd.xlane.f32.xlu0 %v1635_v44 }
 0x3f4   : > { %v1624_v48 = vmul.f32 0.022222223, %v1620_v47  ;;  %v1769_v49 = vsel %vm1284_vm7, %v1765_v39, 0.0  ;;  %v1379_v50 = vsel %vm1284_vm7, %v1375_v31, 0.0  ;;  %v5945_v39 = vadd.f32 %v2048_v38, %v2034_v4  ;;  %v4718_v31 = vld [vmem:[%s5951_s14 + $0x74] sm:$0xf0] }
 0x3f5   : > { %1770 = vadd.xlane.f32.xlu1 %v1769_v49  ;;  %1380 = vadd.xlane.f32.xlu2 %v1379_v50  ;;  %v4717_v47 = vld [vmem:[%s5951_s14 + $0x74] sm:$0xf]  ;;  %v4112_v49 = vld [vmem:[%s5951_s14 + $0x78] sm:$0xf0]  ;;  %v4102_v50 = vld [vmem:[%s5951_s14 + $0x60] sm:$0xf] }
 0x3f6   : > { %v1626_v51 = vsub.f32 %v5870_v52, %v1624_v48 }
 0x3f8   : > { %v5932_v40 = vmul.f32 %v5863_v46, %v1626_v51  ;;  %v2050_v41 = vpop.f32.mrf.mxu1  ;;  %v2036_v44 = vpop.f32.mrf.mxu0  ;;  %v4716_v51 = vld [vmem:[%s5951_s14 + $0x64] sm:$0xf0] }
 0x3fa   : > { %v1630_v5 = vmul.f32 %v5932_v40, %v5932_v40 }
 0x3fc   : > { %v1632_v9 = vsel %vm1284_vm7, %v1630_v5, 0.0  ;;  %v4047_v5 = vmul.f32 -1.442695, %v5945_v39 }
 0x3fd   : > { %1633 = vadd.xlane.f32.xlu1 %v1632_v9  ;;  %v4115_v9 = vor.u32 %v4717_v47, %v4112_v49  ;;  %v4158_v49 = vld [vmem:[%s5951_s14 + $0xd0] sm:$0xf] }
 0x3ff   : > { %2389 = vmatpush.bf16.msra.mxu2 %v4115_v9 }
 0x44e   : > { %v1512_v53 = vpop.xlane.xlu1 %1511 }
 0x44f   : > { %v1516_v54 = vmul.f32 0.022222223, %v1512_v53  ;;  %v4715_v53 = vld [vmem:[%s5951_s14 + $0x64] sm:$0xf] }
 0x451   : > { %v1518_v55 = vadd.f32 1e-05, %v1516_v54  ;;  %v4104_v54 = vld [vmem:[%s5951_s14 + $0x68] sm:$0xf0] }
 0x453   : > { %4965 = vrsqrt.f32 %v1518_v55  ;;  %vm1526_vm3 = vweird.f32 %v1518_v55 }
 0x456   : > { %v1515_v56 = vpop.xlane.xlu0 %1514 }
 0x457   : > { %v1517_v57 = vmul.f32 0.022222223, %v1515_v56  ;;  %v4103_v56 = vor.u32 %v4716_v51, %v4102_v50  ;;  %v4730_v50 = vld [vmem:[%s5951_s14 + $0xd4] sm:$0xf0] }
 0x458   : > { %v4159_v9 = vor.u32 %v4730_v50, %v4158_v49  ;;  %v4724_v49 = vld [vmem:[%s5951_s14 + $0xa4] sm:$0xf0] }
 0x459   : > { %v4966_v58 = vpop.eup %4965  ;;  %v1519_v59 = vadd.f32 1e-05, %v1517_v57  ;;  %v4094_v57 = vld [vmem:[%s5951_s14 + $0x50] sm:$0xf] }
 0x45a   : > { %v1521_v60 = vmul.f32 %v4966_v58, %v1518_v55  ;;  %vm1527_vm2 = vweird.f32 %v4966_v58 }
 0x45b   : > { %4967 = vrsqrt.f32 %v1519_v59  ;;  %vm1528_vm4 = vmor %vm1526_vm3, %vm1527_vm2  ;;  %vm1536_vm6 = vweird.f32 %v1519_v59 }
 0x45c   : > { %v1522_v52 = vmul.f32 %v4966_v58, %v1521_v60  ;;  %v4174_v60 = vld [vmem:[%s5951_s14 + $0xf0] sm:$0xf] }
 0x45e   : > { %v1523_v61 = vmul.f32 0.5, %v1522_v52  ;;  %v4734_v52 = vld [vmem:[%s5951_s14 + $0xf4] sm:$0xf0] }
 0x460   : > { %v1524_v46 = vsub.f32 1.5, %v1523_v61  ;;  %v1768_v62 = vpop.xlane.xlu2 %1767  ;;  %v4733_v61 = vld [vmem:[%s5951_s14 + $0xf4] sm:$0xf] }
 0x461   : > { %v4968_v63 = vpop.eup %4967  ;;  %v1772_v0 = vmul.f32 0.022222223, %v1768_v62  ;;  %v4096_v62 = vld [vmem:[%s5951_s14 + $0x58] sm:$0xf0] }
 0x462   : > { %v1531_v1 = vmul.f32 %v4968_v63, %v1519_v59  ;;  %v1525_v2 = vmul.f32 %v4966_v58, %v1524_v46  ;;  %vm1537_vm5 = vweird.f32 %v4968_v63  ;;  %v4107_v59 = vor.u32 %v4715_v53, %v4104_v54  ;;  %v4713_v46 = vld [vmem:[%s5951_s14 + $0x54] sm:$0xf]  ;;  %v4160_v54 = vld [vmem:[%s5951_s14 + $0xd8] sm:$0xf0] }
 0x463   : > { %v1774_v3 = vadd.f32 1e-05, %v1772_v0  ;;  %vm1538_vm8 = vmor %vm1536_vm6, %vm1537_vm5  ;;  %v4176_v0 = vld [vmem:[%s5951_s14 + $0xf8] sm:$0xf0]  ;;  %v4729_v53 = vld [vmem:[%s5951_s14 + $0xd4] sm:$0xf] }
 0x464   : > { %v1532_v6 = vmul.f32 %v4968_v63, %v1531_v1  ;;  %v1529_v13 = vsel %vm1528_vm4, %v4966_v58, %v1525_v2  ;;  %v4714_v58 = vld [vmem:[%s5951_s14 + $0x54] sm:$0xf0]  ;;  %v2076_v1 = vpop.f32.mrf.mxu3  ;;  %v1378_v2 = vpop.xlane.xlu0 %1377  ;;  %2390 = vmatpush.bf16.msra.mxu2 %v4107_v59  ;;  %v4070_v59 = vld [vmem:[%s5951_s14 + $0x20] sm:$0xf] }
 0x465   : > { %4969 = vrsqrt.f32 %v1774_v3  ;;  %v1540_v14 = vmul.f32 %v1529_v13, %v5888_v11  ;;  %vm1782_vm10 = vweird.f32 %v1774_v3  ;;  %v4095_v13 = vor.u32 %v4714_v58, %v4094_v57 }
 0x466   : > { %v1533_v16 = vmul.f32 0.5, %v1532_v6  ;;  %v4166_v6 = vld [vmem:[%s5951_s14 + $0xe0] sm:$0xf]  ;;  %v4163_v57 = vor.u32 %v4729_v53, %v4160_v54  ;;  %v4136_v53 = vld [vmem:[%s5951_s14 + $0xa8] sm:$0xf0] }
 0x467   : > { %1800 = vrot.lane.b32.xlu2 %v1540_v14, %s5286_s10  ;;  %v4732_v14 = vld [vmem:[%s5951_s14 + $0xe4] sm:$0xf0] }
 0x468   : > { %v1534_v17 = vsub.f32 1.5, %v1533_v16  ;;  %v1771_v18 = vpop.xlane.xlu1 %1770  ;;  %v4731_v16 = vld [vmem:[%s5951_s14 + $0xe4] sm:$0xf] }
 0x469   : > { %v1773_v19 = vmul.f32 0.022222223, %v1771_v18  ;;  %v2062_v18 = vpop.f32.mrf.mxu2 }
 0x46a   : > { %v1535_v20 = vmul.f32 %v4968_v63, %v1534_v17  ;;  %v4168_v17 = vld [vmem:[%s5951_s14 + $0xe8] sm:$0xf0] }
 0x46b   : > { %v4970_v22 = vpop.eup %4969  ;;  %v1775_v23 = vadd.f32 1e-05, %v1773_v19  ;;  %v4099_v19 = vor.u32 %v4713_v46, %v4096_v62  ;;  %v4072_v62 = vld [vmem:[%s5951_s14 + $0x28] sm:$0xf0] }
 0x46c   : > { %v1777_v24 = vmul.f32 %v4970_v22, %v1774_v3  ;;  %v1539_v26 = vsel %vm1538_vm8, %v4968_v63, %v1535_v20  ;;  %vm1783_vm9 = vweird.f32 %v4970_v22  ;;  %v4175_v63 = vor.u32 %v4734_v52, %v4174_v60  ;;  %v4086_v20 = vld [vmem:[%s5951_s14 + $0x40] sm:$0xf]  ;;  %v4708_v60 = vld [vmem:[%s5951_s14 + $0x24] sm:$0xf0]  ;;  %v4707_v52 = vld [vmem:[%s5951_s14 + $0x24] sm:$0xf] }
 0x46d   : > { %v1541_v27 = vmul.f32 %v1539_v26, %v5894_v34  ;;  %4971 = vrsqrt.f32 %v1775_v23  ;;  %vm1784_vm11 = vmor %vm1782_vm10, %vm1783_vm9  ;;  %vm1792_vm13 = vweird.f32 %v1775_v23  ;;  %v4179_v3 = vor.u32 %v4733_v61, %v4176_v0  ;;  %v4711_v26 = vld [vmem:[%s5951_s14 + $0x44] sm:$0xf]  ;;  %2391 = vmatpush.bf16.msra.mxu2 %v4099_v19  ;;  %v4728_v0 = vld [vmem:[%s5951_s14 + $0xc4] sm:$0xf0] }
 0x46e   : > { %v1778_v7 = vmul.f32 %v4970_v22, %v1777_v24  ;;  %2375 = vmatpush.bf16.msra.mxu1 %v4175_v63  ;;  %4973 = vpow2.f32 %v4047_v5  ;;  %v4171_v24 = vor.u32 %v4731_v16, %v4168_v17  ;;  %v4071_v46 = vor.u32 %v4708_v60, %v4070_v59  ;;  %v4150_v63 = vld [vmem:[%s5951_s14 + $0xc0] sm:$0xf]  ;;  %v4062_v17 = vld [vmem:[%s5951_s14 + $0x10] sm:$0xf]  ;;  %v4705_v19 = vld [vmem:[%s5951_s14 + $0x14] sm:$0xf] }
 0x46f   : > { %1802 = vrot.lane.b32.xlu1 %v1541_v27, %s5286_s10  ;;  %2403 = vmatpush.bf16.msra.mxu3 %v4179_v3  ;;  %v4088_v27 = vld [vmem:[%s5951_s14 + $0x48] sm:$0xf0]  ;;  %v4727_v3 = vld [vmem:[%s5951_s14 + $0xc4] sm:$0xf] }
 0x470   : > { %v1779_v11 = vmul.f32 0.5, %v1778_v7  ;;  %v1382_v7 = vmul.f32 0.022222223, %v1378_v2  ;;  %v1634_v58 = vpop.xlane.xlu1 %1633  ;;  %v4151_v2 = vor.u32 %v4728_v0, %v4150_v63  ;;  %v4721_v63 = vld [vmem:[%s5951_s14 + $0x94] sm:$0xf] }
 0x472   : > { %v1780_v21 = vsub.f32 1.5, %v1779_v11 }
 0x473   : > { %v4972_v45 = vpop.eup %4971  ;;  %2404 = vmatpush.bf16.msra.mxu3 %v4171_v24  ;;  %v4142_v24 = vld [vmem:[%s5951_s14 + $0xb0] sm:$0xf] }
 0x474   : > { %v1781_v30 = vmul.f32 %v4970_v22, %v1780_v21  ;;  %v1787_v25 = vmul.f32 %v4972_v45, %v1775_v23  ;;  %vm1793_vm12 = vweird.f32 %v4972_v45  ;;  %v4167_v23 = vor.u32 %v4732_v14, %v4166_v6  ;;  %v1381_v21 = vpop.xlane.xlu2 %1380  ;;  %v4152_v6 = vld [vmem:[%s5951_s14 + $0xc8] sm:$0xf0] }
 0x475   : > { %vm1794_vm14 = vmor %vm1792_vm13, %vm1793_vm12  ;;  %v4155_v14 = vor.u32 %v4727_v3, %v4152_v6  ;;  %v4128_v3 = vld [vmem:[%s5951_s14 + $0x98] sm:$0xf0] }
 0x476   : > { %v1785_v32 = vsel %vm1784_vm11, %v4970_v22, %v1781_v30  ;;  %v1788_v33 = vmul.f32 %v4972_v45, %v1787_v25  ;;  %v4712_v22 = vld [vmem:[%s5951_s14 + $0x44] sm:$0xf0]  ;;  %2376 = vmatpush.bf16.msra.mxu1 %v4167_v23  ;;  %v4974_v30 = vpop.eup %4973  ;;  %v4064_v23 = vld [vmem:[%s5951_s14 + $0x18] sm:$0xf0] }
 0x477   : > { %v1796_v35 = vmul.f32 %v1785_v32, %v5905_v28  ;;  %v5947_v28 = vadd.f32 %v2050_v41, %v2036_v44  ;;  %v4087_v11 = vor.u32 %v4712_v22, %v4086_v20  ;;  %v5979_v32 = vadd.f32 1e-05, %v1382_v7  ;;  %v4078_v44 = vld [vmem:[%s5951_s14 + $0x30] sm:$0xf]  ;;  %2405 = vmatpush.bf16.msra.mxu3 %v4163_v57 }
 0x478   : > { %v1789_v15 = vmul.f32 0.5, %v1788_v33  ;;  %v1383_v33 = vmul.f32 0.022222223, %v1381_v21  ;;  %v4067_v7 = vor.u32 %v4705_v19, %v4064_v23  ;;  %v4725_v21 = vld [vmem:[%s5951_s14 + $0xb4] sm:$0xf] }
 0x479   : > { %1808 = vrot.lane.b32.xlu0 %v1796_v35, %s5286_s10  ;;  %v4049_v55 = vmul.f32 -1.442695, %v5947_v28  ;;  %v2078_v35 = vpop.f32.mrf.mxu3  ;;  %v4720_v19 = vld [vmem:[%s5951_s14 + $0x84] sm:$0xf0]  ;;  %vm1392_vm1 = vweird.f32 %v5979_v32 }
 0x47a   : > { %v1790_v34 = vsub.f32 1.5, %v1789_v15  ;;  %v1637_v15 = vpop.xlane.xlu0 %1636  ;;  %v5990_v41 = vadd.f32 1e-05, %v1383_v33  ;;  %2377 = vmatpush.bf16.msra.mxu1 %v4159_v9  ;;  %v4723_v9 = vld [vmem:[%s5951_s14 + $0xa4] sm:$0xf] }
 0x47b   : > { %4975 = vpow2.f32 %v4049_v55  ;;  %v1639_v4 = vmul.f32 0.022222223, %v1637_v15  ;;  %2406 = vmatpush.bf16.msra.mxu3 %v4155_v14  ;;  %v4139_v57 = vor.u32 %v4723_v9, %v4136_v53 }
 0x47c   : > { %v1791_v12 = vmul.f32 %v4972_v45, %v1790_v34  ;;  %v2064_v34 = vpop.f32.mrf.mxu2  ;;  %4977 = vrsqrt.f32 %v5979_v32  ;;  %vm1402_vm11 = vweird.f32 %v5990_v41 }
 0x47d   : > { %v5987_v38 = vadd.f32 %v2078_v35, %v2064_v34  ;;  %v4054_v34 = vld [vmem:[%s5951_s14] sm:$0xf] }
 0x47e   : > { %v1795_v36 = vsel %vm1794_vm14, %v4972_v45, %v1791_v12  ;;  %v4091_v45 = vor.u32 %v4711_v26, %v4088_v27  ;;  %v5981_v12 = vadd.f32 1.0, %v4974_v30  ;;  %2378 = vmatpush.bf16.msra.mxu1 %v4151_v2  ;;  %v4726_v26 = vld [vmem:[%s5951_s14 + $0xb4] sm:$0xf0] }
 0x47f   : > { %v1797_v37 = vmul.f32 %v1795_v36, %v5918_v42  ;;  %v4110_v42 = vld [vmem:[%s5951_s14 + $0x70] sm:$0xf]  ;;  %v4050_v55 = vmul.f32 -1.442695, %v5987_v38 }
 0x480   : > { %v4111_v48 = vor.u32 %v4718_v31, %v4110_v42  ;;  %2392 = vmatpush.bf16.msra.mxu2 %v4091_v45  ;;  %v4710_v42 = vld [vmem:[%s5951_s14 + $0x34] sm:$0xf0]  ;;  %v4709_v31 = vld [vmem:[%s5951_s14 + $0x34] sm:$0xf]  ;;  %4979 = vrcp.f32 %v5981_v12  ;;  %v4144_v45 = vld [vmem:[%s5951_s14 + $0xb8] sm:$0xf0]  ;;  %vm2102_vm0 = vweird.f32 %v5981_v12 }
 0x481   : > { %1810 = vrot.lane.b32.xlu2 %v1797_v37, %s5286_s10  ;;  %v4976_v25 = vpop.eup %4975  ;;  %v5985_v37 = vadd.f32 %v2076_v1, %v2062_v18  ;;  %v4079_v47 = vor.u32 %v4710_v42, %v4078_v44  ;;  %v4075_v1 = vor.u32 %v4707_v52, %v4072_v62  ;;  %v4706_v18 = vld [vmem:[%s5951_s14 + $0x14] sm:$0xf0]  ;;  %v4147_v33 = vor.u32 %v4725_v21, %v4144_v45  ;;  %v4703_v44 = vld [vmem:[%s5951_s14 + $0x4] sm:$0xf] }
 0x482   : > { %2361 = vmatpush.bf16.msra.mxu0 %v4111_v48  ;;  %v5983_v36 = vadd.f32 1.0, %v4976_v25  ;;  %v4080_v48 = vld [vmem:[%s5951_s14 + $0x38] sm:$0xf0]  ;;  %v6009_v61 = vpop.eup %4977  ;;  %v4063_v22 = vor.u32 %v4706_v18, %v4062_v17  ;;  %v4722_v62 = vld [vmem:[%s5951_s14 + $0x94] sm:$0xf0] }
 0x483   : > { %v4048_v51 = vmul.f32 -1.442695, %v5985_v37  ;;  %v4083_v5 = vor.u32 %v4709_v31, %v4080_v48  ;;  %v1387_v16 = vmul.f32 %v6009_v61, %v5979_v32  ;;  %2407 = vmatpush.bf16.msra.mxu3 %v4147_v33  ;;  %v4134_v48 = vld [vmem:[%s5951_s14 + $0xa0] sm:$0xf]  ;;  %vm1393_vm15 = vweird.f32 %v6009_v61 }
 0x484   : > { %4981 = vrcp.f32 %v5983_v36  ;;  %v4118_v18 = vld [vmem:[%s5951_s14 + $0x80] sm:$0xf]  ;;  %vm6090_vm3 = vmor %vm1392_vm1, %vm1393_vm15  ;;  %vm2132_vm5 = vweird.f32 %v5983_v36 }
 0x485   : > { %2393 = vmatpush.bf16.msra.mxu2 %v4083_v5  ;;  %4983 = vrsqrt.f32 %v5990_v41  ;;  %v1388_v15 = vmul.f32 %v6009_v61, %v1387_v16  ;;  %v4135_v5 = vor.u32 %v4724_v49, %v4134_v48 }
 0x486   : > { %2362 = vmatpush.bf16.msra.mxu0 %v4103_v56  ;;  %v6003_v56 = vadd.f32 1e-05, %v1639_v4  ;;  %4985 = vpow2.f32 %v4048_v51  ;;  %v6022_v20 = vpop.eup %4979  ;;  %v4704_v4 = vld [vmem:[%s5951_s14 + $0x4] sm:$0xf0] }
 0x487   : > { %4987 = vpow2.f32 %v4050_v55  ;;  %v4055_v31 = vor.u32 %v4704_v4, %v4054_v34  ;;  %v2098_v55 = vmul.f32 %v6022_v20, %v5981_v12  ;;  %v1389_v52 = vmul.f32 0.5, %v1388_v15  ;;  %2408 = vmatpush.bf16.msra.mxu3 %v4139_v57 }
 0x488   : > { %4989 = vrsqrt.f32 %v6003_v56  ;;  %vm2103_vm2 = vweird.f32 %v6022_v20  ;;  %vm1658_vm15 = vweird.f32 %v6003_v56 }
 0x489   : > { %2394 = vmatpush.bf16.msra.mxu2 %v4075_v1  ;;  %v2099_v6 = vsub.f32 1.0, %v2098_v55  ;;  %v1390_v16 = vsub.f32 1.5, %v1389_v52  ;;  %vm6107_vm6 = vmor %vm2102_vm0, %vm2103_vm2 }
 0x48a   : > { %2363 = vmatpush.bf16.msra.mxu0 %v4095_v13  ;;  %v1638_v13 = vmul.f32 0.022222223, %v1634_v58  ;;  %v6028_v27 = vpop.eup %4981 }
 0x48b   : > { %v6032_v30 = vpop.eup %4983  ;;  %v2128_v58 = vmul.f32 %v6028_v27, %v5983_v36  ;;  %v1391_v33 = vmul.f32 %v6009_v61, %v1390_v16  ;;  %vm2133_vm4 = vweird.f32 %v6028_v27 }
 0x48c   : > { %v6034_v25 = vadd.f32 1e-05, %v1638_v13  ;;  %v4986_v35 = vpop.eup %4985  ;;  %v1397_v50 = vmul.f32 %v6032_v30, %v5990_v41  ;;  %v4131_v13 = vor.u32 %v4721_v63, %v4128_v3  ;;  %vm1403_vm8 = vweird.f32 %v6032_v30  ;;  %vm6124_vm10 = vmor %vm2132_vm5, %vm2133_vm4 }
 0x48d   : > { %2395 = vmatpush.bf16.msra.mxu2 %v4067_v7  ;;  %v4988_v42 = vpop.eup %4987  ;;  %v6054_v59 = vadd.f32 1.0, %v4986_v35  ;;  %v2129_v14 = vsub.f32 1.0, %v2128_v58  ;;  %v4120_v7 = vld [vmem:[%s5951_s14 + $0x88] sm:$0xf0]  ;;  %vm1404_vm13 = vmor %vm1402_vm11, %vm1403_vm8 }
 0x48e   : > { %2364 = vmatpush.bf16.msra.mxu0 %v4087_v11  ;;  %v4143_v11 = vor.u32 %v4726_v26, %v4142_v24  ;;  %v6047_v54 = vpop.eup %4989  ;;  %4991 = vrsqrt.f32 %v6034_v25  ;;  %v6056_v60 = vadd.f32 1.0, %v4988_v42  ;;  %v1398_v1 = vmul.f32 %v6032_v30, %v1397_v50  ;;  %2409 = vmatpush.bf16.msra.mxu3 %v4131_v13 }
 0x48f   : > { %v1653_v0 = vmul.f32 %v6047_v54, %v6003_v56  ;;  %4993 = vrcp.f32 %v6054_v59  ;;  %v4119_v26 = vor.u32 %v4720_v19, %v4118_v18  ;;  %v2130_v45 = vmul.f32 %v6028_v27, %v2129_v14 }
 0x490   : > { %2379 = vmatpush.bf16.msra.mxu1 %v4143_v11  ;;  %4995 = vrcp.f32 %v6056_v60  ;;  %v1399_v24 = vmul.f32 0.5, %v1398_v1  ;;  %v2100_v11 = vmul.f32 %v6022_v20, %v2099_v6  ;;  %v1395_v50 = vsel %vm6090_vm3, %v6009_v61, %v1391_v33 }
 0x491   : > { %v1654_v23 = vmul.f32 %v6047_v54, %v1653_v0  ;;  %v2131_v49 = vadd.f32 %v6028_v27, %v2130_v45  ;;  %v6134_v0 = vld [vmem:[%s5614_s27] sm:$0xff]  ;;  %vm1659_vm14 = vweird.f32 %v6047_v54  ;;  %vm2117_vm1 = vweird.f32 %v6054_v59 }
 0x492   : > { %2365 = vmatpush.bf16.msra.mxu0 %v4079_v47  ;;  %v4056_v47 = vld [vmem:[%s5951_s14 + $0x8] sm:$0xf0]  ;;  %v1400_v4 = vsub.f32 1.5, %v1399_v24  ;;  %v2101_v42 = vadd.f32 %v6022_v20, %v2100_v11  ;;  %v1818_v1 = vperm.slane %v6134_v0, 4  ;;  %v1824_v18 = vperm.slane %v6134_v0, 5  ;;  %vm6148_vm0 = vmor %vm1658_vm15, %vm1659_vm14 }
 0x493   : > { %v4059_v51 = vor.u32 %v4703_v44, %v4056_v47  ;;  %v1655_v34 = vmul.f32 0.5, %v1654_v23  ;;  %v2108_v47 = vand.u32 2147483648, %v5981_v12  ;;  %v2135_v63 = vsel %vm6124_vm10, %v6028_v27, %v2131_v49 }
 0x494   : > { %2380 = vmatpush.bf16.msra.mxu1 %v4135_v5  ;;  %v6066_v17 = vpop.eup %4991  ;;  %v2138_v5 = vand.u32 2147483648, %v5983_v36  ;;  %v1401_v57 = vmul.f32 %v6032_v30, %v1400_v4  ;;  %vm1648_vm5 = vweird.f32 %v6034_v25  ;;  %v6171_v4 = vld [vmem:[%s5614_s27 + $0x8] sm:$0xff]  ;;  %v2153_v48 = vand.u32 2147483648, %v6056_v60 }
 0x495   : > { %2396 = vmatpush.bf16.msra.mxu2 %v4059_v51  ;;  %v1643_v35 = vmul.f32 %v6066_v17, %v6034_v25  ;;  %v6080_v15 = vpop.eup %4993  ;;  %v2136_v51 = vand.u32 2147483647, %v5983_v36  ;;  %v1656_v61 = vsub.f32 1.5, %v1655_v34  ;;  %v2105_v36 = vsel %vm6107_vm6, %v6022_v20, %v2101_v42 }
 0x496   : > { %2366 = vmatpush.bf16.msra.mxu0 %v4071_v46  ;;  %v4126_v46 = vld [vmem:[%s5951_s14 + $0x90] sm:$0xf]  ;;  %v6084_v44 = vpop.eup %4995  ;;  %v2113_v9 = vmul.f32 %v6080_v15, %v6054_v59  ;;  %v1405_v41 = vsel %vm1404_vm13, %v6032_v30, %v1401_v57  ;;  %vm1649_vm2 = vweird.f32 %v6066_v17  ;;  %vm2118_vm3 = vweird.f32 %v6080_v15 }
 0x497   : > { %v4127_v2 = vor.u32 %v4722_v62, %v4126_v46  ;;  %v1644_v32 = vmul.f32 %v6066_v17, %v1643_v35  ;;  %v2143_v55 = vmul.f32 %v6084_v44, %v6056_v60  ;;  %v1406_v62 = vmul.f32 %v1395_v50, %v5900_v8  ;;  %vm1650_vm8 = vmor %vm1648_vm5, %vm1649_vm2 }
 0x498   : > { %vm2137_vm12 = vcmp.eq.f32.partialorder %v2136_v51, 8.507059e+37  ;;  %v2114_v3 = vsub.f32 1.0, %v2113_v9  ;;  %v1657_v13 = vmul.f32 %v6047_v54, %v1656_v61  ;;  %v1407_v24 = vmul.f32 %v1405_v41, %v5921_v43  ;;  %v5016_v41 = vld [vmem:[#allocation2 + $0x10] sm:$0xff] }
 0x499   : > { %2381 = vmatpush.bf16.msra.mxu1 %v4127_v2  ;;  %v1645_v20 = vmul.f32 0.5, %v1644_v32  ;;  %v2139_v2 = vor.u32 1.1754944e-38, %v2138_v5  ;;  %v2144_v8 = vsub.f32 1.0, %v2143_v55  ;;  %vm2148_vm4 = vweird.f32 %v6084_v44 }
 0x49a   : > { %2367 = vmatpush.bf16.msra.mxu0 %v4063_v22  ;;  %v4719_v22 = vld [vmem:[%s5951_s14 + $0x84] sm:$0xf]  ;;  %v1661_v56 = vsel %vm6148_vm0, %v6047_v54, %v1657_v13  ;;  %v1819_v42 = vperm.slane %v6171_v4, 4  ;;  %vm2147_vm6 = vweird.f32 %v6056_v60  ;;  %v2151_v49 = vand.u32 2147483647, %v6056_v60 }
 0x49b   : > { %v4123_v21 = vor.u32 %v4719_v22, %v4120_v7  ;;  %v2140_v14 = vsel %vm2137_vm12, %v2139_v2, %v2135_v63  ;;  %v1646_v16 = vsub.f32 1.5, %v1645_v20  ;;  %v2115_v22 = vmul.f32 %v6080_v15, %v2114_v3  ;;  %vm2149_vm10 = vmor %vm2147_vm6, %vm2148_vm4 }
 0x49c   : > { %v2159_v11 = vmul.f32 %v2140_v14, %v5947_v28  ;;  %v1663_v28 = vmul.f32 %v1661_v56, %v5913_v29  ;;  %v2154_v57 = vor.u32 1.1754944e-38, %v2153_v48  ;;  %vm2152_vm12 = vcmp.eq.f32.partialorder %v2151_v49, 8.507059e+37 }
 0x49d   : > { %2382 = vmatpush.bf16.msra.mxu1 %v4119_v26  ;;  %2410 = vmatpush.bf16.msra.mxu3 %v4123_v21  ;;  %v2145_v26 = vmul.f32 %v6084_v44, %v2144_v8  ;;  %v2121_v21 = vand.u32 2147483647, %v6054_v59  ;;  %v1647_v43 = vmul.f32 %v6066_v17, %v1646_v16  ;;  %v2116_v34 = vadd.f32 %v6080_v15, %v2115_v22  ;;  %v5017_v22 = vld [vmem:[#allocation2 + $0x8] sm:$0xff] }
 0x49e   : > { %2368 = vmatpush.bf16.msra.mxu0 %v4055_v31  ;;  %v2106_v31 = vand.u32 2147483647, %v5981_v12  ;;  %v2109_v12 = vor.u32 1.1754944e-38, %v2108_v47  ;;  %v2123_v47 = vand.u32 2147483648, %v6054_v59  ;;  %v1825_v59 = vperm.slane %v6171_v4, 5 }
 0x49f   : > { %v2146_v54 = vadd.f32 %v6084_v44, %v2145_v26  ;;  %v1651_v51 = vsel %vm1650_vm8, %v6066_v17, %v1647_v43  ;;  %vm2122_vm11 = vcmp.eq.f32.partialorder %v2121_v21, 8.507059e+37  ;;  %v5018_v26 = vld [vmem:[#allocation2 + $0x18] sm:$0xff]  ;;  %v4267_v43 = vld [vmem:[%s6216_s21 + $0xa8] sm:$0xf] }
 0x4a0   : > { %vm6118_vm9 = vcmp.eq.f32.partialorder %v2106_v31, 8.507059e+37  ;;  %v2124_v61 = vor.u32 1.1754944e-38, %v2123_v47  ;;  %v1662_v60 = vmul.f32 %v1651_v51, %v5932_v40  ;;  %v4779_v47 = vld [vmem:[%s6216_s21 + $0x158] sm:$0xf0] }
 0x4a1   : > { %v2110_v27 = vsel %vm6118_vm9, %v2109_v12, %v2105_v36  ;;  %vm6182_vm9 = vmor %vm2117_vm1, %vm2118_vm3  ;;  %v2150_v9 = vsel %vm2149_vm10, %v6084_v44, %v2146_v54  ;;  %v4755_v54 = vld [vmem:[%s6216_s21 + $0x98] sm:$0xf0] }
 0x4a2   : > { %v2157_v30 = vmul.f32 %v2110_v27, %v5945_v39  ;;  %v2120_v5 = vsel %vm6182_vm9, %v6080_v15, %v2116_v34  ;;  %v2155_v15 = vsel %vm2152_vm12, %v2154_v57, %v2150_v9  ;;  %v4782_v34 = vld [vmem:[%s6216_s21 + $0x170] sm:$0xf0] }
 0x4a3   : > { %v2160_v46 = vmul.f32 %v2155_v15, %v5987_v38 }
 0x4c1   : > { %v1801_v58 = vpop.permute.xlu2 %1800 }
 0x4c2   : > { %v1814_v6 = vsel %vm1284_vm7, %v1406_v62, %v1801_v58  ;;  %v2125_v58 = vsel %vm2122_vm11, %v2124_v61, %v2120_v5 }
 0x4c3   : > { %v1820_v19 = vmul.f32 %v1818_v1, %v1814_v6  ;;  %v2158_v44 = vmul.f32 %v2125_v58, %v5985_v37  ;;  %v5015_v6 = vld [vmem:[#allocation2] sm:$0xff] }
 0x4c5   : > { %v1826_v39 = vadd.f32 %v1824_v18, %v1820_v19 }
 0x4c7   : > { %v2161_v32 = vmul.f32 %v2157_v30, %v1826_v39  ;;  %v4758_v39 = vld [vmem:[%s6216_s21 + $0xb0] sm:$0xf0] }
 0x4db   : > { %v1811_v33 = vpop.permute.xlu2 %1810 }
 0x4dc   : > { %v1817_v29 = vsel %vm1284_vm7, %v1663_v28, %v1811_v33  ;;  %v4363_v33 = vld [vmem:[%s6216_s21 + $0x168] sm:$0xf]  ;;  %v4255_v28 = vld [vmem:[%s6216_s21 + $0x90] sm:$0xf] }
 0x4dd   : > { %v1823_v53 = vmul.f32 %v1819_v42, %v1817_v29  ;;  %v4256_v48 = vor.u32 %v4755_v54, %v4255_v28  ;;  %v4751_v28 = vld [vmem:[%s6216_s21 + $0x7c] sm:$0xf]  ;;  %v4245_v54 = vld [vmem:[%s6216_s21 + $0x84] sm:$0xf0] }
 0x4df   : > { %v1829_v52 = vadd.f32 %v1825_v59, %v1823_v53 }
 0x4e1   : > { %v1803_v7 = vpop.permute.xlu1 %1802  ;;  %v2164_v63 = vmul.f32 %v2160_v46, %v1829_v52  ;;  %v4752_v52 = vld [vmem:[%s6216_s21 + $0x80] sm:$0xf0] }
 0x4e2   : > { %v1815_v45 = vsel %vm1284_vm7, %v1407_v24, %v1803_v7  ;;  %v4776_v46 = vld [vmem:[%s6216_s21 + $0x140] sm:$0xf0] }
 0x4e3   : > { %v1822_v35 = vmul.f32 %v1818_v1, %v1815_v45 }
 0x4e5   : > { %v1828_v31 = vadd.f32 %v1824_v18, %v1822_v35  ;;  %v4268_v35 = vor.u32 %v4758_v39, %v4267_v43  ;;  %v4207_v43 = vld [vmem:[%s6216_s21 + $0x30] sm:$0xf]  ;;  %v4743_v39 = vld [vmem:[%s6216_s21 + $0x38] sm:$0xf0] }
 0x4e7   : > { %v2163_v50 = vmul.f32 %v2159_v11, %v1828_v31  ;;  %v4351_v31 = vld [vmem:[%s6216_s21 + $0x150] sm:$0xf]  ;;  %2815 = vmatpush.bf16.msrb.mxu0 %v4268_v35  ;;  %v4208_v35 = vor.u32 %v4743_v39, %v4207_v43  ;;  %v4739_v43 = vld [vmem:[%s6216_s21 + $0x1c] sm:$0xf]  ;;  %v4197_v39 = vld [vmem:[%s6216_s21 + $0x24] sm:$0xf0] }
 0x4e8   : > { %v4352_v29 = vor.u32 %v4779_v47, %v4351_v31  ;;  %v4248_v31 = vor.u32 %v4751_v28, %v4245_v54  ;;  %v4775_v47 = vld [vmem:[%s6216_s21 + $0x13c] sm:$0xf]  ;;  %v4251_v28 = vld [vmem:[%s6216_s21 + $0x80] sm:$0xf]  ;;  %v4753_v54 = vld [vmem:[%s6216_s21 + $0x88] sm:$0xf0] }
 0x4e9   : > { %v2165_v55 = vpack.c.bf16 %v2163_v50, %v2161_v32 }
 0x4eb   : > { %v1809_v17 = vpop.permute.xlu0 %1808  ;;  %2369 = vmatmul.bf16.vlgmr.msra.gmra.mxu0 %v2165_v55  ;;  %2397 = vmatmul.bf16.vlgmr.msra.gmra.mxu2 %v2165_v55 }
 0x4ec   : > { %v1816_v36 = vsel %vm1284_vm7, %v1662_v60, %v1809_v17  ;;  %2816 = vmatpush.bf16.msrb.mxu0 %v4256_v48  ;;  %v4341_v48 = vld [vmem:[%s6216_s21 + $0x144] sm:$0xf0] }
 0x4ed   : > { %v1821_v12 = vmul.f32 %v1819_v42, %v1816_v36  ;;  %v4364_v42 = vor.u32 %v4782_v34, %v4363_v33  ;;  %v4243_v36 = vld [vmem:[%s6216_s21 + $0x78] sm:$0xf]  ;;  %v4303_v33 = vld [vmem:[%s6216_s21 + $0xf0] sm:$0xf]  ;;  %v4767_v34 = vld [vmem:[%s6216_s21 + $0xf8] sm:$0xf0] }
 0x4ef   : > { %v1827_v62 = vadd.f32 %v1825_v59, %v1821_v12  ;;  %2829 = vmatpush.bf16.msrb.mxu1 %v4364_v42  ;;  %v4339_v12 = vld [vmem:[%s6216_s21 + $0x138] sm:$0xf]  ;;  %v4304_v42 = vor.u32 %v4767_v34, %v4303_v33  ;;  %v4763_v33 = vld [vmem:[%s6216_s21 + $0xdc] sm:$0xf]  ;;  %v4293_v34 = vld [vmem:[%s6216_s21 + $0xe4] sm:$0xf0] }
 0x4f1   : > { %v2162_v20 = vmul.f32 %v2158_v44, %v1827_v62  ;;  %v4244_v44 = vor.u32 %v4752_v52, %v4243_v36  ;;  %v4231_v62 = vld [vmem:[%s6216_s21 + $0x60] sm:$0xf]  ;;  %v4737_v52 = vld [vmem:[%s6216_s21 + $0x8] sm:$0xf0] }
 0x4f2   : > { %v4183_v36 = vld [vmem:[%s6216_s21] sm:$0xf] }
 0x4f3   : > { %v2166_v1 = vpack.c.bf16 %v2164_v63, %v2162_v20  ;;  %2830 = vmatpush.bf16.msrb.mxu1 %v4352_v29  ;;  %2817 = vmatpush.bf16.msrb.mxu0 %v4244_v44  ;;  %v4749_v63 = vld [vmem:[%s6216_s21 + $0x68] sm:$0xf0]  ;;  %v4327_v20 = vld [vmem:[%s6216_s21 + $0x120] sm:$0xf]  ;;  %v4344_v29 = vor.u32 %v4775_v47, %v4341_v48  ;;  %v4184_v44 = vor.u32 %v4737_v52, %v4183_v36  ;;  %v4774_v52 = vld [vmem:[%s6216_s21 + $0x130] sm:$0xf0] }
 0x4f4   : > { %v4252_v47 = vor.u32 %v4753_v54, %v4251_v28  ;;  %v4347_v48 = vld [vmem:[%s6216_s21 + $0x140] sm:$0xf] }
 0x4f5   : > { %2383 = vmatmul.bf16.vlgmr.msra.gmra.mxu1 %v2166_v1  ;;  %2411 = vmatmul.bf16.vlgmr.msra.gmra.mxu3 %v2166_v1  ;;  %v4232_v1 = vor.u32 %v4749_v63, %v4231_v62  ;;  %v4221_v62 = vld [vmem:[%s6216_s21 + $0x54] sm:$0xf0] }
 0x4f7   : > { %2818 = vmatpush.bf16.msrb.mxu0 %v4232_v1  ;;  %v4769_v1 = vld [vmem:[%s6216_s21 + $0x10c] sm:$0xf] }
 0x568   : > { %v2370_v2 = vpop.f32.mrf.mxu0 }
 0x569   : > { %v2371_v27 = vadd.f32 %v5016_v41, %v2370_v2  ;;  %v4757_v2 = vld [vmem:[%s6216_s21 + $0xac] sm:$0xf]  ;;  %v4365_v41 = vld [vmem:[%s6216_s21 + $0x174] sm:$0xf0] }
 0x56e   : > { %v2398_v40 = vpop.f32.mrf.mxu2 }
 0x56f   : > { %v2399_v8 = vadd.f32 %v5015_v6, %v2398_v40  ;;  %v4773_v40 = vld [vmem:[%s6216_s21 + $0x128] sm:$0xf0] }
 0x570   : > { %v2372_v19 = vpop.f32.mrf.mxu0  ;;  %v4328_v6 = vor.u32 %v4773_v40, %v4327_v20  ;;  %v4317_v40 = vld [vmem:[%s6216_s21 + $0x114] sm:$0xf0] }
 0x571   : > { %v2373_v56 = vadd.f32 %v5018_v26, %v2372_v19 }
 0x572   : > { %v2384_v3 = vpop.f32.mrf.mxu1 }
 0x573   : > { %v6201_v16 = vadd.f32 %v2384_v3, %v2371_v27  ;;  %v4269_v3 = vld [vmem:[%s6216_s21 + $0xb4] sm:$0xf0] }
 0x576   : > { %v2400_v38 = vpop.f32.mrf.mxu2 }
 0x577   : > { %v2401_v23 = vadd.f32 %v5017_v22, %v2400_v38  ;;  %v4746_v38 = vld [vmem:[%s6216_s21 + $0x50] sm:$0xf0] }
 0x578   : > { %v2412_v13 = vpop.f32.mrf.mxu3  ;;  %v4770_v22 = vld [vmem:[%s6216_s21 + $0x110] sm:$0xf0] }
 0x579   : > { %v6199_v14 = vadd.f32 %v2412_v13, %v2399_v8  ;;  %v4272_v8 = vor.u32 %v4757_v2, %v4269_v3  ;;  %v4781_v13 = vld [vmem:[%s6216_s21 + $0x16c] sm:$0xf]  ;;  %v4275_v2 = vld [vmem:[%s6216_s21 + $0xb0] sm:$0xf]  ;;  %v4320_v3 = vor.u32 %v4769_v1, %v4317_v40  ;;  %v4215_v40 = vld [vmem:[%s6216_s21 + $0x38] sm:$0xf] }
 0x57a   : > { %v2386_v24 = vpop.f32.mrf.mxu1  ;;  %v4368_v27 = vor.u32 %v4781_v13, %v4365_v41  ;;  %v4783_v13 = vld [vmem:[%s6216_s21 + $0x178] sm:$0xf0] }
 0x57b   : > { %v2418_v37 = vmul.f32 %v5448_v10, %v6199_v14  ;;  %v6208_v11 = vadd.f32 %v2386_v24, %v2373_v56  ;;  %2843 = vmatpush.bf16.msrb.mxu2 %v4272_v8  ;;  %v4257_v24 = vld [vmem:[%s6216_s21 + $0x9c] sm:$0xf0]  ;;  %v4778_v56 = vld [vmem:[%s6216_s21 + $0x154] sm:$0xf]  ;;  %v4371_v8 = vld [vmem:[%s6216_s21 + $0x170] sm:$0xf] }
 0x57c   : > { %2857 = vmatpush.bf16.msrb.mxu3 %v4368_v27  ;;  %v4372_v27 = vor.u32 %v4783_v13, %v4371_v8  ;;  %v4768_v8 = vld [vmem:[%s6216_s21 + $0x100] sm:$0xf0] }
 0x57d   : > { %v2421_v18 = vadd.f32 %v2418_v37, %v6201_v16  ;;  %v4219_v37 = vld [vmem:[%s6216_s21 + $0x48] sm:$0xf] }
 0x57e   : > { %v4220_v19 = vor.u32 %v4746_v38, %v4219_v37  ;;  %v4742_v37 = vld [vmem:[%s6216_s21 + $0x34] sm:$0xf]  ;;  %v4209_v38 = vld [vmem:[%s6216_s21 + $0x3c] sm:$0xf0] }
 0x57f   : > { %2422 = vadd.xlane.f32.xlu0 %v2421_v18  ;;  %v4315_v18 = vld [vmem:[%s6216_s21 + $0x108] sm:$0xf] }
 0x580   : > { %v2414_v30 = vpop.f32.mrf.mxu3  ;;  %2819 = vmatpush.bf16.msrb.mxu0 %v4220_v19  ;;  %v4212_v19 = vor.u32 %v4742_v37, %v4209_v38  ;;  %v4203_v38 = vld [vmem:[%s6216_s21 + $0x20] sm:$0xf] }
 0x581   : > { %v6206_v7 = vadd.f32 %v2414_v30, %v2401_v23  ;;  %v4754_v23 = vld [vmem:[%s6216_s21 + $0x94] sm:$0xf]  ;;  %v4316_v30 = vor.u32 %v4770_v22, %v4315_v18  ;;  %v4305_v22 = vld [vmem:[%s6216_s21 + $0xfc] sm:$0xf0] }
 0x582   : > { %v4260_v26 = vor.u32 %v4754_v23, %v4257_v24  ;;  %v4766_v18 = vld [vmem:[%s6216_s21 + $0xf4] sm:$0xf]  ;;  %v4263_v23 = vld [vmem:[%s6216_s21 + $0x98] sm:$0xf]  ;;  %v4756_v24 = vld [vmem:[%s6216_s21 + $0xa0] sm:$0xf0] }
 0x583   : > { %v2420_v21 = vmul.f32 %v5448_v10, %v6206_v7 }
 0x584   : > { %2844 = vmatpush.bf16.msrb.mxu2 %v4260_v26  ;;  %2820 = vmatpush.bf16.msrb.mxu0 %v4208_v35  ;;  %v4264_v26 = vor.u32 %v4756_v24, %v4263_v23  ;;  %v4200_v35 = vor.u32 %v4739_v43, %v4197_v39  ;;  %v4765_v23 = vld [vmem:[%s6216_s21 + $0xe8] sm:$0xf0]  ;;  %v4287_v43 = vld [vmem:[%s6216_s21 + $0xc8] sm:$0xf]  ;;  %v4762_v39 = vld [vmem:[%s6216_s21 + $0xd0] sm:$0xf0] }
 0x585   : > { %v2424_v45 = vadd.f32 %v2420_v21, %v6208_v11  ;;  %v4353_v21 = vld [vmem:[%s6216_s21 + $0x15c] sm:$0xf0]  ;;  %v4288_v28 = vor.u32 %v4762_v39, %v4287_v43  ;;  %v4797_v39 = vld [vmem:[%s6338_s9 + $0x64] sm:$0xf] }
 0x587   : > { %2425 = vadd.xlane.f32.xlu1 %v2424_v45  ;;  %v4356_v45 = vor.u32 %v4778_v56, %v4353_v21  ;;  %v4359_v56 = vld [vmem:[%s6216_s21 + $0x158] sm:$0xf]  ;;  %v4780_v21 = vld [vmem:[%s6216_s21 + $0x160] sm:$0xf0] }
 0x588   : > { %2845 = vmatpush.bf16.msrb.mxu2 %v4248_v31  ;;  %v4296_v31 = vor.u32 %v4763_v33, %v4293_v34 }
 0x589   : > { %2858 = vmatpush.bf16.msrb.mxu3 %v4356_v45  ;;  %v4360_v45 = vor.u32 %v4780_v21, %v4359_v56  ;;  %v4191_v56 = vld [vmem:[%s6216_s21 + $0x8] sm:$0xf]  ;;  %v4738_v21 = vld [vmem:[%s6216_s21 + $0x10] sm:$0xf0] }
 0x58a   : > { %v4192_v34 = vor.u32 %v4738_v21, %v4191_v56  ;;  %v4400_v21 = vld [vmem:[%s6338_s9 + $0x30] sm:$0xf] }
 0x58d   : > { %2859 = vmatpush.bf16.msrb.mxu3 %v4344_v29  ;;  %v4777_v29 = vld [vmem:[%s6216_s21 + $0x148] sm:$0xf0] }
 0x5f2   : > { %v2423_v25 = vpop.xlane.xlu0 %2422 }
 0x5f3   : > { %v2427_v49 = vmul.f32 0.0055555557, %v2423_v25  ;;  %v4195_v25 = vld [vmem:[%s6216_s21 + $0x18] sm:$0xf] }
 0x5f5   : > { %v6227_v32 = vsub.f32 %v6201_v16, %v2427_v49  ;;  %v2430_v50 = vsub.f32 %v6199_v14, %v2427_v49  ;;  %v4740_v49 = vld [vmem:[%s6216_s21 + $0x20] sm:$0xf0] }
 0x5f7   : > { %v6231_v51 = vmul.f32 %v5448_v10, %v2430_v50  ;;  %v2437_v5 = vmul.f32 %v6227_v32, %v6227_v32  ;;  %v4291_v50 = vld [vmem:[%s6216_s21 + $0xd8] sm:$0xf] }
 0x5f9   : > { %v2438_v9 = vmul.f32 %v6231_v51, %v6231_v51 }
 0x5fa   : > { %v2426_v59 = vpop.xlane.xlu1 %2425 }
 0x5fb   : > { %v2428_v53 = vmul.f32 0.0055555557, %v2426_v59  ;;  %v2441_v55 = vadd.f32 %v2438_v9, %v2437_v5  ;;  %v4196_v5 = vor.u32 %v4740_v49, %v4195_v25  ;;  %v4764_v9 = vld [vmem:[%s6216_s21 + $0xe0] sm:$0xf0]  ;;  %v4348_v49 = vor.u32 %v4777_v29, %v4347_v48  ;;  %v4800_v48 = vld [vmem:[%s6338_s9 + $0x74] sm:$0xf0] }
 0x5fc   : > { %v4748_v59 = vld [vmem:[%s6216_s21 + $0x64] sm:$0xf]  ;;  %v4424_v29 = vld [vmem:[%s6338_s9 + $0x60] sm:$0xf] }
 0x5fd   : > { %v6238_v61 = vsub.f32 %v6208_v11, %v2428_v53  ;;  %v2432_v57 = vsub.f32 %v6206_v7, %v2428_v53  ;;  %2442 = vadd.xlane.f32.xlu2 %v2441_v55  ;;  %v4233_v53 = vld [vmem:[%s6216_s21 + $0x6c] sm:$0xf0]  ;;  %v4292_v55 = vor.u32 %v4764_v9, %v4291_v50  ;;  %2821 = vmatpush.bf16.msrb.mxu0 %v4196_v5  ;;  %v4736_v50 = vld [vmem:[%s6216_s21 + $0x4] sm:$0xf] }
 0x5fe   : > { %v4185_v5 = vld [vmem:[%s6216_s21 + $0xc] sm:$0xf0] }
 0x5ff   : > { %v6242_v60 = vmul.f32 %v5448_v10, %v2432_v57  ;;  %v2439_v17 = vmul.f32 %v6238_v61, %v6238_v61  ;;  %v4340_v10 = vor.u32 %v4776_v46, %v4339_v12  ;;  %v4236_v57 = vor.u32 %v4748_v59, %v4233_v53  ;;  %v4279_v12 = vld [vmem:[%s6216_s21 + $0xc0] sm:$0xf]  ;;  %v4761_v46 = vld [vmem:[%s6216_s21 + $0xc8] sm:$0xf0]  ;;  %v4760_v59 = vld [vmem:[%s6216_s21 + $0xc4] sm:$0xf] }
 0x600   : > { %v4280_v63 = vor.u32 %v4761_v46, %v4279_v12  ;;  %v4188_v9 = vor.u32 %v4736_v50, %v4185_v5  ;;  %v4281_v53 = vld [vmem:[%s6216_s21 + $0xcc] sm:$0xf0]  ;;  %v4747_v46 = vld [vmem:[%s6216_s21 + $0x58] sm:$0xf0]  ;;  %v4798_v5 = vld [vmem:[%s6338_s9 + $0x64] sm:$0xf0] }
 0x601   : > { %v2440_v58 = vmul.f32 %v6242_v60, %v6242_v60  ;;  %2831 = vmatpush.bf16.msrb.mxu1 %v4340_v10  ;;  %2846 = vmatpush.bf16.msrb.mxu2 %v4236_v57  ;;  %v4745_v10 = vld [vmem:[%s6216_s21 + $0x4c] sm:$0xf] }
 0x602   : > { %v4224_v20 = vor.u32 %v4745_v10, %v4221_v62  ;;  %2822 = vmatpush.bf16.msrb.mxu0 %v4184_v44  ;;  %v4227_v44 = vld [vmem:[%s6216_s21 + $0x50] sm:$0xf] }
 0x603   : > { %v2444_v15 = vadd.f32 %v2440_v58, %v2439_v17  ;;  %v4772_v17 = vld [vmem:[%s6216_s21 + $0x124] sm:$0xf]  ;;  %v4329_v58 = vld [vmem:[%s6216_s21 + $0x12c] sm:$0xf0]  ;;  %v4228_v62 = vor.u32 %v4747_v46, %v4227_v44  ;;  %v2481_v44 = vperm.slane %v6134_v0, 3  ;;  %v2482_v46 = vperm.slane %v6171_v4, 3 }
 0x604   : > { %v4323_v10 = vld [vmem:[%s6216_s21 + $0x110] sm:$0xf] }
 0x605   : > { %2445 = vadd.xlane.f32.xlu0 %v2444_v15  ;;  %2832 = vmatpush.bf16.msrb.mxu1 %v4328_v6  ;;  %v4332_v15 = vor.u32 %v4772_v17, %v4329_v58  ;;  %v4759_v6 = vld [vmem:[%s6216_s21 + $0xb8] sm:$0xf0]  ;;  %v4284_v17 = vor.u32 %v4760_v59, %v4281_v53  ;;  %v4750_v58 = vld [vmem:[%s6216_s21 + $0x70] sm:$0xf0]  ;;  %v4816_v59 = vld [vmem:[%s6338_s9 + $0xf4] sm:$0xf0] }
 0x606   : > { %2847 = vmatpush.bf16.msrb.mxu2 %v4224_v20  ;;  %v4276_v41 = vor.u32 %v4759_v6, %v4275_v2  ;;  %v4744_v2 = vld [vmem:[%s6216_s21 + $0x40] sm:$0xf0] }
 0x607   : > { %2860 = vmatpush.bf16.msrb.mxu3 %v4332_v15  ;;  %v4335_v15 = vld [vmem:[%s6216_s21 + $0x128] sm:$0xf] }
 0x608   : > { %2871 = vmatpush.bf16.msra.mxu0 %v4276_v41  ;;  %v4336_v12 = vor.u32 %v4774_v52, %v4335_v15 }
 0x609   : > { %2833 = vmatpush.bf16.msrb.mxu1 %v4316_v30  ;;  %v4308_v30 = vor.u32 %v4766_v18, %v4305_v22  ;;  %v4299_v22 = vld [vmem:[%s6216_s21 + $0xe0] sm:$0xf] }
 0x60a   : > { %2848 = vmatpush.bf16.msrb.mxu2 %v4212_v19  ;;  %v4741_v19 = vld [vmem:[%s6216_s21 + $0x28] sm:$0xf0] }
 0x60b   : > { %2861 = vmatpush.bf16.msrb.mxu3 %v4320_v3  ;;  %v4311_v3 = vld [vmem:[%s6216_s21 + $0xf8] sm:$0xf] }
 0x60c   : > { %2872 = vmatpush.bf16.msra.mxu0 %v4264_v26  ;;  %v4312_v37 = vor.u32 %v4768_v8, %v4311_v3  ;;  %v4300_v26 = vor.u32 %v4765_v23, %v4299_v22  ;;  %v4799_v22 = vld [vmem:[%s6338_s9 + $0x74] sm:$0xf]  ;;  %v4434_v23 = vld [vmem:[%s6338_s9 + $0x78] sm:$0xf0] }
 0x60d   : > { %2834 = vmatpush.bf16.msrb.mxu1 %v4304_v42 }
 0x60e   : > { %2849 = vmatpush.bf16.msrb.mxu2 %v4200_v35 }
 0x60f   : > { %2862 = vmatpush.bf16.msrb.mxu3 %v4308_v30  ;;  %v4204_v30 = vor.u32 %v4741_v19, %v4203_v38  ;;  %v4408_v38 = vld [vmem:[%s6338_s9 + $0x40] sm:$0xf] }
 0x610   : > { %2873 = vmatpush.bf16.msra.mxu0 %v4252_v47  ;;  %v4432_v47 = vld [vmem:[%s6338_s9 + $0x70] sm:$0xf] }
 0x611   : > { %2835 = vmatpush.bf16.msrb.mxu1 %v4292_v55  ;;  %v4239_v55 = vld [vmem:[%s6216_s21 + $0x68] sm:$0xf]  ;;  %v4433_v50 = vor.u32 %v4800_v48, %v4432_v47  ;;  %v4795_v48 = vld [vmem:[%s6338_s9 + $0x54] sm:$0xf] }
 0x612   : > { %v4240_v36 = vor.u32 %v4750_v58, %v4239_v55  ;;  %2850 = vmatpush.bf16.msrb.mxu2 %v4188_v9  ;;  %v4496_v9 = vld [vmem:[%s6338_s9 + $0xf0] sm:$0xf]  ;;  %v4425_v55 = vor.u32 %v4798_v5, %v4424_v29  ;;  %v2476_v58 = vperm.slane %v6171_v4, 2  ;;  %v4418_v29 = vld [vmem:[%s6338_s9 + $0x58] sm:$0xf0] }
 0x613   : > { %2863 = vmatpush.bf16.msrb.mxu3 %v4296_v31 }
 0x614   : > { %2874 = vmatpush.bf16.msra.mxu0 %v4240_v36 }
 0x615   : > { %2836 = vmatpush.bf16.msrb.mxu1 %v4280_v63  ;;  %v4771_v63 = vld [vmem:[%s6216_s21 + $0x118] sm:$0xf0] }
 0x616   : > { %v4324_v1 = vor.u32 %v4771_v63, %v4323_v10  ;;  %3248 = vmatpush.bf16.msra.mxu2 %v4433_v50  ;;  %v4808_v50 = vld [vmem:[%s6338_s9 + $0xb4] sm:$0xf0] }
 0x617   : > { %2864 = vmatpush.bf16.msrb.mxu3 %v4284_v17  ;;  %v2475_v17 = vperm.slane %v6134_v0, 2 }
 0x618   : > { %2875 = vmatpush.bf16.msra.mxu0 %v4228_v62 }
 0x619   : > { %2885 = vmatpush.bf16.msra.mxu1 %v4372_v27  ;;  %v4216_v27 = vor.u32 %v4744_v2, %v4215_v40 }
 0x61a   : > { %3249 = vmatpush.bf16.msra.mxu2 %v4425_v55  ;;  %v4793_v55 = vld [vmem:[%s6338_s9 + $0x44] sm:$0xf] }
 0x61c   : > { %2876 = vmatpush.bf16.msra.mxu0 %v4216_v27  ;;  %v4814_v27 = vld [vmem:[%s6338_s9 + $0xe4] sm:$0xf0] }
 0x61d   : > { %2886 = vmatpush.bf16.msra.mxu1 %v4360_v45 }
 0x620   : > { %2877 = vmatpush.bf16.msra.mxu0 %v4204_v30  ;;  %v4480_v30 = vld [vmem:[%s6338_s9 + $0xd0] sm:$0xf] }
 0x621   : > { %2887 = vmatpush.bf16.msra.mxu1 %v4348_v49 }
 0x624   : > { %2878 = vmatpush.bf16.msra.mxu0 %v4192_v34  ;;  %v4472_v34 = vld [vmem:[%s6338_s9 + $0xc0] sm:$0xf] }
 0x625   : > { %2888 = vmatpush.bf16.msra.mxu1 %v4336_v12 }
 0x629   : > { %2889 = vmatpush.bf16.msra.mxu1 %v4324_v1 }
 0x62d   : > { %2890 = vmatpush.bf16.msra.mxu1 %v4312_v37 }
 0x631   : > { %2891 = vmatpush.bf16.msra.mxu1 %v4300_v26  ;;  %v4812_v26 = vld [vmem:[%s6338_s9 + $0xd4] sm:$0xf0] }
 0x632   : > { %v4481_v56 = vor.u32 %v4812_v26, %v4480_v30  ;;  %v4562_v30 = vld [vmem:[%s6338_s9 + $0x178] sm:$0xf0] }
 0x635   : > { %2892 = vmatpush.bf16.msra.mxu1 %v4288_v28  ;;  %v4810_v28 = vld [vmem:[%s6338_s9 + $0xc4] sm:$0xf0] }
 0x670   : > { %v2443_v42 = vpop.xlane.xlu2 %2442 }
 0x671   : > { %v2447_v25 = vmul.f32 0.0055555557, %v2443_v42 }
 0x673   : > { %v2449_v57 = vadd.f32 1e-05, %v2447_v25 }
 0x675   : > { %4997 = vrsqrt.f32 %v2449_v57  ;;  %vm2457_vm13 = vweird.f32 %v2449_v57 }
 0x678   : > { %v2446_v20 = vpop.xlane.xlu0 %2445 }
 0x679   : > { %v2448_v6 = vmul.f32 0.0055555557, %v2446_v20 }
 0x67b   : > { %v4998_v13 = vpop.eup %4997  ;;  %v2450_v41 = vadd.f32 1e-05, %v2448_v6 }
 0x67c   : > { %v2452_v18 = vmul.f32 %v4998_v13, %v2449_v57  ;;  %vm2458_vm7 = vweird.f32 %v4998_v13  ;;  %v4497_v57 = vor.u32 %v4816_v59, %v4496_v9  ;;  %v4384_v9 = vld [vmem:[%s6338_s9 + $0x10] sm:$0xf]  ;;  %v4788_v59 = vld [vmem:[%s6338_s9 + $0x14] sm:$0xf0] }
 0x67d   : > { %4999 = vrsqrt.f32 %v2450_v41  ;;  %vm2459_vm14 = vmor %vm2457_vm13, %vm2458_vm7  ;;  %vm2467_vm0 = vweird.f32 %v2450_v41 }
 0x67e   : > { %v2453_v24 = vmul.f32 %v4998_v13, %v2452_v18  ;;  %3262 = vmatpush.bf16.msra.mxu3 %v4497_v57  ;;  %v4794_v18 = vld [vmem:[%s6338_s9 + $0x44] sm:$0xf0]  ;;  %v4410_v57 = vld [vmem:[%s6338_s9 + $0x48] sm:$0xf0] }
 0x67f   : > { %v4409_v19 = vor.u32 %v4794_v18, %v4408_v38 }
 0x680   : > { %v2454_v45 = vmul.f32 0.5, %v2453_v24  ;;  %v4437_v24 = vor.u32 %v4799_v22, %v4434_v23  ;;  %v4802_v22 = vld [vmem:[%s6338_s9 + $0x84] sm:$0xf0]  ;;  %v4831_v23 = vld [vmem:[%s6338_s9 + $0x174] sm:$0xf] }
 0x681   : > { %v4565_v26 = vor.u32 %v4831_v23, %v4562_v30 }
 0x682   : > { %v2455_v33 = vsub.f32 1.5, %v2454_v45  ;;  %v4792_v45 = vld [vmem:[%s6338_s9 + $0x34] sm:$0xf0] }
 0x683   : > { %v5000_v35 = vpop.eup %4999  ;;  %v4401_v43 = vor.u32 %v4792_v45, %v4400_v21  ;;  %v4828_v21 = vld [vmem:[%s6338_s9 + $0x154] sm:$0xf0]  ;;  %v4787_v45 = vld [vmem:[%s6338_s9 + $0x14] sm:$0xf] }
 0x684   : > { %v2456_v54 = vmul.f32 %v4998_v13, %v2455_v33  ;;  %v2462_v42 = vmul.f32 %v5000_v35, %v2450_v41  ;;  %vm2468_vm15 = vweird.f32 %v5000_v35  ;;  %v4488_v41 = vld [vmem:[%s6338_s9 + $0xe0] sm:$0xf]  ;;  %v4426_v33 = vld [vmem:[%s6338_s9 + $0x68] sm:$0xf0] }
 0x685   : > { %vm2469_vm1 = vmor %vm2467_vm0, %vm2468_vm15  ;;  %v4489_v37 = vor.u32 %v4814_v27, %v4488_v41  ;;  %v4394_v41 = vld [vmem:[%s6338_s9 + $0x28] sm:$0xf0]  ;;  %v4813_v27 = vld [vmem:[%s6338_s9 + $0xe4] sm:$0xf] }
 0x686   : > { %v2463_v31 = vmul.f32 %v5000_v35, %v2462_v42  ;;  %v2460_v25 = vsel %vm2459_vm14, %v4998_v13, %v2456_v54  ;;  %v4473_v54 = vor.u32 %v4810_v28, %v4472_v34  ;;  %v4392_v42 = vld [vmem:[%s6338_s9 + $0x20] sm:$0xf]  ;;  %v2556_v34 = vperm.slane %v6134_v0, 7 }
 0x687   : > { %v2471_v15 = vmul.f32 %v2460_v25, %v6227_v32  ;;  %v2472_v36 = vmul.f32 %v2460_v25, %v6231_v51  ;;  %3263 = vmatpush.bf16.msra.mxu3 %v4489_v37  ;;  %v4421_v25 = vor.u32 %v4795_v48, %v4418_v29  ;;  %v4490_v37 = vld [vmem:[%s6338_s9 + $0xe8] sm:$0xf0]  ;;  %v4536_v48 = vld [vmem:[%s6338_s9 + $0x140] sm:$0xf]  ;;  %v4826_v29 = vld [vmem:[%s6338_s9 + $0x144] sm:$0xf0] }
 0x688   : > { %v2464_v49 = vmul.f32 0.5, %v2463_v31  ;;  %v4790_v31 = vld [vmem:[%s6338_s9 + $0x24] sm:$0xf0]  ;;  %v4493_v18 = vor.u32 %v4813_v27, %v4490_v37  ;;  %v4537_v0 = vor.u32 %v4826_v29, %v4536_v48  ;;  %v4522_v48 = vld [vmem:[%s6338_s9 + $0x128] sm:$0xf0] }
 0x689   : > { %v2477_v10 = vmul.f32 %v2475_v17, %v2471_v15  ;;  %v2478_v62 = vmul.f32 %v2476_v58, %v2472_v36  ;;  %v4393_v47 = vor.u32 %v4790_v31, %v4392_v42  ;;  %v4806_v15 = vld [vmem:[%s6338_s9 + $0xa4] sm:$0xf0]  ;;  %v4829_v42 = vld [vmem:[%s6338_s9 + $0x164] sm:$0xf]  ;;  %v4554_v31 = vld [vmem:[%s6338_s9 + $0x168] sm:$0xf0] }
 0x68a   : > { %v2465_v53 = vsub.f32 1.5, %v2464_v49  ;;  %v4464_v49 = vld [vmem:[%s6338_s9 + $0xb0] sm:$0xf]  ;;  %v4504_v29 = vld [vmem:[%s6338_s9 + $0x100] sm:$0xf] }
 0x68b   : > { %v2483_v1 = vadd.f32 %v2481_v44, %v2477_v10  ;;  %v2484_v2 = vadd.f32 %v2482_v46, %v2478_v62  ;;  %3264 = vmatpush.bf16.msra.mxu3 %v4481_v56  ;;  %v4465_v5 = vor.u32 %v4808_v50, %v4464_v49  ;;  %v4832_v10 = vld [vmem:[%s6338_s9 + $0x174] sm:$0xf0]  ;;  %v4791_v62 = vld [vmem:[%s6338_s9 + $0x34] sm:$0xf]  ;;  %v4544_v56 = vld [vmem:[%s6338_s9 + $0x150] sm:$0xf] }
 0x68c   : > { %v2466_v52 = vmul.f32 %v5000_v35, %v2465_v53  ;;  %v4385_v53 = vor.u32 %v4788_v59, %v4384_v9  ;;  %v4809_v9 = vld [vmem:[%s6338_s9 + $0xc4] sm:$0xf]  ;;  %v4474_v59 = vld [vmem:[%s6338_s9 + $0xc8] sm:$0xf0] }
 0x68e   : > { %v2470_v12 = vsel %vm2469_vm1, %v5000_v35, %v2466_v52  ;;  %v4429_v35 = vor.u32 %v4797_v39, %v4426_v33  ;;  %v4376_v52 = vld [vmem:[%s6338_s9] sm:$0xf]  ;;  %v4386_v39 = vld [vmem:[%s6338_s9 + $0x18] sm:$0xf0]  ;;  %v4811_v33 = vld [vmem:[%s6338_s9 + $0xd4] sm:$0xf] }
 0x68f   : > { %v2473_v63 = vmul.f32 %v2470_v12, %v6238_v61  ;;  %v2474_v20 = vmul.f32 %v2470_v12, %v6242_v60  ;;  %v4416_v61 = vld [vmem:[%s6338_s9 + $0x50] sm:$0xf]  ;;  %v4796_v60 = vld [vmem:[%s6338_s9 + $0x54] sm:$0xf0]  ;;  %3265 = vmatpush.bf16.msra.mxu3 %v4473_v54  ;;  %v4786_v12 = vld [vmem:[%s6338_s9 + $0x4] sm:$0xf0]  ;;  %v4389_v28 = vor.u32 %v4787_v45, %v4386_v39 }
 0x690   : > { %v4417_v13 = vor.u32 %v4796_v60, %v4416_v61  ;;  %v4830_v61 = vld [vmem:[%s6338_s9 + $0x164] sm:$0xf0]  ;;  %v4789_v60 = vld [vmem:[%s6338_s9 + $0x24] sm:$0xf]  ;;  %v4820_v45 = vld [vmem:[%s6338_s9 + $0x114] sm:$0xf0] }
 0x691   : > { %v2479_v32 = vmul.f32 %v2475_v17, %v2473_v63  ;;  %v2480_v51 = vmul.f32 %v2476_v58, %v2474_v20  ;;  %v4413_v17 = vor.u32 %v4793_v55, %v4410_v57  ;;  %v4456_v58 = vld [vmem:[%s6338_s9 + $0xa0] sm:$0xf]  ;;  %v4402_v20 = vld [vmem:[%s6338_s9 + $0x38] sm:$0xf0]  ;;  %v4397_v38 = vor.u32 %v4789_v60, %v4394_v41  ;;  %v4458_v60 = vld [vmem:[%s6338_s9 + $0xa8] sm:$0xf0] }
 0x692   : > { %3250 = vmatpush.bf16.msra.mxu2 %v4417_v13  ;;  %v4457_v36 = vor.u32 %v4806_v15, %v4456_v58  ;;  %v4477_v57 = vor.u32 %v4809_v9, %v4474_v59  ;;  %v4546_v58 = vld [vmem:[%s6338_s9 + $0x158] sm:$0xf0]  ;;  %v4442_v9 = vld [vmem:[%s6338_s9 + $0x88] sm:$0xf0] }
 0x693   : > { %v2485_v40 = vadd.f32 %v2481_v44, %v2479_v32  ;;  %v2486_v3 = vadd.f32 %v2482_v46, %v2480_v51  ;;  %3266 = vmatpush.bf16.msra.mxu3 %v4465_v5  ;;  %v4377_v44 = vor.u32 %v4786_v12, %v4376_v52  ;;  %v4560_v46 = vld [vmem:[%s6338_s9 + $0x170] sm:$0xf]  ;;  %v4815_v32 = vld [vmem:[%s6338_s9 + $0xf4] sm:$0xf]  ;;  %v4498_v51 = vld [vmem:[%s6338_s9 + $0xf8] sm:$0xf0] }
 0x694   : > { %v4561_v63 = vor.u32 %v4832_v10, %v4560_v46  ;;  %v4378_v5 = vld [vmem:[%s6338_s9 + $0x8] sm:$0xf0]  ;;  %v4528_v52 = vld [vmem:[%s6338_s9 + $0x130] sm:$0xf]  ;;  %v4824_v12 = vld [vmem:[%s6338_s9 + $0x134] sm:$0xf0] }
 0x695   : > { %v2487_v6 = vpack.c.bf16 %v2485_v40, %v2483_v1  ;;  %v2488_v8 = vpack.c.bf16 %v2486_v3, %v2484_v2  ;;  %v4405_v1 = vor.u32 %v4791_v62, %v4402_v20  ;;  %v4501_v40 = vor.u32 %v4815_v32, %v4498_v51  ;;  %v4448_v2 = vld [vmem:[%s6338_s9 + $0x90] sm:$0xf]  ;;  %v4804_v3 = vld [vmem:[%s6338_s9 + $0x94] sm:$0xf0]  ;;  %v4466_v62 = vld [vmem:[%s6338_s9 + $0xb8] sm:$0xf0] }
 0x696   : > { %3251 = vmatpush.bf16.msra.mxu2 %v4409_v19  ;;  %v4440_v19 = vld [vmem:[%s6338_s9 + $0x80] sm:$0xf]  ;;  %v2557_v46 = vperm.slane %v6171_v4, 7  ;;  %v4529_v10 = vor.u32 %v4824_v12, %v4528_v52  ;;  %v4825_v32 = vld [vmem:[%s6338_s9 + $0x144] sm:$0xf] }
 0x697   : > { %2823 = vmatmul.bf16.vlgmr.msrb.gmra.mxu0 %v2487_v6  ;;  %2837 = vmatmul.bf16.vlgmr.msrb.gmra.mxu1 %v2488_v8  ;;  %v4538_v51 = vld [vmem:[%s6338_s9 + $0x148] sm:$0xf0]  ;;  %v4514_v52 = vld [vmem:[%s6338_s9 + $0x118] sm:$0xf0] }
 0x698   : > { %2851 = vmatmul.bf16.vlgmr.msrb.gmra.mxu2 %v2487_v6  ;;  %2865 = vmatmul.bf16.vlgmr.msrb.gmra.mxu3 %v2488_v8  ;;  %v4541_v4 = vor.u32 %v4825_v32, %v4538_v51 }
 0x699   : > { %3290 = vmatpush.bf16.msrb.mxu1 %v4437_v24  ;;  %3267 = vmatpush.bf16.msra.mxu3 %v4457_v36  ;;  %v4441_v24 = vor.u32 %v4802_v22, %v4440_v19  ;;  %v4823_v19 = vld [vmem:[%s6338_s9 + $0x134] sm:$0xf]  ;;  %v4530_v22 = vld [vmem:[%s6338_s9 + $0x138] sm:$0xf0] }
 0x69a   : > { %3252 = vmatpush.bf16.msra.mxu2 %v4401_v43  ;;  %3276 = vmatpush.bf16.msrb.mxu0 %v4561_v63  ;;  %v4545_v43 = vor.u32 %v4828_v21, %v4544_v56  ;;  %v4533_v30 = vor.u32 %v4823_v19, %v4530_v22  ;;  %v4512_v21 = vld [vmem:[%s6338_s9 + $0x110] sm:$0xf] }
 0x69d   : > { %3291 = vmatpush.bf16.msrb.mxu1 %v4429_v35  ;;  %v4482_v35 = vld [vmem:[%s6338_s9 + $0xd8] sm:$0xf0] }
 0x69e   : > { %3253 = vmatpush.bf16.msra.mxu2 %v4393_v47  ;;  %v4485_v54 = vor.u32 %v4811_v33, %v4482_v35  ;;  %v4557_v47 = vor.u32 %v4829_v42, %v4554_v31  ;;  %v4513_v33 = vor.u32 %v4820_v45, %v4512_v21  ;;  %v4450_v35 = vld [vmem:[%s6338_s9 + $0x98] sm:$0xf0] }
 0x6a1   : > { %3292 = vmatpush.bf16.msrb.mxu1 %v4421_v25  ;;  %v4785_v25 = vld [vmem:[%s6338_s9 + $0x4] sm:$0xf] }
 0x6a2   : > { %3254 = vmatpush.bf16.msra.mxu2 %v4385_v53  ;;  %v4381_v55 = vor.u32 %v4785_v25, %v4378_v5  ;;  %v4801_v5 = vld [vmem:[%s6338_s9 + $0x84] sm:$0xf] }
 0x6a5   : > { %3293 = vmatpush.bf16.msrb.mxu1 %v4413_v17  ;;  %v4827_v17 = vld [vmem:[%s6338_s9 + $0x154] sm:$0xf] }
 0x6a6   : > { %3255 = vmatpush.bf16.msra.mxu2 %v4377_v44  ;;  %v4549_v15 = vor.u32 %v4827_v17, %v4546_v58  ;;  %v4807_v44 = vld [vmem:[%s6338_s9 + $0xb4] sm:$0xf]  ;;  %v4445_v58 = vor.u32 %v4801_v5, %v4442_v9 }
 0x6a7   : > { %2879 = vmatmul.bf16.vlgmr.msra.gmra.mxu0 %v2487_v6  ;;  %2893 = vmatmul.bf16.vlgmr.msra.gmra.mxu1 %v2488_v8  ;;  %v4449_v6 = vor.u32 %v4804_v3, %v4448_v2  ;;  %v4552_v8 = vld [vmem:[%s6338_s9 + $0x160] sm:$0xf]  ;;  %v4469_v20 = vor.u32 %v4807_v44, %v4466_v62 }
 0x6a8   : > { %v4553_v13 = vor.u32 %v4830_v61, %v4552_v8  ;;  %v4805_v61 = vld [vmem:[%s6338_s9 + $0xa4] sm:$0xf] }
 0x6a9   : > { %3294 = vmatpush.bf16.msrb.mxu1 %v4405_v1  ;;  %3268 = vmatpush.bf16.msra.mxu3 %v4449_v6  ;;  %v4520_v1 = vld [vmem:[%s6338_s9 + $0x120] sm:$0xf]  ;;  %v4461_v37 = vor.u32 %v4805_v61, %v4458_v60 }
 0x6aa   : > { %3304 = vmatpush.bf16.msrb.mxu2 %v4501_v40  ;;  %3277 = vmatpush.bf16.msrb.mxu0 %v4553_v13  ;;  %v4822_v40 = vld [vmem:[%s6338_s9 + $0x124] sm:$0xf0] }
 0x6ab   : > { %v4521_v8 = vor.u32 %v4822_v40, %v4520_v1 }
 0x6ad   : > { %3295 = vmatpush.bf16.msrb.mxu1 %v4397_v38  ;;  %3269 = vmatpush.bf16.msra.mxu3 %v4441_v24  ;;  %v6440_v24 = vld [vmem:[%s5614_s27 + $0x10] sm:$0xff] }
 0x6ae   : > { %3305 = vmatpush.bf16.msrb.mxu2 %v4493_v18  ;;  %3278 = vmatpush.bf16.msrb.mxu0 %v4545_v43  ;;  %v4803_v43 = vld [vmem:[%s6338_s9 + $0x94] sm:$0xf] }
 0x6af   : > { %v4453_v42 = vor.u32 %v4803_v43, %v4450_v35 }
 0x6b1   : > { %3318 = vmatpush.bf16.msrb.mxu3 %v4565_v26  ;;  %3296 = vmatpush.bf16.msrb.mxu1 %v4389_v28 }
 0x6b2   : > { %3306 = vmatpush.bf16.msrb.mxu2 %v4485_v54  ;;  %3279 = vmatpush.bf16.msrb.mxu0 %v4537_v0  ;;  %v2558_v54 = vperm.slane %v6440_v24, 7  ;;  %v4818_v0 = vld [vmem:[%s6338_s9 + $0x104] sm:$0xf0] }
 0x6b3   : > { %v4505_v17 = vor.u32 %v4818_v0, %v4504_v29 }
 0x6b5   : > { %3319 = vmatpush.bf16.msrb.mxu3 %v4557_v47  ;;  %3297 = vmatpush.bf16.msrb.mxu1 %v4381_v55  ;;  %v4821_v47 = vld [vmem:[%s6338_s9 + $0x124] sm:$0xf] }
 0x6b6   : > { %3307 = vmatpush.bf16.msrb.mxu2 %v4477_v57  ;;  %3280 = vmatpush.bf16.msrb.mxu0 %v4529_v10 }
 0x6b9   : > { %3320 = vmatpush.bf16.msrb.mxu3 %v4549_v15  ;;  %v4819_v15 = vld [vmem:[%s6338_s9 + $0x114] sm:$0xf] }
 0x6ba   : > { %3308 = vmatpush.bf16.msrb.mxu2 %v4469_v20  ;;  %3281 = vmatpush.bf16.msrb.mxu0 %v4521_v8  ;;  %v4517_v62 = vor.u32 %v4819_v15, %v4514_v52 }
 0x6bd   : > { %3321 = vmatpush.bf16.msrb.mxu3 %v4541_v4  ;;  %v4506_v4 = vld [vmem:[%s6338_s9 + $0x108] sm:$0xf0] }
 0x6be   : > { %3309 = vmatpush.bf16.msrb.mxu2 %v4461_v37  ;;  %3282 = vmatpush.bf16.msrb.mxu0 %v4513_v33 }
 0x6c1   : > { %3322 = vmatpush.bf16.msrb.mxu3 %v4533_v30 }
 0x6c2   : > { %3310 = vmatpush.bf16.msrb.mxu2 %v4453_v42  ;;  %3283 = vmatpush.bf16.msrb.mxu0 %v4505_v17 }
 0x6c6   : > { %3311 = vmatpush.bf16.msrb.mxu2 %v4445_v58 }
 0x714   : > { %v2824_v49 = vpop.f32.mrf.mxu0  ;;  %v2838_v50 = vpop.f32.mrf.mxu1 }
 0x715   : > { %v2825_v53 = vadd.f32 %v2824_v49, %v2556_v34 }
 0x717   : > { %v6419_v36 = vadd.f32 %v2838_v50, %v2825_v53  ;;  %v4525_v50 = vor.u32 %v4821_v47, %v4522_v48 }
 0x719   : > { %v2905_v63 = vmul.f32 0.044715, %v6419_v36  ;;  %3323 = vmatpush.bf16.msrb.mxu3 %v4525_v50  ;;  %v2899_v45 = vmul.f32 0.5, %v6419_v36 }
 0x71b   : > { %v2911_v2 = vmul.f32 %v2905_v63, %v6419_v36  ;;  %v2852_v3 = vpop.f32.mrf.mxu2  ;;  %v2866_v6 = vpop.f32.mrf.mxu3 }
 0x71c   : > { %v2853_v13 = vadd.f32 %v2852_v3, %v2557_v46  ;;  %v2826_v41 = vpop.f32.mrf.mxu0  ;;  %v2840_v27 = vpop.f32.mrf.mxu1 }
 0x71d   : > { %v2917_v38 = vmul.f32 %v2911_v2, %v6419_v36  ;;  %v2827_v18 = vadd.f32 %v2826_v41, %v2556_v34  ;;  %3324 = vmatpush.bf16.msrb.mxu3 %v4517_v62 }
 0x71e   : > { %v6437_v23 = vadd.f32 %v2866_v6, %v2853_v13  ;;  %v4817_v6 = vld [vmem:[%s6338_s9 + $0x104] sm:$0xf] }
 0x71f   : > { %v2923_v26 = vadd.f32 %v2917_v38, %v6419_v36  ;;  %v6443_v56 = vadd.f32 %v2840_v27, %v2827_v18  ;;  %v4509_v61 = vor.u32 %v4817_v6, %v4506_v4 }
 0x720   : > { %v2906_v39 = vmul.f32 0.044715, %v6437_v23  ;;  %v2900_v36 = vmul.f32 0.5, %v6437_v23 }
 0x721   : > { %v2929_v34 = vmul.f32 0.7978846, %v2923_v26  ;;  %v2908_v28 = vmul.f32 0.044715, %v6443_v56  ;;  %3325 = vmatpush.bf16.msrb.mxu3 %v4509_v61  ;;  %v2902_v43 = vmul.f32 0.5, %v6443_v56 }
 0x722   : > { %v2912_v31 = vmul.f32 %v2906_v39, %v6437_v23 }
 0x723   : > { %v2914_v25 = vmul.f32 %v2908_v28, %v6443_v56  ;;  %v2854_v49 = vpop.f32.mrf.mxu2  ;;  %v2868_v44 = vpop.f32.mrf.mxu3  ;;  %5001 = vtanh.f32 %v2929_v34 }
 0x724   : > { %v2918_v59 = vmul.f32 %v2912_v31, %v6437_v23  ;;  %v2855_v53 = vadd.f32 %v2854_v49, %v2557_v46  ;;  %v2880_v55 = vpop.f32.mrf.mxu0  ;;  %v2894_v57 = vpop.f32.mrf.mxu1 }
 0x725   : > { %v2920_v12 = vmul.f32 %v2914_v25, %v6443_v56  ;;  %v2881_v10 = vadd.f32 %v2880_v55, %v2558_v54 }
 0x726   : > { %v2924_v63 = vadd.f32 %v2918_v59, %v6437_v23  ;;  %v2869_v20 = vadd.f32 %v2868_v44, %v2855_v53 }
 0x727   : > { %v2926_v46 = vadd.f32 %v2920_v12, %v6443_v56  ;;  %v2895_v32 = vadd.f32 %v2894_v57, %v2881_v10  ;;  %v5019_v12 = vld [vmem:[%s5614_s27] sm:$0xff] }
 0x728   : > { %v2909_v51 = vmul.f32 0.044715, %v2869_v20  ;;  %v2930_v2 = vmul.f32 0.7978846, %v2924_v63  ;;  %v2903_v49 = vmul.f32 0.5, %v2869_v20  ;;  %v3006_v44 = vperm.slane %v5019_v12, 6 }
 0x729   : > { %v2932_v1 = vmul.f32 0.7978846, %v2926_v46  ;;  %v2907_v40 = vmul.f32 0.044715, %v2895_v32  ;;  %v5002_v41 = vpop.eup %5001  ;;  %v2901_v55 = vmul.f32 0.5, %v2895_v32 }
 0x72a   : > { %v2915_v3 = vmul.f32 %v2909_v51, %v2869_v20  ;;  %v2941_v30 = vadd.f32 1.0, %v5002_v41 }
 0x72b   : > { %v2913_v8 = vmul.f32 %v2907_v40, %v2895_v32  ;;  %5003 = vtanh.f32 %v2932_v1 }
 0x72c   : > { %v2921_v60 = vmul.f32 %v2915_v3, %v2869_v20  ;;  %v2882_v13 = vpop.f32.mrf.mxu0  ;;  %v2896_v18 = vpop.f32.mrf.mxu1  ;;  %5005 = vtanh.f32 %v2930_v2  ;;  %v2947_v28 = vmul.f32 %v2941_v30, %v2899_v45  ;;  %v5020_v3 = vld [vmem:[%s5614_s27 + $0x8] sm:$0xff] }
 0x72d   : > { %v2919_v27 = vmul.f32 %v2913_v8, %v2895_v32  ;;  %v2883_v37 = vadd.f32 %v2882_v13, %v2558_v54  ;;  %v3007_v6 = vperm.slane %v5020_v3, 6 }
 0x72e   : > { %v2927_v38 = vadd.f32 %v2921_v60, %v2869_v20 }
 0x72f   : > { %v2925_v19 = vadd.f32 %v2919_v27, %v2895_v32  ;;  %v2897_v22 = vadd.f32 %v2896_v18, %v2883_v37 }
 0x730   : > { %v2933_v24 = vmul.f32 0.7978846, %v2927_v38 }
 0x731   : > { %v5004_v26 = vpop.eup %5003  ;;  %v2910_v21 = vmul.f32 0.044715, %v2897_v22  ;;  %v2931_v33 = vmul.f32 0.7978846, %v2925_v19  ;;  %v2904_v57 = vmul.f32 0.5, %v2897_v22 }
 0x732   : > { %v2944_v39 = vadd.f32 1.0, %v5004_v26  ;;  %5007 = vtanh.f32 %v2933_v24  ;;  %v5006_v34 = vpop.eup %5005 }
 0x733   : > { %v2916_v35 = vmul.f32 %v2910_v21, %v2897_v22  ;;  %v2942_v48 = vadd.f32 1.0, %v5006_v34  ;;  %5009 = vtanh.f32 %v2931_v33 }
 0x734   : > { %v2950_v54 = vmul.f32 %v2944_v39, %v2902_v43 }
 0x735   : > { %v2922_v42 = vmul.f32 %v2916_v35, %v2897_v22  ;;  %v2948_v50 = vmul.f32 %v2942_v48, %v2900_v36 }
 0x736   : > { %v2953_v31 = vpack.c.bf16 %v2950_v54, %v2947_v28 }
 0x737   : > { %v2928_v47 = vadd.f32 %v2922_v42, %v2897_v22 }
 0x738   : > { %v5008_v29 = vpop.eup %5007  ;;  %3256 = vmatmul.bf16.vlgmr.msra.gmra.mxu2 %v2953_v31  ;;  %3298 = vmatmul.bf16.vlgmr.msrb.gmra.mxu1 %v2953_v31 }
 0x739   : > { %v2934_v25 = vmul.f32 0.7978846, %v2928_v47  ;;  %v2945_v56 = vadd.f32 1.0, %v5008_v29  ;;  %v5010_v5 = vpop.eup %5009 }
 0x73a   : > { %v2943_v59 = vadd.f32 1.0, %v5010_v5 }
 0x73b   : > { %v2951_v0 = vmul.f32 %v2945_v56, %v2903_v49  ;;  %5011 = vtanh.f32 %v2934_v25 }
 0x73c   : > { %v2949_v58 = vmul.f32 %v2943_v59, %v2901_v55 }
 0x73d   : > { %v2954_v9 = vpack.c.bf16 %v2951_v0, %v2948_v50 }
 0x73f   : > { %3270 = vmatmul.bf16.vlgmr.msra.gmra.mxu3 %v2954_v9 }
 0x741   : > { %v5012_v53 = vpop.eup %5011 }
 0x742   : > { %v2946_v17 = vadd.f32 1.0, %v5012_v53 }
 0x744   : > { %v2952_v15 = vmul.f32 %v2946_v17, %v2904_v57 }
 0x746   : > { %v2955_v52 = vpack.c.bf16 %v2952_v15, %v2949_v58 }
 0x748   : > { %3284 = vmatmul.bf16.vlgmr.msrb.gmra.mxu0 %v2955_v52  ;;  %3312 = vmatmul.bf16.vlgmr.msrb.gmra.mxu2 %v2954_v9 }
 0x74f   : > { %3326 = vmatmul.bf16.vlgmr.msrb.gmra.mxu3 %v2955_v52 }
 0x7b5   : > { %v3299_v1 = vpop.f32.mrf.mxu1 }
 0x7b6   : > { %v3300_v13 = vadd.f32 %v3299_v1, %v3007_v6 }
 0x7bb   : > { %v3257_v23 = vpop.f32.mrf.mxu2 }
 0x7bc   : > { %v3258_v10 = vadd.f32 %v3257_v23, %v3006_v44 }
 0x7bd   : > { %v3301_v18 = vpop.f32.mrf.mxu1 }
 0x7be   : > { %v3302_v22 = vadd.f32 %v3301_v18, %v3007_v6 }
 0x7c2   : > { %v3271_v62 = vpop.f32.mrf.mxu3 }
 0x7c3   : > { %v3259_v63 = vpop.f32.mrf.mxu2  ;;  %v3272_v20 = vadd.f32 %v3271_v62, %v3258_v10 }
 0x7c4   : > { %v3260_v40 = vadd.f32 %v3259_v63, %v3006_v44 }
 0x7c5   : > { %v3285_v46 = vpop.f32.mrf.mxu0 }
 0x7c6   : > { %v3286_v51 = vadd.f32 %v3285_v46, %v3272_v20 }
 0x7c8   : > { %v3332_v32 = vadd.f32 %v3286_v51, %v6201_v16 }
 0x7ca   : > { %3336 = vst [vmem:[#allocation2 + $0x10] sm:$0xff] %v3332_v32  ;;  %v3273_v2 = vpop.f32.mrf.mxu3 }
 0x7cb   : > { %v3274_v4 = vadd.f32 %v3273_v2, %v3260_v40  ;;  %v3313_v8 = vpop.f32.mrf.mxu2 }
 0x7cc   : > { %v3314_v27 = vadd.f32 %v3313_v8, %v3300_v13 }
 0x7cd   : > { %v3287_v61 = vpop.f32.mrf.mxu0 }
 0x7ce   : > { %v3288_v60 = vadd.f32 %v3287_v61, %v3274_v4 }
 0x7d0   : > { %v3334_v41 = vadd.f32 %v3288_v60, %v6208_v11 }
 0x7d2   : > { %3338 = vst [vmem:[#allocation2 + $0x18] sm:$0xff] %v3334_v41  ;;  %v3327_v37 = vpop.f32.mrf.mxu3 }
 0x7d3   : > { %v3328_v38 = vadd.f32 %v3327_v37, %v3314_v27  ;;  %v3315_v19 = vpop.f32.mrf.mxu2 }
 0x7d4   : > { %v3316_v24 = vadd.f32 %v3315_v19, %v3302_v22 }
 0x7d5   : > { %v3333_v16 = vadd.f32 %v3328_v38, %v6199_v14 }
 0x7d7   : > { %3337 = vst [vmem:[#allocation2] sm:$0xff] %v3333_v16 }
 0x7da   : > { %v3329_v30 = vpop.f32.mrf.mxu3 }
 0x7db   : > { %v3330_v26 = vadd.f32 %v3329_v30, %v3316_v24  ;;  %3343 = sbr.rel (%p4566_p8) target bundleno = 2020 (0x7e4), region = 80 }
 0x7dd   : > { %v3335_v21 = vadd.f32 %v3330_v26, %v6206_v7 }
 0x7df   : > { %3339 = vst [vmem:[#allocation2 + $0x8] sm:$0xff] %v3335_v21 }
 0x7e0   : > { %3344 = vst [vmem:[#allocation14] sm:$0xff] %v3332_v32 }
 0x7e1   : > { %3345 = vst [vmem:[#allocation14 + $0x8] sm:$0xff] %v3333_v16 }
 0x7e2   : > { %3346 = vst [vmem:[#allocation14 + $0x10] sm:$0xff] %v3334_v41 }
 0x7e3   : > { %3347 = vst [vmem:[#allocation14 + $0x18] sm:$0xff] %v3335_v21 }
 0x7e4 PF: > { %p4892_p9 = scmp.eq.s32.totalorder %s3488_s30, 7  ;;  %s3359_s19 = sshll.u32 %s6499_s7, 4  ;;  %s3360_s19 = int_to_ptr.hbm [resolvable:$true] %s3359_s19 }
 0x7e5   : > { %s5287_s13 = smov [#allocation14]   ;;  %s5288_s16 = smov 256  }
 0x7e6   : > { %s3357_s29 = sshll.u32 %s5287_s13, 4  ;;  %s5289_s20 = smov 16   ;;  %s3358_s29 = int_to_ptr.vmem [resolvable:$true] %s3357_s29 }
 0x7e7   : > { %4858 = dma.vmem_to_hbm [thread:$0]  (%p4892_p9), %s3358_s29, 512, %s3360_s19, [#allocation5], %s5288_s16, %s5288_s16, %s5289_s20  }
 0x7e8   : > { %5258 = dma.done.wait (%p4892_p9), [#allocation5], 512  }
 0x7e9   : > { %5260 = vsyncadd (%p4892_p9), [#allocation5], 4294966784 }
 0x7ea PF: > { %s22_s26 = sadd.s32 1, %s5271_s26   ;;  %s6519_s24 = smov %s5267_s25 }
 0x7eb   : > { %p19_p10 = scmp.ge.s32.totalorder %s22_s26, 10   ;;  %s6520_s25 = smov %s6522_s28 }
 0x7ed   :  { %21 = sbr.rel (!%p19_p10) target bundleno = 6 (0x6), region = 115 }
 0x7f2   :  { %3376 = vsyncpa [#allocation4], 1 }
 0x7f3   :  { %3378 = vsyncpa [#allocation4 + $0x1], 1 }
 0x7f4   :  { %3379 = vsyncpa [#allocation7], 1 }
 0x7f5   :  { %3380 = vsyncpa [#allocation10], 1 }
 0x7f6   :  { %3381 = vsyncpa [#allocation13], 1 }
 0x7f7   :  { %3382 = vsyncpa [#allocation5], 1 }
 0x7f8   :  { %3384 = vsyncpa [#allocation5 + $0x1], 1 }

</bundles_post_ra>
